<compile_context>
chip_gen: v7x
topology: tpu7x:2x2x1
jax: 0.10.0
libtpu: 0.0.40
codegen_flags: <defaults>
</compile_context>

<pallas_src>
import functools

import jax
import jax.numpy as jnp
import numpy as np
from jax.experimental import pallas as pl
from jax.experimental.pallas import tpu as pltpu


# ---------------------------------------------------------------------------
# Trace-time constant: stride-2 row selector (built with numpy, baked in).
# ---------------------------------------------------------------------------
def _make_stride2_selector(bb: int, n: int) -> np.ndarray:
    """0/1 matrix S of shape (bb*m*m, bb*n*n): S @ rows(b,h,w) -> rows(b,2h,2w)."""
    m = n // 2
    sel = np.zeros((bb * m * m, bb * n * n), np.float32)
    r = np.arange(bb * m * m)
    b = r // (m * m)
    ho = (r % (m * m)) // m
    wo = r % m
    q = b * n * n + (2 * ho) * n + (2 * wo)
    sel[r, q] = 1.0
    return sel


# ---------------------------------------------------------------------------
# Fused whole-network Pallas kernel
# ---------------------------------------------------------------------------
def _net_kernel(
    x_ref, sel_ref,
    w1_ref, b1_ref,
    wp2_ref, bp2_ref, wp3_ref, bp3_ref,
    wv2_ref, bv2_ref, wv3_ref, bv3_ref,
    wv4_ref, bv4_ref,
    policy_ref, values_ref,
    pad_x, pad_p1, pad_p2, pad_v1, pad_v2,
    *, bb: int, n: int,
):
    m = n // 2
    f32 = jnp.float32

    # Zero the padded scratch buffers: the 1-pixel halo must be zero and the
    # scratch is uninitialized / reused across grid steps.  (~90 KB, trivial.)
    pad_x[...] = jnp.zeros_like(pad_x)
    pad_p1[...] = jnp.zeros_like(pad_p1)
    pad_p2[...] = jnp.zeros_like(pad_p2)
    pad_v1[...] = jnp.zeros_like(pad_v1)
    pad_v2[...] = jnp.zeros_like(pad_v2)

    def im2col(pref, H, W, C):
        # pref holds a zero halo around a (bb, H, W, C) interior.  Returns the
        # (bb*H*W, 9*C) patch matrix; columns ordered (kh, kw, cin) to match
        # an HWIO weight reshaped to (9*C, Cout).
        cols = []
        for kh in range(3):
            for kw in range(3):
                tap = pref[:, kh:kh + H, kw:kw + W, :]          # (bb, H, W, C)
                cols.append(tap.reshape(bb * H * W, C))
        return jnp.concatenate(cols, axis=-1)

    def dense(patches, w_ref, b_ref, relu):
        y = jnp.dot(patches, w_ref[...], preferred_element_type=f32) + b_ref[...]
        return jnp.maximum(y, 0.0) if relu else y

    # ---- layer 1: policy_l1 + value_l1 fused (Cout = 32 + 32), K = 9*2 -----
    pad_x[:, 1:n + 1, 1:n + 1, :] = x_ref[...]
    h1 = dense(im2col(pad_x, n, n, 2), w1_ref, b1_ref, relu=True)   # (bb*n*n, 64)

    # ---- policy branch ------------------------------------------------------
    pad_p1[:, 1:n + 1, 1:n + 1, :] = h1[:, :32].reshape(bb, n, n, 32)
    hp2 = dense(im2col(pad_p1, n, n, 32), wp2_ref, bp2_ref, relu=True)
    pad_p2[:, 1:n + 1, 1:n + 1, :] = hp2.reshape(bb, n, n, 32)
    p3 = dense(im2col(pad_p2, n, n, 32), wp3_ref, bp3_ref, relu=False)  # (bb*n*n, 1)
    # Lane-dense policy store: spatial positions on the lane axis.
    p3_row = jnp.transpose(p3)                                      # (1, bb*n*n)
    for b in range(bb):
        policy_ref[b:b + 1, :] = p3_row[:, b * n * n:(b + 1) * n * n]

    # ---- value branch -------------------------------------------------------
    pad_v1[:, 1:n + 1, 1:n + 1, :] = h1[:, 32:].reshape(bb, n, n, 32)
    hv2 = dense(im2col(pad_v1, n, n, 32), wv2_ref, bv2_ref, relu=True)   # (bb*n*n, 32)
    # stride-2 conv == stride-1 conv subsampled at even (h, w); subsample with
    # a selection matmul on the MXU (no strided slicing, no XLA glue).
    hv2s = jnp.dot(sel_ref[...], hv2, preferred_element_type=f32)        # (bb*m*m, 32)
    pad_v2[:, 1:m + 1, 1:m + 1, :] = hv2s.reshape(bb, m, m, 32)
    hv3 = dense(im2col(pad_v2, m, m, 32), wv3_ref, bv3_ref, relu=True)   # (bb*m*m, 32)

    # ---- value_l4 linear, fused (weight rows pre-permuted to (h, w) x c) ----
    w4 = wv4_ref[...]                                                    # (m*m, 32)
    b4 = bv4_ref[...]                                                    # (1, 1)
    for b in range(bb):
        vb = hv3[b * m * m:(b + 1) * m * m, :]                           # (m*m, 32)
        s = jnp.sum(vb * w4, axis=-1, keepdims=True)                     # (m*m, 1)
        s = jnp.sum(s, axis=0, keepdims=True)                            # (1, 1)
        values_ref[b:b + 1, :] = s + b4


# ---------------------------------------------------------------------------
# Parameters (synthetic, HWIO layout) and one-time weight repack for the kernel
# ---------------------------------------------------------------------------
def init_params(key, n: int = 8):
    ks = jax.random.split(key, 10)

    def wconv(k, cin, cout, std=0.1):
        return (std * jax.random.normal(k, (3, 3, cin, cout))).astype(jnp.float32)

    # NOTE: synthetic weights (not a PyTorch checkpoint / exact torch init).
    return {
        "p1_w": wconv(ks[0], 2, 32), "p1_b": jnp.zeros((1, 32), jnp.float32),
        "p2_w": wconv(ks[1], 32, 32), "p2_b": jnp.zeros((1, 32), jnp.float32),
        "p3_w": wconv(ks[2], 32, 1, std=0.05),
        "p3_b": (0.01 * jax.random.normal(ks[3], (1, 1))).astype(jnp.float32),
        "v1_w": wconv(ks[4], 2, 32), "v1_b": jnp.zeros((1, 32), jnp.float32),
        "v2_w": wconv(ks[5], 32, 32), "v2_b": jnp.zeros((1, 32), jnp.float32),
        "v3_w": wconv(ks[6], 32, 32, std=0.05),
        "v3_b": (0.01 * jax.random.normal(ks[7], (1, 32))).astype(jnp.float32),
        "v4_w": (0.05 * jax.random.normal(ks[8], (32 * (n // 2) ** 2, 1))).astype(jnp.float32),
        "v4_b": (0.01 * jax.random.normal(ks[9], (1, 1))).astype(jnp.float32),
    }


def prepare_fused_params(params, n: int = 8):
    """One-time repack of HWIO conv weights into the kernel's matmul layouts."""
    m = n // 2

    def flat(w):                       # (3,3,Cin,Cout) -> (9*Cin, Cout), rows (kh,kw,cin)
        kh, kw, ci, co = w.shape
        return jnp.reshape(w, (kh * kw * ci, co))

    w1 = jnp.concatenate([params["p1_w"], params["v1_w"]], axis=-1)   # (3,3,2,64)
    b1 = jnp.concatenate([params["p1_b"], params["v1_b"]], axis=-1)   # (1,64)
    # value_l4 weight: torch flattens (C,H,W); kernel rows are (h,w) with c on
    # lanes -> permute once here so no activation transpose is needed.
    wv4 = jnp.transpose(jnp.reshape(params["v4_w"], (32, m, m)), (1, 2, 0))
    wv4 = jnp.reshape(wv4, (m * m, 32))
    return {
        "w1": flat(w1), "b1": b1,
        "wp2": flat(params["p2_w"]), "bp2": params["p2_b"],
        "wp3": flat(params["p3_w"]), "bp3": params["p3_b"],
        "wv2": flat(params["v2_w"]), "bv2": params["v2_b"],
        "wv3": flat(params["v3_w"]), "bv3": params["v3_b"],
        "wv4": wv4, "bv4": params["v4_b"],
    }


# ---------------------------------------------------------------------------
# Public forward: one fused pallas_call
# ---------------------------------------------------------------------------
def net_forward(state_nchw, fused, *, batch_block=None):
    """state_nchw: (B, 2, n, n) f32 -> (policy (B,1,n,n), values (B,1))."""
    B, _, n, _ = state_nchw.shape
    m = n // 2
    bb = B if (batch_block is None or B % batch_block != 0) else batch_block
    nb = B // bb

    x = jnp.transpose(state_nchw, (0, 2, 3, 1))        # NCHW -> NHWC (only glue op)
    sel = jnp.asarray(_make_stride2_selector(bb, n))   # trace-time constant
    f32 = jnp.float32
    fp = fused

    def full(arr):
        nd = arr.ndim
        return pl.BlockSpec(arr.shape, lambda i, _nd=nd: (0,) * _nd)

    in_specs = [
        pl.BlockSpec((bb, n, n, 2), lambda i: (i, 0, 0, 0)),
        full(sel),
        full(fp["w1"]), full(fp["b1"]),
        full(fp["wp2"]), full(fp["bp2"]), full(fp["wp3"]), full(fp["bp3"]),
        full(fp["wv2"]), full(fp["bv2"]), full(fp["wv3"]), full(fp["bv3"]),
        full(fp["wv4"]), full(fp["bv4"]),
    ]
    out_specs = (
        pl.BlockSpec((bb, n * n), lambda i: (i, 0)),
        pl.BlockSpec((bb, 1), lambda i: (i, 0)),
    )
    scratch_shapes = [
        pltpu.VMEM((bb, n + 2, n + 2, 2), f32),     # padded input
        pltpu.VMEM((bb, n + 2, n + 2, 32), f32),    # padded policy_l1 out
        pltpu.VMEM((bb, n + 2, n + 2, 32), f32),    # padded policy_l2 out
        pltpu.VMEM((bb, n + 2, n + 2, 32), f32),    # padded value_l1 out
        pltpu.VMEM((bb, m + 2, m + 2, 32), f32),    # padded value_l2 out (4x4)
    ]

    policy_flat, values = pl.pallas_call(
        functools.partial(_net_kernel, bb=bb, n=n),
        out_shape=(
            jax.ShapeDtypeStruct((B, n * n), f32),
            jax.ShapeDtypeStruct((B, 1), f32),
        ),
        grid=(nb,),
        in_specs=in_specs,
        out_specs=out_specs,
        scratch_shapes=scratch_shapes,
        compiler_params=pltpu.CompilerParams(
            dimension_semantics=("parallel",)),
    )(x, sel,
      fp["w1"], fp["b1"],
      fp["wp2"], fp["bp2"], fp["wp3"], fp["bp3"],
      fp["wv2"], fp["bv2"], fp["wv3"], fp["bv3"],
      fp["wv4"], fp["bv4"])

    policy = policy_flat.reshape(B, 1, n, n)           # free bitcast
    return policy, values


# ---------------------------------------------------------------------------
# Pure-JAX reference (for correctness check)
# ---------------------------------------------------------------------------
def _conv_ref(x_nhwc, w_hwio, b, *, relu, stride=1):
    out = jax.lax.conv_general_dilated(
        x_nhwc, w_hwio,
        window_strides=(stride, stride),
        padding=((1, 1), (1, 1)),
        dimension_numbers=("NHWC", "HWIO", "NHWC"),
    ) + b.reshape(1, 1, 1, -1)
    return jnp.maximum(out, 0.0) if relu else out


def net_forward_ref(state_nchw, params):
    x = jnp.transpose(state_nchw, (0, 2, 3, 1))
    p = _conv_ref(x, params["p1_w"], params["p1_b"], relu=True)
    p = _conv_ref(p, params["p2_w"], params["p2_b"], relu=True)
    p = _conv_ref(p, params["p3_w"], params["p3_b"], relu=False)
    policy = jnp.transpose(p, (0, 3, 1, 2))

    v = _conv_ref(x, params["v1_w"], params["v1_b"], relu=True)
    v = _conv_ref(v, params["v2_w"], params["v2_b"], relu=True, stride=2)
    v = _conv_ref(v, params["v3_w"], params["v3_b"], relu=True)
    v_flat = jnp.transpose(v, (0, 3, 1, 2)).reshape(v.shape[0], -1)   # torch .view order
    values = v_flat @ params["v4_w"] + params["v4_b"]
    return policy, values


# ---------------------------------------------------------------------------
if __name__ == "__main__":
    n = 8
    batch = 2
    key = jax.random.PRNGKey(0)
    k_param, k_state = jax.random.split(key)

    params = init_params(k_param, n=n)
    fused = prepare_fused_params(params, n=n)        # one-time weight repack
    state = jax.random.normal(k_state, (batch, 2, n, n), dtype=jnp.float32)

    fwd = jax.jit(net_forward)
    policy, values = fwd(state, fused)
    jax.block_until_ready((policy, values))

    # correctness check against pure-JAX reference
    policy_ref, values_ref = net_forward_ref(state, params)
    np.testing.assert_allclose(np.asarray(policy), np.asarray(policy_ref),
                               rtol=1e-4, atol=1e-4)
    np.testing.assert_allclose(np.asarray(values), np.asarray(values_ref),
                               rtol=1e-4, atol=1e-4)

    assert policy.shape == (batch, 1, n, n)
    assert values.shape == (batch, 1)
    print("KERNEL_OK")
</pallas_src>

<mosaic_0001>
module attributes {stable_mosaic.version = 11 : i64} {
  func.func @_net_kernel(%arg0: i32, %arg1: memref<2x8x8x2xf32, #tpu.memory_space<vmem>>, %arg2: memref<32x128xf32, #tpu.memory_space<vmem>>, %arg3: memref<18x64xf32, #tpu.memory_space<vmem>>, %arg4: memref<1x64xf32, #tpu.memory_space<vmem>>, %arg5: memref<288x32xf32, #tpu.memory_space<vmem>>, %arg6: memref<1x32xf32, #tpu.memory_space<vmem>>, %arg7: memref<288x1xf32, #tpu.memory_space<vmem>>, %arg8: memref<1x1xf32, #tpu.memory_space<vmem>>, %arg9: memref<288x32xf32, #tpu.memory_space<vmem>>, %arg10: memref<1x32xf32, #tpu.memory_space<vmem>>, %arg11: memref<288x32xf32, #tpu.memory_space<vmem>>, %arg12: memref<1x32xf32, #tpu.memory_space<vmem>>, %arg13: memref<16x32xf32, #tpu.memory_space<vmem>>, %arg14: memref<1x1xf32, #tpu.memory_space<vmem>>, %arg15: memref<2x64xf32, #tpu.memory_space<vmem>>, %arg16: memref<2x1xf32, #tpu.memory_space<vmem>>, %arg17: memref<2x10x10x2xf32, #tpu.memory_space<vmem>>, %arg18: memref<2x10x10x32xf32, #tpu.memory_space<vmem>>, %arg19: memref<2x10x10x32xf32, #tpu.memory_space<vmem>>, %arg20: memref<2x10x10x32xf32, #tpu.memory_space<vmem>>, %arg21: memref<2x6x6x32xf32, #tpu.memory_space<vmem>>) attributes {dimension_semantics = [#tpu.dimension_semantics<parallel>], iteration_bounds = array<i64: 1>, scalar_prefetch = 0 : i64, scratch_operands = 5 : i64, tpu.core_type = #tpu.core_type<tc>, window_params = [{transform_indices = @transform_0, window_bounds = array<i64: 2, 8, 8, 2>}, {pipeline_mode = #tpu.pipeline_mode<synchronous>, transform_indices = @transform_1, window_bounds = array<i64: 32, 128>}, {pipeline_mode = #tpu.pipeline_mode<synchronous>, transform_indices = @transform_2, window_bounds = array<i64: 18, 64>}, {pipeline_mode = #tpu.pipeline_mode<synchronous>, transform_indices = @transform_3, window_bounds = array<i64: 1, 64>}, {pipeline_mode = #tpu.pipeline_mode<synchronous>, transform_indices = @transform_4, window_bounds = array<i64: 288, 32>}, {pipeline_mode = #tpu.pipeline_mode<synchronous>, transform_indices = @transform_5, window_bounds = array<i64: 1, 32>}, {pipeline_mode = #tpu.pipeline_mode<synchronous>, transform_indices = @transform_6, window_bounds = array<i64: 288, 1>}, {pipeline_mode = #tpu.pipeline_mode<synchronous>, transform_indices = @transform_7, window_bounds = array<i64: 1, 1>}, {pipeline_mode = #tpu.pipeline_mode<synchronous>, transform_indices = @transform_8, window_bounds = array<i64: 288, 32>}, {pipeline_mode = #tpu.pipeline_mode<synchronous>, transform_indices = @transform_9, window_bounds = array<i64: 1, 32>}, {pipeline_mode = #tpu.pipeline_mode<synchronous>, transform_indices = @transform_10, window_bounds = array<i64: 288, 32>}, {pipeline_mode = #tpu.pipeline_mode<synchronous>, transform_indices = @transform_11, window_bounds = array<i64: 1, 32>}, {pipeline_mode = #tpu.pipeline_mode<synchronous>, transform_indices = @transform_12, window_bounds = array<i64: 16, 32>}, {pipeline_mode = #tpu.pipeline_mode<synchronous>, transform_indices = @transform_13, window_bounds = array<i64: 1, 1>}, {transform_indices = @transform_14, window_bounds = array<i64: 2, 64>}, {transform_indices = @transform_15, window_bounds = array<i64: 2, 1>}]} {
    %cst = arith.constant 0.000000e+00 : f32
    %0 = vector.broadcast %cst : f32 to vector<2x10x10x2xf32>
    %c0 = arith.constant 0 : index
    %c0_0 = arith.constant 0 : index
    %c0_1 = arith.constant 0 : index
    %c0_2 = arith.constant 0 : index
    %1 = vector.load %arg17[%c0, %c0_0, %c0_1, %c0_2] : memref<2x10x10x2xf32, #tpu.memory_space<vmem>>, vector<2x10x10x2xf32>
    tpu.vector_store %arg17[%c0, %c0_0, %c0_1, %c0_2], %0 {strides = array<i32>} : memref<2x10x10x2xf32, #tpu.memory_space<vmem>>, vector<2x10x10x2xf32>,
    %cst_3 = arith.constant 0.000000e+00 : f32
    %2 = vector.broadcast %cst_3 : f32 to vector<2x10x10x32xf32>
    %c0_4 = arith.constant 0 : index
    %c0_5 = arith.constant 0 : index
    %c0_6 = arith.constant 0 : index
    %c0_7 = arith.constant 0 : index
    %3 = vector.load %arg18[%c0_4, %c0_5, %c0_6, %c0_7] : memref<2x10x10x32xf32, #tpu.memory_space<vmem>>, vector<2x10x10x32xf32>
    tpu.vector_store %arg18[%c0_4, %c0_5, %c0_6, %c0_7], %2 {strides = array<i32>} : memref<2x10x10x32xf32, #tpu.memory_space<vmem>>, vector<2x10x10x32xf32>,
    %cst_8 = arith.constant 0.000000e+00 : f32
    %4 = vector.broadcast %cst_8 : f32 to vector<2x10x10x32xf32>
    %c0_9 = arith.constant 0 : index
    %c0_10 = arith.constant 0 : index
    %c0_11 = arith.constant 0 : index
    %c0_12 = arith.constant 0 : index
    %5 = vector.load %arg19[%c0_9, %c0_10, %c0_11, %c0_12] : memref<2x10x10x32xf32, #tpu.memory_space<vmem>>, vector<2x10x10x32xf32>
    tpu.vector_store %arg19[%c0_9, %c0_10, %c0_11, %c0_12], %4 {strides = array<i32>} : memref<2x10x10x32xf32, #tpu.memory_space<vmem>>, vector<2x10x10x32xf32>,
    %cst_13 = arith.constant 0.000000e+00 : f32
    %6 = vector.broadcast %cst_13 : f32 to vector<2x10x10x32xf32>
    %c0_14 = arith.constant 0 : index
    %c0_15 = arith.constant 0 : index
    %c0_16 = arith.constant 0 : index
    %c0_17 = arith.constant 0 : index
    %7 = vector.load %arg20[%c0_14, %c0_15, %c0_16, %c0_17] : memref<2x10x10x32xf32, #tpu.memory_space<vmem>>, vector<2x10x10x32xf32>
    tpu.vector_store %arg20[%c0_14, %c0_15, %c0_16, %c0_17], %6 {strides = array<i32>} : memref<2x10x10x32xf32, #tpu.memory_space<vmem>>, vector<2x10x10x32xf32>,
    %cst_18 = arith.constant 0.000000e+00 : f32
    %8 = vector.broadcast %cst_18 : f32 to vector<2x6x6x32xf32>
    %c0_19 = arith.constant 0 : index
    %c0_20 = arith.constant 0 : index
    %c0_21 = arith.constant 0 : index
    %c0_22 = arith.constant 0 : index
    %9 = vector.load %arg21[%c0_19, %c0_20, %c0_21, %c0_22] : memref<2x6x6x32xf32, #tpu.memory_space<vmem>>, vector<2x6x6x32xf32>
    tpu.vector_store %arg21[%c0_19, %c0_20, %c0_21, %c0_22], %8 {strides = array<i32>} : memref<2x6x6x32xf32, #tpu.memory_space<vmem>>, vector<2x6x6x32xf32>,
    %c0_23 = arith.constant 0 : index
    %c0_24 = arith.constant 0 : index
    %c0_25 = arith.constant 0 : index
    %c0_26 = arith.constant 0 : index
    %10 = vector.load %arg1[%c0_23, %c0_24, %c0_25, %c0_26] : memref<2x8x8x2xf32, #tpu.memory_space<vmem>>, vector<2x8x8x2xf32>
    %c0_27 = arith.constant 0 : index
    %c1 = arith.constant 1 : index
    %c1_28 = arith.constant 1 : index
    %c0_29 = arith.constant 0 : index
    %11 = vector.load %arg17[%c0_27, %c1, %c1_28, %c0_29] : memref<2x10x10x2xf32, #tpu.memory_space<vmem>>, vector<2x8x8x2xf32>
    tpu.vector_store %arg17[%c0_27, %c1, %c1_28, %c0_29], %10 {strides = array<i32>} : memref<2x10x10x2xf32, #tpu.memory_space<vmem>>, vector<2x8x8x2xf32>,
    %c0_30 = arith.constant 0 : index
    %c0_31 = arith.constant 0 : index
    %c0_32 = arith.constant 0 : index
    %c0_33 = arith.constant 0 : index
    %12 = vector.load %arg17[%c0_30, %c0_31, %c0_32, %c0_33] : memref<2x10x10x2xf32, #tpu.memory_space<vmem>>, vector<2x8x8x2xf32>
    %13 = vector.shape_cast %12 : vector<2x8x8x2xf32> to vector<128x2xf32>
    %c0_34 = arith.constant 0 : index
    %c0_35 = arith.constant 0 : index
    %c1_36 = arith.constant 1 : index
    %c0_37 = arith.constant 0 : index
    %14 = vector.load %arg17[%c0_34, %c0_35, %c1_36, %c0_37] : memref<2x10x10x2xf32, #tpu.memory_space<vmem>>, vector<2x8x8x2xf32>
    %15 = vector.shape_cast %14 : vector<2x8x8x2xf32> to vector<128x2xf32>
    %c0_38 = arith.constant 0 : index
    %c0_39 = arith.constant 0 : index
    %c2 = arith.constant 2 : index
    %c0_40 = arith.constant 0 : index
    %16 = vector.load %arg17[%c0_38, %c0_39, %c2, %c0_40] : memref<2x10x10x2xf32, #tpu.memory_space<vmem>>, vector<2x8x8x2xf32>
    %17 = vector.shape_cast %16 : vector<2x8x8x2xf32> to vector<128x2xf32>
    %c0_41 = arith.constant 0 : index
    %c1_42 = arith.constant 1 : index
    %c0_43 = arith.constant 0 : index
    %c0_44 = arith.constant 0 : index
    %18 = vector.load %arg17[%c0_41, %c1_42, %c0_43, %c0_44] : memref<2x10x10x2xf32, #tpu.memory_space<vmem>>, vector<2x8x8x2xf32>
    %19 = vector.shape_cast %18 : vector<2x8x8x2xf32> to vector<128x2xf32>
    %c0_45 = arith.constant 0 : index
    %c1_46 = arith.constant 1 : index
    %c1_47 = arith.constant 1 : index
    %c0_48 = arith.constant 0 : index
    %20 = vector.load %arg17[%c0_45, %c1_46, %c1_47, %c0_48] : memref<2x10x10x2xf32, #tpu.memory_space<vmem>>, vector<2x8x8x2xf32>
    %21 = vector.shape_cast %20 : vector<2x8x8x2xf32> to vector<128x2xf32>
    %c0_49 = arith.constant 0 : index
    %c1_50 = arith.constant 1 : index
    %c2_51 = arith.constant 2 : index
    %c0_52 = arith.constant 0 : index
    %22 = vector.load %arg17[%c0_49, %c1_50, %c2_51, %c0_52] : memref<2x10x10x2xf32, #tpu.memory_space<vmem>>, vector<2x8x8x2xf32>
    %23 = vector.shape_cast %22 : vector<2x8x8x2xf32> to vector<128x2xf32>
    %c0_53 = arith.constant 0 : index
    %c2_54 = arith.constant 2 : index
    %c0_55 = arith.constant 0 : index
    %c0_56 = arith.constant 0 : index
    %24 = vector.load %arg17[%c0_53, %c2_54, %c0_55, %c0_56] : memref<2x10x10x2xf32, #tpu.memory_space<vmem>>, vector<2x8x8x2xf32>
    %25 = vector.shape_cast %24 : vector<2x8x8x2xf32> to vector<128x2xf32>
    %c0_57 = arith.constant 0 : index
    %c2_58 = arith.constant 2 : index
    %c1_59 = arith.constant 1 : index
    %c0_60 = arith.constant 0 : index
    %26 = vector.load %arg17[%c0_57, %c2_58, %c1_59, %c0_60] : memref<2x10x10x2xf32, #tpu.memory_space<vmem>>, vector<2x8x8x2xf32>
    %27 = vector.shape_cast %26 : vector<2x8x8x2xf32> to vector<128x2xf32>
    %c0_61 = arith.constant 0 : index
    %c2_62 = arith.constant 2 : index
    %c2_63 = arith.constant 2 : index
    %c0_64 = arith.constant 0 : index
    %28 = vector.load %arg17[%c0_61, %c2_62, %c2_63, %c0_64] : memref<2x10x10x2xf32, #tpu.memory_space<vmem>>, vector<2x8x8x2xf32>
    %29 = vector.shape_cast %28 : vector<2x8x8x2xf32> to vector<128x2xf32>
    %30 = tpu.concatenate %13, %15, %17, %19, %21, %23, %25, %27, %29 in 1 : vector<128x2xf32>, vector<128x2xf32>, vector<128x2xf32>, vector<128x2xf32>, vector<128x2xf32>, vector<128x2xf32>, vector<128x2xf32>, vector<128x2xf32>, vector<128x2xf32> -> vector<128x18xf32>
    %c0_65 = arith.constant 0 : index
    %c0_66 = arith.constant 0 : index
    %31 = vector.load %arg3[%c0_65, %c0_66] : memref<18x64xf32, #tpu.memory_space<vmem>>, vector<18x64xf32>
    %cst_67 = arith.constant dense<0.000000e+00> : vector<128x64xf32>
    %32 = tpu.matmul %30, %31, %cst_67 {dimension_numbers = #tpu.dot_dimension_numbers<[1], [0], [0], [1], [0, 0, 1, 1], [], []>} : vector<128x18xf32>, vector<18x64xf32>, vector<128x64xf32> -> vector<128x64xf32>
    %c0_68 = arith.constant 0 : index
    %c0_69 = arith.constant 0 : index
    %33 = vector.load %arg4[%c0_68, %c0_69] : memref<1x64xf32, #tpu.memory_space<vmem>>, vector<1x64xf32>
    %34 = vector.broadcast %33 : vector<1x64xf32> to vector<128x64xf32>
    %35 = arith.addf %32, %34 : vector<128x64xf32>
    %cst_70 = arith.constant 0.000000e+00 : f32
    %36 = vector.broadcast %cst_70 : f32 to vector<128x64xf32>
    %37 = arith.maximumf %35, %36 : vector<128x64xf32>
    %38 = vector.extract_strided_slice %37 {offsets = [0, 0], sizes = [128, 32], strides = [1, 1]} : vector<128x64xf32> to vector<128x32xf32>
    %39 = vector.shape_cast %38 : vector<128x32xf32> to vector<2x8x8x32xf32>
    %c0_71 = arith.constant 0 : index
    %c1_72 = arith.constant 1 : index
    %c1_73 = arith.constant 1 : index
    %c0_74 = arith.constant 0 : index
    %40 = vector.load %arg18[%c0_71, %c1_72, %c1_73, %c0_74] : memref<2x10x10x32xf32, #tpu.memory_space<vmem>>, vector<2x8x8x32xf32>
    tpu.vector_store %arg18[%c0_71, %c1_72, %c1_73, %c0_74], %39 {strides = array<i32>} : memref<2x10x10x32xf32, #tpu.memory_space<vmem>>, vector<2x8x8x32xf32>,
    %c0_75 = arith.constant 0 : index
    %c0_76 = arith.constant 0 : index
    %c0_77 = arith.constant 0 : index
    %c0_78 = arith.constant 0 : index
    %41 = vector.load %arg18[%c0_75, %c0_76, %c0_77, %c0_78] : memref<2x10x10x32xf32, #tpu.memory_space<vmem>>, vector<2x8x8x32xf32>
    %42 = vector.shape_cast %41 : vector<2x8x8x32xf32> to vector<128x32xf32>
    %c0_79 = arith.constant 0 : index
    %c0_80 = arith.constant 0 : index
    %c1_81 = arith.constant 1 : index
    %c0_82 = arith.constant 0 : index
    %43 = vector.load %arg18[%c0_79, %c0_80, %c1_81, %c0_82] : memref<2x10x10x32xf32, #tpu.memory_space<vmem>>, vector<2x8x8x32xf32>
    %44 = vector.shape_cast %43 : vector<2x8x8x32xf32> to vector<128x32xf32>
    %c0_83 = arith.constant 0 : index
    %c0_84 = arith.constant 0 : index
    %c2_85 = arith.constant 2 : index
    %c0_86 = arith.constant 0 : index
    %45 = vector.load %arg18[%c0_83, %c0_84, %c2_85, %c0_86] : memref<2x10x10x32xf32, #tpu.memory_space<vmem>>, vector<2x8x8x32xf32>
    %46 = vector.shape_cast %45 : vector<2x8x8x32xf32> to vector<128x32xf32>
    %c0_87 = arith.constant 0 : index
    %c1_88 = arith.constant 1 : index
    %c0_89 = arith.constant 0 : index
    %c0_90 = arith.constant 0 : index
    %47 = vector.load %arg18[%c0_87, %c1_88, %c0_89, %c0_90] : memref<2x10x10x32xf32, #tpu.memory_space<vmem>>, vector<2x8x8x32xf32>
    %48 = vector.shape_cast %47 : vector<2x8x8x32xf32> to vector<128x32xf32>
    %c0_91 = arith.constant 0 : index
    %c1_92 = arith.constant 1 : index
    %c1_93 = arith.constant 1 : index
    %c0_94 = arith.constant 0 : index
    %49 = vector.load %arg18[%c0_91, %c1_92, %c1_93, %c0_94] : memref<2x10x10x32xf32, #tpu.memory_space<vmem>>, vector<2x8x8x32xf32>
    %50 = vector.shape_cast %49 : vector<2x8x8x32xf32> to vector<128x32xf32>
    %c0_95 = arith.constant 0 : index
    %c1_96 = arith.constant 1 : index
    %c2_97 = arith.constant 2 : index
    %c0_98 = arith.constant 0 : index
    %51 = vector.load %arg18[%c0_95, %c1_96, %c2_97, %c0_98] : memref<2x10x10x32xf32, #tpu.memory_space<vmem>>, vector<2x8x8x32xf32>
    %52 = vector.shape_cast %51 : vector<2x8x8x32xf32> to vector<128x32xf32>
    %c0_99 = arith.constant 0 : index
    %c2_100 = arith.constant 2 : index
    %c0_101 = arith.constant 0 : index
    %c0_102 = arith.constant 0 : index
    %53 = vector.load %arg18[%c0_99, %c2_100, %c0_101, %c0_102] : memref<2x10x10x32xf32, #tpu.memory_space<vmem>>, vector<2x8x8x32xf32>
    %54 = vector.shape_cast %53 : vector<2x8x8x32xf32> to vector<128x32xf32>
    %c0_103 = arith.constant 0 : index
    %c2_104 = arith.constant 2 : index
    %c1_105 = arith.constant 1 : index
    %c0_106 = arith.constant 0 : index
    %55 = vector.load %arg18[%c0_103, %c2_104, %c1_105, %c0_106] : memref<2x10x10x32xf32, #tpu.memory_space<vmem>>, vector<2x8x8x32xf32>
    %56 = vector.shape_cast %55 : vector<2x8x8x32xf32> to vector<128x32xf32>
    %c0_107 = arith.constant 0 : index
    %c2_108 = arith.constant 2 : index
    %c2_109 = arith.constant 2 : index
    %c0_110 = arith.constant 0 : index
    %57 = vector.load %arg18[%c0_107, %c2_108, %c2_109, %c0_110] : memref<2x10x10x32xf32, #tpu.memory_space<vmem>>, vector<2x8x8x32xf32>
    %58 = vector.shape_cast %57 : vector<2x8x8x32xf32> to vector<128x32xf32>
    %59 = tpu.concatenate %42, %44, %46, %48, %50, %52, %54, %56, %58 in 1 : vector<128x32xf32>, vector<128x32xf32>, vector<128x32xf32>, vector<128x32xf32>, vector<128x32xf32>, vector<128x32xf32>, vector<128x32xf32>, vector<128x32xf32>, vector<128x32xf32> -> vector<128x288xf32>
    %c0_111 = arith.constant 0 : index
    %c0_112 = arith.constant 0 : index
    %60 = vector.load %arg5[%c0_111, %c0_112] : memref<288x32xf32, #tpu.memory_space<vmem>>, vector<288x32xf32>
    %cst_113 = arith.constant dense<0.000000e+00> : vector<128x32xf32>
    %61 = tpu.matmul %59, %60, %cst_113 {dimension_numbers = #tpu.dot_dimension_numbers<[1], [0], [0], [1], [0, 0, 1, 1], [], []>} : vector<128x288xf32>, vector<288x32xf32>, vector<128x32xf32> -> vector<128x32xf32>
    %c0_114 = arith.constant 0 : index
    %c0_115 = arith.constant 0 : index
    %62 = vector.load %arg6[%c0_114, %c0_115] : memref<1x32xf32, #tpu.memory_space<vmem>>, vector<1x32xf32>
    %63 = vector.broadcast %62 : vector<1x32xf32> to vector<128x32xf32>
    %64 = arith.addf %61, %63 : vector<128x32xf32>
    %cst_116 = arith.constant 0.000000e+00 : f32
    %65 = vector.broadcast %cst_116 : f32 to vector<128x32xf32>
    %66 = arith.maximumf %64, %65 : vector<128x32xf32>
    %67 = vector.shape_cast %66 : vector<128x32xf32> to vector<2x8x8x32xf32>
    %c0_117 = arith.constant 0 : index
    %c1_118 = arith.constant 1 : index
    %c1_119 = arith.constant 1 : index
    %c0_120 = arith.constant 0 : index
    %68 = vector.load %arg19[%c0_117, %c1_118, %c1_119, %c0_120] : memref<2x10x10x32xf32, #tpu.memory_space<vmem>>, vector<2x8x8x32xf32>
    tpu.vector_store %arg19[%c0_117, %c1_118, %c1_119, %c0_120], %67 {strides = array<i32>} : memref<2x10x10x32xf32, #tpu.memory_space<vmem>>, vector<2x8x8x32xf32>,
    %c0_121 = arith.constant 0 : index
    %c0_122 = arith.constant 0 : index
    %c0_123 = arith.constant 0 : index
    %c0_124 = arith.constant 0 : index
    %69 = vector.load %arg19[%c0_121, %c0_122, %c0_123, %c0_124] : memref<2x10x10x32xf32, #tpu.memory_space<vmem>>, vector<2x8x8x32xf32>
    %70 = vector.shape_cast %69 : vector<2x8x8x32xf32> to vector<128x32xf32>
    %c0_125 = arith.constant 0 : index
    %c0_126 = arith.constant 0 : index
    %c1_127 = arith.constant 1 : index
    %c0_128 = arith.constant 0 : index
    %71 = vector.load %arg19[%c0_125, %c0_126, %c1_127, %c0_128] : memref<2x10x10x32xf32, #tpu.memory_space<vmem>>, vector<2x8x8x32xf32>
    %72 = vector.shape_cast %71 : vector<2x8x8x32xf32> to vector<128x32xf32>
    %c0_129 = arith.constant 0 : index
    %c0_130 = arith.constant 0 : index
    %c2_131 = arith.constant 2 : index
    %c0_132 = arith.constant 0 : index
    %73 = vector.load %arg19[%c0_129, %c0_130, %c2_131, %c0_132] : memref<2x10x10x32xf32, #tpu.memory_space<vmem>>, vector<2x8x8x32xf32>
    %74 = vector.shape_cast %73 : vector<2x8x8x32xf32> to vector<128x32xf32>
    %c0_133 = arith.constant 0 : index
    %c1_134 = arith.constant 1 : index
    %c0_135 = arith.constant 0 : index
    %c0_136 = arith.constant 0 : index
    %75 = vector.load %arg19[%c0_133, %c1_134, %c0_135, %c0_136] : memref<2x10x10x32xf32, #tpu.memory_space<vmem>>, vector<2x8x8x32xf32>
    %76 = vector.shape_cast %75 : vector<2x8x8x32xf32> to vector<128x32xf32>
    %c0_137 = arith.constant 0 : index
    %c1_138 = arith.constant 1 : index
    %c1_139 = arith.constant 1 : index
    %c0_140 = arith.constant 0 : index
    %77 = vector.load %arg19[%c0_137, %c1_138, %c1_139, %c0_140] : memref<2x10x10x32xf32, #tpu.memory_space<vmem>>, vector<2x8x8x32xf32>
    %78 = vector.shape_cast %77 : vector<2x8x8x32xf32> to vector<128x32xf32>
    %c0_141 = arith.constant 0 : index
    %c1_142 = arith.constant 1 : index
    %c2_143 = arith.constant 2 : index
    %c0_144 = arith.constant 0 : index
    %79 = vector.load %arg19[%c0_141, %c1_142, %c2_143, %c0_144] : memref<2x10x10x32xf32, #tpu.memory_space<vmem>>, vector<2x8x8x32xf32>
    %80 = vector.shape_cast %79 : vector<2x8x8x32xf32> to vector<128x32xf32>
    %c0_145 = arith.constant 0 : index
    %c2_146 = arith.constant 2 : index
    %c0_147 = arith.constant 0 : index
    %c0_148 = arith.constant 0 : index
    %81 = vector.load %arg19[%c0_145, %c2_146, %c0_147, %c0_148] : memref<2x10x10x32xf32, #tpu.memory_space<vmem>>, vector<2x8x8x32xf32>
    %82 = vector.shape_cast %81 : vector<2x8x8x32xf32> to vector<128x32xf32>
    %c0_149 = arith.constant 0 : index
    %c2_150 = arith.constant 2 : index
    %c1_151 = arith.constant 1 : index
    %c0_152 = arith.constant 0 : index
    %83 = vector.load %arg19[%c0_149, %c2_150, %c1_151, %c0_152] : memref<2x10x10x32xf32, #tpu.memory_space<vmem>>, vector<2x8x8x32xf32>
    %84 = vector.shape_cast %83 : vector<2x8x8x32xf32> to vector<128x32xf32>
    %c0_153 = arith.constant 0 : index
    %c2_154 = arith.constant 2 : index
    %c2_155 = arith.constant 2 : index
    %c0_156 = arith.constant 0 : index
    %85 = vector.load %arg19[%c0_153, %c2_154, %c2_155, %c0_156] : memref<2x10x10x32xf32, #tpu.memory_space<vmem>>, vector<2x8x8x32xf32>
    %86 = vector.shape_cast %85 : vector<2x8x8x32xf32> to vector<128x32xf32>
    %87 = tpu.concatenate %70, %72, %74, %76, %78, %80, %82, %84, %86 in 1 : vector<128x32xf32>, vector<128x32xf32>, vector<128x32xf32>, vector<128x32xf32>, vector<128x32xf32>, vector<128x32xf32>, vector<128x32xf32>, vector<128x32xf32>, vector<128x32xf32> -> vector<128x288xf32>
    %c0_157 = arith.constant 0 : index
    %c0_158 = arith.constant 0 : index
    %88 = vector.load %arg7[%c0_157, %c0_158] : memref<288x1xf32, #tpu.memory_space<vmem>>, vector<288x1xf32>
    %cst_159 = arith.constant dense<0.000000e+00> : vector<128x1xf32>
    %89 = tpu.matmul %87, %88, %cst_159 {dimension_numbers = #tpu.dot_dimension_numbers<[1], [0], [0], [1], [0, 0, 1, 1], [], []>} : vector<128x288xf32>, vector<288x1xf32>, vector<128x1xf32> -> vector<128x1xf32>
    %c0_160 = arith.constant 0 : index
    %c0_161 = arith.constant 0 : index
    %90 = vector.load %arg8[%c0_160, %c0_161] : memref<1x1xf32, #tpu.memory_space<vmem>>, vector<1x1xf32>
    %91 = vector.broadcast %90 : vector<1x1xf32> to vector<128x1xf32>
    %92 = arith.addf %89, %91 : vector<128x1xf32>
    %93 = tpu.transpose %92, [1, 0] : vector<128x1xf32> -> vector<1x128xf32>
    %94 = vector.extract_strided_slice %93 {offsets = [0, 0], sizes = [1, 64], strides = [1, 1]} : vector<1x128xf32> to vector<1x64xf32>
    %c0_162 = arith.constant 0 : index
    %c0_163 = arith.constant 0 : index
    %95 = vector.load %arg15[%c0_162, %c0_163] : memref<2x64xf32, #tpu.memory_space<vmem>>, vector<1x64xf32>
    tpu.vector_store %arg15[%c0_162, %c0_163], %94 {strides = array<i32>} : memref<2x64xf32, #tpu.memory_space<vmem>>, vector<1x64xf32>,
    %96 = vector.extract_strided_slice %93 {offsets = [0, 64], sizes = [1, 64], strides = [1, 1]} : vector<1x128xf32> to vector<1x64xf32>
    %c1_164 = arith.constant 1 : index
    %c0_165 = arith.constant 0 : index
    %97 = vector.load %arg15[%c1_164, %c0_165] : memref<2x64xf32, #tpu.memory_space<vmem>>, vector<1x64xf32>
    tpu.vector_store %arg15[%c1_164, %c0_165], %96 {strides = array<i32>} : memref<2x64xf32, #tpu.memory_space<vmem>>, vector<1x64xf32>,
    %98 = vector.extract_strided_slice %37 {offsets = [0, 32], sizes = [128, 32], strides = [1, 1]} : vector<128x64xf32> to vector<128x32xf32>
    %99 = vector.shape_cast %98 : vector<128x32xf32> to vector<2x8x8x32xf32>
    %c0_166 = arith.constant 0 : index
    %c1_167 = arith.constant 1 : index
    %c1_168 = arith.constant 1 : index
    %c0_169 = arith.constant 0 : index
    %100 = vector.load %arg20[%c0_166, %c1_167, %c1_168, %c0_169] : memref<2x10x10x32xf32, #tpu.memory_space<vmem>>, vector<2x8x8x32xf32>
    tpu.vector_store %arg20[%c0_166, %c1_167, %c1_168, %c0_169], %99 {strides = array<i32>} : memref<2x10x10x32xf32, #tpu.memory_space<vmem>>, vector<2x8x8x32xf32>,
    %c0_170 = arith.constant 0 : index
    %c0_171 = arith.constant 0 : index
    %c0_172 = arith.constant 0 : index
    %c0_173 = arith.constant 0 : index
    %101 = vector.load %arg20[%c0_170, %c0_171, %c0_172, %c0_173] : memref<2x10x10x32xf32, #tpu.memory_space<vmem>>, vector<2x8x8x32xf32>
    %102 = vector.shape_cast %101 : vector<2x8x8x32xf32> to vector<128x32xf32>
    %c0_174 = arith.constant 0 : index
    %c0_175 = arith.constant 0 : index
    %c1_176 = arith.constant 1 : index
    %c0_177 = arith.constant 0 : index
    %103 = vector.load %arg20[%c0_174, %c0_175, %c1_176, %c0_177] : memref<2x10x10x32xf32, #tpu.memory_space<vmem>>, vector<2x8x8x32xf32>
    %104 = vector.shape_cast %103 : vector<2x8x8x32xf32> to vector<128x32xf32>
    %c0_178 = arith.constant 0 : index
    %c0_179 = arith.constant 0 : index
    %c2_180 = arith.constant 2 : index
    %c0_181 = arith.constant 0 : index
    %105 = vector.load %arg20[%c0_178, %c0_179, %c2_180, %c0_181] : memref<2x10x10x32xf32, #tpu.memory_space<vmem>>, vector<2x8x8x32xf32>
    %106 = vector.shape_cast %105 : vector<2x8x8x32xf32> to vector<128x32xf32>
    %c0_182 = arith.constant 0 : index
    %c1_183 = arith.constant 1 : index
    %c0_184 = arith.constant 0 : index
    %c0_185 = arith.constant 0 : index
    %107 = vector.load %arg20[%c0_182, %c1_183, %c0_184, %c0_185] : memref<2x10x10x32xf32, #tpu.memory_space<vmem>>, vector<2x8x8x32xf32>
    %108 = vector.shape_cast %107 : vector<2x8x8x32xf32> to vector<128x32xf32>
    %c0_186 = arith.constant 0 : index
    %c1_187 = arith.constant 1 : index
    %c1_188 = arith.constant 1 : index
    %c0_189 = arith.constant 0 : index
    %109 = vector.load %arg20[%c0_186, %c1_187, %c1_188, %c0_189] : memref<2x10x10x32xf32, #tpu.memory_space<vmem>>, vector<2x8x8x32xf32>
    %110 = vector.shape_cast %109 : vector<2x8x8x32xf32> to vector<128x32xf32>
    %c0_190 = arith.constant 0 : index
    %c1_191 = arith.constant 1 : index
    %c2_192 = arith.constant 2 : index
    %c0_193 = arith.constant 0 : index
    %111 = vector.load %arg20[%c0_190, %c1_191, %c2_192, %c0_193] : memref<2x10x10x32xf32, #tpu.memory_space<vmem>>, vector<2x8x8x32xf32>
    %112 = vector.shape_cast %111 : vector<2x8x8x32xf32> to vector<128x32xf32>
    %c0_194 = arith.constant 0 : index
    %c2_195 = arith.constant 2 : index
    %c0_196 = arith.constant 0 : index
    %c0_197 = arith.constant 0 : index
    %113 = vector.load %arg20[%c0_194, %c2_195, %c0_196, %c0_197] : memref<2x10x10x32xf32, #tpu.memory_space<vmem>>, vector<2x8x8x32xf32>
    %114 = vector.shape_cast %113 : vector<2x8x8x32xf32> to vector<128x32xf32>
    %c0_198 = arith.constant 0 : index
    %c2_199 = arith.constant 2 : index
    %c1_200 = arith.constant 1 : index
    %c0_201 = arith.constant 0 : index
    %115 = vector.load %arg20[%c0_198, %c2_199, %c1_200, %c0_201] : memref<2x10x10x32xf32, #tpu.memory_space<vmem>>, vector<2x8x8x32xf32>
    %116 = vector.shape_cast %115 : vector<2x8x8x32xf32> to vector<128x32xf32>
    %c0_202 = arith.constant 0 : index
    %c2_203 = arith.constant 2 : index
    %c2_204 = arith.constant 2 : index
    %c0_205 = arith.constant 0 : index
    %117 = vector.load %arg20[%c0_202, %c2_203, %c2_204, %c0_205] : memref<2x10x10x32xf32, #tpu.memory_space<vmem>>, vector<2x8x8x32xf32>
    %118 = vector.shape_cast %117 : vector<2x8x8x32xf32> to vector<128x32xf32>
    %119 = tpu.concatenate %102, %104, %106, %108, %110, %112, %114, %116, %118 in 1 : vector<128x32xf32>, vector<128x32xf32>, vector<128x32xf32>, vector<128x32xf32>, vector<128x32xf32>, vector<128x32xf32>, vector<128x32xf32>, vector<128x32xf32>, vector<128x32xf32> -> vector<128x288xf32>
    %c0_206 = arith.constant 0 : index
    %c0_207 = arith.constant 0 : index
    %120 = vector.load %arg9[%c0_206, %c0_207] : memref<288x32xf32, #tpu.memory_space<vmem>>, vector<288x32xf32>
    %cst_208 = arith.constant dense<0.000000e+00> : vector<128x32xf32>
    %121 = tpu.matmul %119, %120, %cst_208 {dimension_numbers = #tpu.dot_dimension_numbers<[1], [0], [0], [1], [0, 0, 1, 1], [], []>} : vector<128x288xf32>, vector<288x32xf32>, vector<128x32xf32> -> vector<128x32xf32>
    %c0_209 = arith.constant 0 : index
    %c0_210 = arith.constant 0 : index
    %122 = vector.load %arg10[%c0_209, %c0_210] : memref<1x32xf32, #tpu.memory_space<vmem>>, vector<1x32xf32>
    %123 = vector.broadcast %122 : vector<1x32xf32> to vector<128x32xf32>
    %124 = arith.addf %121, %123 : vector<128x32xf32>
    %cst_211 = arith.constant 0.000000e+00 : f32
    %125 = vector.broadcast %cst_211 : f32 to vector<128x32xf32>
    %126 = arith.maximumf %124, %125 : vector<128x32xf32>
    %c0_212 = arith.constant 0 : index
    %c0_213 = arith.constant 0 : index
    %127 = vector.load %arg2[%c0_212, %c0_213] : memref<32x128xf32, #tpu.memory_space<vmem>>, vector<32x128xf32>
    %cst_214 = arith.constant dense<0.000000e+00> : vector<32x32xf32>
    %128 = tpu.matmul %127, %126, %cst_214 {dimension_numbers = #tpu.dot_dimension_numbers<[1], [0], [0], [1], [0, 0, 1, 1], [], []>} : vector<32x128xf32>, vector<128x32xf32>, vector<32x32xf32> -> vector<32x32xf32>
    %129 = vector.shape_cast %128 : vector<32x32xf32> to vector<2x4x4x32xf32>
    %c0_215 = arith.constant 0 : index
    %c1_216 = arith.constant 1 : index
    %c1_217 = arith.constant 1 : index
    %c0_218 = arith.constant 0 : index
    %130 = vector.load %arg21[%c0_215, %c1_216, %c1_217, %c0_218] : memref<2x6x6x32xf32, #tpu.memory_space<vmem>>, vector<2x4x4x32xf32>
    tpu.vector_store %arg21[%c0_215, %c1_216, %c1_217, %c0_218], %129 {strides = array<i32>} : memref<2x6x6x32xf32, #tpu.memory_space<vmem>>, vector<2x4x4x32xf32>,
    %c0_219 = arith.constant 0 : index
    %c0_220 = arith.constant 0 : index
    %c0_221 = arith.constant 0 : index
    %c0_222 = arith.constant 0 : index
    %131 = vector.load %arg21[%c0_219, %c0_220, %c0_221, %c0_222] : memref<2x6x6x32xf32, #tpu.memory_space<vmem>>, vector<2x4x4x32xf32>
    %132 = vector.shape_cast %131 : vector<2x4x4x32xf32> to vector<32x32xf32>
    %c0_223 = arith.constant 0 : index
    %c0_224 = arith.constant 0 : index
    %c1_225 = arith.constant 1 : index
    %c0_226 = arith.constant 0 : index
    %133 = vector.load %arg21[%c0_223, %c0_224, %c1_225, %c0_226] : memref<2x6x6x32xf32, #tpu.memory_space<vmem>>, vector<2x4x4x32xf32>
    %134 = vector.shape_cast %133 : vector<2x4x4x32xf32> to vector<32x32xf32>
    %c0_227 = arith.constant 0 : index
    %c0_228 = arith.constant 0 : index
    %c2_229 = arith.constant 2 : index
    %c0_230 = arith.constant 0 : index
    %135 = vector.load %arg21[%c0_227, %c0_228, %c2_229, %c0_230] : memref<2x6x6x32xf32, #tpu.memory_space<vmem>>, vector<2x4x4x32xf32>
    %136 = vector.shape_cast %135 : vector<2x4x4x32xf32> to vector<32x32xf32>
    %c0_231 = arith.constant 0 : index
    %c1_232 = arith.constant 1 : index
    %c0_233 = arith.constant 0 : index
    %c0_234 = arith.constant 0 : index
    %137 = vector.load %arg21[%c0_231, %c1_232, %c0_233, %c0_234] : memref<2x6x6x32xf32, #tpu.memory_space<vmem>>, vector<2x4x4x32xf32>
    %138 = vector.shape_cast %137 : vector<2x4x4x32xf32> to vector<32x32xf32>
    %c0_235 = arith.constant 0 : index
    %c1_236 = arith.constant 1 : index
    %c1_237 = arith.constant 1 : index
    %c0_238 = arith.constant 0 : index
    %139 = vector.load %arg21[%c0_235, %c1_236, %c1_237, %c0_238] : memref<2x6x6x32xf32, #tpu.memory_space<vmem>>, vector<2x4x4x32xf32>
    %140 = vector.shape_cast %139 : vector<2x4x4x32xf32> to vector<32x32xf32>
    %c0_239 = arith.constant 0 : index
    %c1_240 = arith.constant 1 : index
    %c2_241 = arith.constant 2 : index
    %c0_242 = arith.constant 0 : index
    %141 = vector.load %arg21[%c0_239, %c1_240, %c2_241, %c0_242] : memref<2x6x6x32xf32, #tpu.memory_space<vmem>>, vector<2x4x4x32xf32>
    %142 = vector.shape_cast %141 : vector<2x4x4x32xf32> to vector<32x32xf32>
    %c0_243 = arith.constant 0 : index
    %c2_244 = arith.constant 2 : index
    %c0_245 = arith.constant 0 : index
    %c0_246 = arith.constant 0 : index
    %143 = vector.load %arg21[%c0_243, %c2_244, %c0_245, %c0_246] : memref<2x6x6x32xf32, #tpu.memory_space<vmem>>, vector<2x4x4x32xf32>
    %144 = vector.shape_cast %143 : vector<2x4x4x32xf32> to vector<32x32xf32>
    %c0_247 = arith.constant 0 : index
    %c2_248 = arith.constant 2 : index
    %c1_249 = arith.constant 1 : index
    %c0_250 = arith.constant 0 : index
    %145 = vector.load %arg21[%c0_247, %c2_248, %c1_249, %c0_250] : memref<2x6x6x32xf32, #tpu.memory_space<vmem>>, vector<2x4x4x32xf32>
    %146 = vector.shape_cast %145 : vector<2x4x4x32xf32> to vector<32x32xf32>
    %c0_251 = arith.constant 0 : index
    %c2_252 = arith.constant 2 : index
    %c2_253 = arith.constant 2 : index
    %c0_254 = arith.constant 0 : index
    %147 = vector.load %arg21[%c0_251, %c2_252, %c2_253, %c0_254] : memref<2x6x6x32xf32, #tpu.memory_space<vmem>>, vector<2x4x4x32xf32>
    %148 = vector.shape_cast %147 : vector<2x4x4x32xf32> to vector<32x32xf32>
    %149 = tpu.concatenate %132, %134, %136, %138, %140, %142, %144, %146, %148 in 1 : vector<32x32xf32>, vector<32x32xf32>, vector<32x32xf32>, vector<32x32xf32>, vector<32x32xf32>, vector<32x32xf32>, vector<32x32xf32>, vector<32x32xf32>, vector<32x32xf32> -> vector<32x288xf32>
    %c0_255 = arith.constant 0 : index
    %c0_256 = arith.constant 0 : index
    %150 = vector.load %arg11[%c0_255, %c0_256] : memref<288x32xf32, #tpu.memory_space<vmem>>, vector<288x32xf32>
    %cst_257 = arith.constant dense<0.000000e+00> : vector<32x32xf32>
    %151 = tpu.matmul %149, %150, %cst_257 {dimension_numbers = #tpu.dot_dimension_numbers<[1], [0], [0], [1], [0, 0, 1, 1], [], []>} : vector<32x288xf32>, vector<288x32xf32>, vector<32x32xf32> -> vector<32x32xf32>
    %c0_258 = arith.constant 0 : index
    %c0_259 = arith.constant 0 : index
    %152 = vector.load %arg12[%c0_258, %c0_259] : memref<1x32xf32, #tpu.memory_space<vmem>>, vector<1x32xf32>
    %153 = vector.broadcast %152 : vector<1x32xf32> to vector<32x32xf32>
    %154 = arith.addf %151, %153 : vector<32x32xf32>
    %cst_260 = arith.constant 0.000000e+00 : f32
    %155 = vector.broadcast %cst_260 : f32 to vector<32x32xf32>
    %156 = arith.maximumf %154, %155 : vector<32x32xf32>
    %c0_261 = arith.constant 0 : index
    %c0_262 = arith.constant 0 : index
    %157 = vector.load %arg13[%c0_261, %c0_262] : memref<16x32xf32, #tpu.memory_space<vmem>>, vector<16x32xf32>
    %c0_263 = arith.constant 0 : index
    %c0_264 = arith.constant 0 : index
    %158 = vector.load %arg14[%c0_263, %c0_264] : memref<1x1xf32, #tpu.memory_space<vmem>>, vector<1x1xf32>
    %159 = vector.extract_strided_slice %156 {offsets = [0, 0], sizes = [16, 32], strides = [1, 1]} : vector<32x32xf32> to vector<16x32xf32>
    %160 = arith.mulf %159, %157 : vector<16x32xf32>
    %cst_265 = arith.constant dense<0.000000e+00> : vector<16xf32>
    %161 = vector.multi_reduction <add>, %160, %cst_265 [1] : vector<16x32xf32> to vector<16xf32>
    %162 = vector.shape_cast %161 : vector<16xf32> to vector<16x1xf32>
    %cst_266 = arith.constant dense<0.000000e+00> : vector<1xf32>
    %163 = vector.multi_reduction <add>, %162, %cst_266 [0] : vector<16x1xf32> to vector<1xf32>
    %164 = vector.shape_cast %163 : vector<1xf32> to vector<1x1xf32>
    %165 = arith.addf %164, %158 : vector<1x1xf32>
    %c0_267 = arith.constant 0 : index
    %c0_268 = arith.constant 0 : index
    %166 = vector.load %arg16[%c0_267, %c0_268] : memref<2x1xf32, #tpu.memory_space<vmem>>, vector<1x1xf32>
    tpu.vector_store %arg16[%c0_267, %c0_268], %165 {strides = array<i32>} : memref<2x1xf32, #tpu.memory_space<vmem>>, vector<1x1xf32>,
    %167 = vector.extract_strided_slice %156 {offsets = [16, 0], sizes = [16, 32], strides = [1, 1]} : vector<32x32xf32> to vector<16x32xf32>
    %168 = arith.mulf %167, %157 : vector<16x32xf32>
    %cst_269 = arith.constant dense<0.000000e+00> : vector<16xf32>
    %169 = vector.multi_reduction <add>, %168, %cst_269 [1] : vector<16x32xf32> to vector<16xf32>
    %170 = vector.shape_cast %169 : vector<16xf32> to vector<16x1xf32>
    %cst_270 = arith.constant dense<0.000000e+00> : vector<1xf32>
    %171 = vector.multi_reduction <add>, %170, %cst_270 [0] : vector<16x1xf32> to vector<1xf32>
    %172 = vector.shape_cast %171 : vector<1xf32> to vector<1x1xf32>
    %173 = arith.addf %172, %158 : vector<1x1xf32>
    %c1_271 = arith.constant 1 : index
    %c0_272 = arith.constant 0 : index
    %174 = vector.load %arg16[%c1_271, %c0_272] : memref<2x1xf32, #tpu.memory_space<vmem>>, vector<1x1xf32>
    tpu.vector_store %arg16[%c1_271, %c0_272], %173 {strides = array<i32>} : memref<2x1xf32, #tpu.memory_space<vmem>>, vector<1x1xf32>,
    return
  }
  func.func @transform_0(%arg0: i32) -> (i32, i32, i32, i32) {
    %c0_i32 = arith.constant 0 : i32
    %c0_i32_0 = arith.constant 0 : i32
    %c0_i32_1 = arith.constant 0 : i32
    %c0_i32_2 = arith.constant 0 : i32
    return %arg0, %c0_i32, %c0_i32_0, %c0_i32_1 : i32, i32, i32, i32
  }
  func.func @transform_1(%arg0: i32) -> (i32, i32) {
    %c0_i32 = arith.constant 0 : i32
    %c0_i32_0 = arith.constant 0 : i32
    %c0_i32_1 = arith.constant 0 : i32
    return %c0_i32, %c0_i32_0 : i32, i32
  }
  func.func @transform_2(%arg0: i32) -> (i32, i32) {
    %c0_i32 = arith.constant 0 : i32
    %c0_i32_0 = arith.constant 0 : i32
    %c0_i32_1 = arith.constant 0 : i32
    return %c0_i32, %c0_i32_0 : i32, i32
  }
  func.func @transform_3(%arg0: i32) -> (i32, i32) {
    %c0_i32 = arith.constant 0 : i32
    %c0_i32_0 = arith.constant 0 : i32
    %c0_i32_1 = arith.constant 0 : i32
    return %c0_i32, %c0_i32_0 : i32, i32
  }
  func.func @transform_4(%arg0: i32) -> (i32, i32) {
    %c0_i32 = arith.constant 0 : i32
    %c0_i32_0 = arith.constant 0 : i32
    %c0_i32_1 = arith.constant 0 : i32
    return %c0_i32, %c0_i32_0 : i32, i32
  }
  func.func @transform_5(%arg0: i32) -> (i32, i32) {
    %c0_i32 = arith.constant 0 : i32
    %c0_i32_0 = arith.constant 0 : i32
    %c0_i32_1 = arith.constant 0 : i32
    return %c0_i32, %c0_i32_0 : i32, i32
  }
  func.func @transform_6(%arg0: i32) -> (i32, i32) {
    %c0_i32 = arith.constant 0 : i32
    %c0_i32_0 = arith.constant 0 : i32
    %c0_i32_1 = arith.constant 0 : i32
    return %c0_i32, %c0_i32_0 : i32, i32
  }
  func.func @transform_7(%arg0: i32) -> (i32, i32) {
    %c0_i32 = arith.constant 0 : i32
    %c0_i32_0 = arith.constant 0 : i32
    %c0_i32_1 = arith.constant 0 : i32
    return %c0_i32, %c0_i32_0 : i32, i32
  }
  func.func @transform_8(%arg0: i32) -> (i32, i32) {
    %c0_i32 = arith.constant 0 : i32
    %c0_i32_0 = arith.constant 0 : i32
    %c0_i32_1 = arith.constant 0 : i32
    return %c0_i32, %c0_i32_0 : i32, i32
  }
  func.func @transform_9(%arg0: i32) -> (i32, i32) {
    %c0_i32 = arith.constant 0 : i32
    %c0_i32_0 = arith.constant 0 : i32
    %c0_i32_1 = arith.constant 0 : i32
    return %c0_i32, %c0_i32_0 : i32, i32
  }
  func.func @transform_10(%arg0: i32) -> (i32, i32) {
    %c0_i32 = arith.constant 0 : i32
    %c0_i32_0 = arith.constant 0 : i32
    %c0_i32_1 = arith.constant 0 : i32
    return %c0_i32, %c0_i32_0 : i32, i32
  }
  func.func @transform_11(%arg0: i32) -> (i32, i32) {
    %c0_i32 = arith.constant 0 : i32
    %c0_i32_0 = arith.constant 0 : i32
    %c0_i32_1 = arith.constant 0 : i32
    return %c0_i32, %c0_i32_0 : i32, i32
  }
  func.func @transform_12(%arg0: i32) -> (i32, i32) {
    %c0_i32 = arith.constant 0 : i32
    %c0_i32_0 = arith.constant 0 : i32
    %c0_i32_1 = arith.constant 0 : i32
    return %c0_i32, %c0_i32_0 : i32, i32
  }
  func.func @transform_13(%arg0: i32) -> (i32, i32) {
    %c0_i32 = arith.constant 0 : i32
    %c0_i32_0 = arith.constant 0 : i32
    %c0_i32_1 = arith.constant 0 : i32
    return %c0_i32, %c0_i32_0 : i32, i32
  }
  func.func @transform_14(%arg0: i32) -> (i32, i32) {
    %c0_i32 = arith.constant 0 : i32
    %c0_i32_0 = arith.constant 0 : i32
    return %arg0, %c0_i32 : i32, i32
  }
  func.func @transform_15(%arg0: i32) -> (i32, i32) {
    %c0_i32 = arith.constant 0 : i32
    %c0_i32_0 = arith.constant 0 : i32
    return %arg0, %c0_i32 : i32, i32
  }
}

</mosaic_0001>

<bundles_post_ra>
// kernel: net_forward.1
= control target key start
LH: loop header
LB: loop body
LE: loop exit
PB: predicated region body
PF: predicated region fallthrough
CT: control target
= control target key end

     0   :  { %vm53_vm0 = vcmask 15360   ;;  %vm55_vm1 = vcmask 9216   ;;  %v9712_v0 = vmov 0.0   ;;  %s6837_s21 = smov 4   ;;  %s6838_s22 = smov 2   ;;  %vm1114_vm2 = vcmask 1041408   ;;  %s9696_s0 = inlined_call_operand.vmem [shape: f32[2,8,8,2], index: 0, kind: input, shape index: {}]   ;;  %s9697_s2 = inlined_call_operand.vmem [shape: f32[18,64], index: 2, kind: input, shape index: {}]   ;;  %s9698_s4 = inlined_call_operand.vmem [shape: f32[288,32], index: 4, kind: input, shape index: {}]   ;;  %s9699_s3 = inlined_call_operand.vmem [shape: f32[1,64], index: 3, kind: input, shape index: {}]   ;;  %s9700_s6 = inlined_call_operand.vmem [shape: f32[288,1], index: 6, kind: input, shape index: {}]   ;;  %s9701_s5 = inlined_call_operand.vmem [shape: f32[1,32], index: 5, kind: input, shape index: {}]   ;;  %s9702_s8 = inlined_call_operand.vmem [shape: f32[288,32], index: 8, kind: input, shape index: {}]   ;;  %s9703_s7 = inlined_call_operand.<no memory space> [shape: f32[1,1], index: 7, kind: input, shape index: {}]   ;;  %s9704_s1 = inlined_call_operand.vmem [shape: f32[32,128], index: 1, kind: input, shape index: {}]   ;;  %s9705_s9 = inlined_call_operand.vmem [shape: f32[1,32], index: 9, kind: input, shape index: {}]   ;;  %s9706_s10 = inlined_call_operand.vmem [shape: f32[288,32], index: 10, kind: input, shape index: {}]   ;;  %s9707_s14 = inlined_call_operand.vmem [shape: f32[2,64], index: 14, kind: output, shape index: {0}]   ;;  %s9708_s11 = inlined_call_operand.vmem [shape: f32[1,32], index: 11, kind: input, shape index: {}]   ;;  %s9709_s12 = inlined_call_operand.vmem [shape: f32[16,32], index: 12, kind: input, shape index: {}]   ;;  %s9710_s13 = inlined_call_operand.<no memory space> [shape: f32[1,1], index: 13, kind: input, shape index: {}]   ;;  %s9711_s15 = inlined_call_operand.vmem [shape: f32[2,1], index: 15, kind: output, shape index: {1}]  }
   0x1   :  { %54 = vst.msk [vmem:[#allocation2] sm:$0xff] %vm53_vm0, %v9712_v0  ;;  %57 = vst.msk [vmem:[#allocation2 + $0x10] sm:$0xff] %vm53_vm0, %v9712_v0  ;;  %v230_v1 = vld [vmem:[%s9696_s0] sm:$0xff]  ;;  %v231_v2 = vld [vmem:[%s9696_s0 + $0x8] sm:$0xff]  ;;  %s6839_s23 = smov 6   ;;  %s6840_s26 = smov 8  }
   0x2   :  { %56 = vst.msk [vmem:[#allocation2 + $0x8] sm:$0x3] %vm55_vm1, %v9712_v0  ;;  %58 = vst.msk [vmem:[#allocation2 + $0x18] sm:$0x3] %vm55_vm1, %v9712_v0  ;;  %v232_v3 = vld [vmem:[%s9696_s0 + $0x10] sm:$0xff]  ;;  %v233_v4 = vld [vmem:[%s9696_s0 + $0x18] sm:$0xff] }
   0x3   :  { %59 = vst.msk [vmem:[#allocation2 + $0x20] sm:$0xff] %vm53_vm0, %v9712_v0  ;;  %61 = vst.msk [vmem:[#allocation2 + $0x30] sm:$0xff] %vm53_vm0, %v9712_v0  ;;  %v234_v5 = vld [vmem:[%s9696_s0 + $0x20] sm:$0xff]  ;;  %v235_v6 = vld [vmem:[%s9696_s0 + $0x28] sm:$0xff]  ;;  %s6841_s29 = smov 10   ;;  %s6842_s30 = smov 12  }
   0x4   :  { %60 = vst.msk [vmem:[#allocation2 + $0x28] sm:$0x3] %vm55_vm1, %v9712_v0  ;;  %62 = vst.msk [vmem:[#allocation2 + $0x38] sm:$0x3] %vm55_vm1, %v9712_v0  ;;  %v236_v7 = vld [vmem:[%s9696_s0 + $0x30] sm:$0xff]  ;;  %v237_v8 = vld [vmem:[%s9696_s0 + $0x38] sm:$0xff] }
   0x5   :  { %63 = vst.msk [vmem:[#allocation2 + $0x40] sm:$0xff] %vm53_vm0, %v9712_v0  ;;  %65 = vst.msk [vmem:[#allocation2 + $0x50] sm:$0xff] %vm53_vm0, %v9712_v0  ;;  %v238_v9 = vld [vmem:[%s9696_s0 + $0x40] sm:$0xff]  ;;  %v239_v17 = vld [vmem:[%s9696_s0 + $0x48] sm:$0xff]  ;;  %s6843_s20 = smov 14   ;;  %s6844_s16 = smov 16  }
   0x6   :  { %64 = vst.msk [vmem:[#allocation2 + $0x48] sm:$0x3] %vm55_vm1, %v9712_v0  ;;  %66 = vst.msk [vmem:[#allocation2 + $0x58] sm:$0x3] %vm55_vm1, %v9712_v0  ;;  %v240_v18 = vld [vmem:[%s9696_s0 + $0x50] sm:$0xff]  ;;  %v1055_v21 = vld [vmem:[%s9697_s2] sm:$0xff] }
   0x7   :  { %67 = vst.msk [vmem:[#allocation2 + $0x60] sm:$0xff] %vm53_vm0, %v9712_v0  ;;  %69 = vst.msk [vmem:[#allocation2 + $0x70] sm:$0xff] %vm53_vm0, %v9712_v0  ;;  %v1056_v22 = vld [vmem:[%s9697_s2 + $0x8] sm:$0xff]  ;;  %v1057_v25 = vld [vmem:[%s9697_s2 + $0x10] sm:$0x3]  ;;  %vm936_vm3 = vcmask 31744  }
   0x8   :  { %68 = vst.msk [vmem:[#allocation2 + $0x68] sm:$0x3] %vm55_vm1, %v9712_v0  ;;  %70 = vst.msk [vmem:[#allocation2 + $0x78] sm:$0x3] %vm55_vm1, %v9712_v0  ;;  %v5795_v24 = vpack.c.bf16 %v1056_v22, %v1055_v21  ;;  %v241_v27 = vld [vmem:[%s9696_s0 + $0x58] sm:$0xff]  ;;  %v242_v30 = vld [vmem:[%s9696_s0 + $0x60] sm:$0xff] }
   0x9   :  { %71 = vst.msk [vmem:[#allocation2 + $0x80] sm:$0xff] %vm53_vm0, %v9712_v0  ;;  %73 = vst.msk [vmem:[#allocation2 + $0x90] sm:$0xff] %vm53_vm0, %v9712_v0  ;;  %v295_v10 = vld [vmem:[#allocation2 + $0x2] sm:$0xff]  ;;  %v244_v38 = vld [vmem:[%s9696_s0 + $0x70] sm:$0xff]  ;;  %vm953_vm4 = vcmask 48128   ;;  %vm970_vm5 = vcmask 64512  }
   0xa   :  { %72 = vst.msk [vmem:[#allocation2 + $0x88] sm:$0x3] %vm55_vm1, %v9712_v0  ;;  %74 = vst.msk [vmem:[#allocation2 + $0x98] sm:$0x3] %vm55_vm1, %v9712_v0  ;;  %v279_v11 = vld [vmem:[#allocation2 + $0x1] sm:$0xff]  ;;  %488 = vrot.lane.b32.xlu1 %v295_v10, %s6837_s21  ;;  %5796 = vmatprep.subr.bf16.mxu0 %v5795_v24  ;;  %v245_v43 = vld [vmem:[%s9696_s0 + $0x78] sm:$0xff] }
   0xb   :  { %75 = vst.msk [vmem:[#allocation2 + $0xa0] sm:$0xff] %vm53_vm0, %v9712_v0  ;;  %77 = vst.msk [vmem:[#allocation2 + $0xb0] sm:$0xff] %vm53_vm0, %v9712_v0  ;;  %424 = vrot.lane.b32.xlu0 %v279_v11, %s6838_s22  ;;  %5798 = vmatpush3.bf16.msra.mxu0 %v5795_v24  ;;  %v243_v35 = vld [vmem:[%s9696_s0 + $0x68] sm:$0xff]  ;;  %vm987_vm6 = vcmask 80896   ;;  %vm1004_vm7 = vcmask 97280   ;;  %vm1021_vm8 = vcmask 113664  }
   0xc   :  { %76 = vst.msk [vmem:[#allocation2 + $0xa8] sm:$0x3] %vm55_vm1, %v9712_v0  ;;  %78 = vst.msk [vmem:[#allocation2 + $0xb8] sm:$0x3] %vm55_vm1, %v9712_v0  ;;  %5621 = vmatprep.subr.msk.mxu0 %vm1114_vm2, %v1057_v25  ;;  %vm1038_vm9 = vcmask 130048   ;;  %vm1065_vm10 = vcmask 146432  }
   0xd   :  { %79 = vst.msk [vmem:[#allocation2 + $0xc0] sm:$0xff] %vm53_vm0, %v9712_v0  ;;  %81 = vst.msk [vmem:[#allocation2 + $0xd0] sm:$0xff] %vm53_vm0, %v9712_v0  ;;  %vm95_vm11 = vcmask 261120   ;;  %vm97_vm12 = vcmask 254976   ;;  %s6845_s25 = smov 64   ;;  %s6846_s27 = smov 32  }
   0xe   :  { %80 = vst.msk [vmem:[#allocation2 + $0xc8] sm:$0x3] %vm55_vm1, %v9712_v0  ;;  %82 = vst.msk [vmem:[#allocation2 + $0xd8] sm:$0x3] %vm55_vm1, %v9712_v0  ;;  %s6847_s28 = smov 96   ;;  %vm1841_vm13 = vcmask 523264  }
   0xf   :  { %83 = vst.msk [vmem:[#allocation2 + $0xe0] sm:$0xff] %vm53_vm0, %v9712_v0  ;;  %85 = vst.msk [vmem:[#allocation2 + $0xf0] sm:$0xff] %vm53_vm0, %v9712_v0  ;;  %5622 = vmatpush3.msk.msra.mxu0 %vm1114_vm2, %v1057_v25  ;;  %vm1858_vm14 = vcmask 785408   ;;  %vm217_vm15 = vcmask 259072   ;;  %vm5125_vm2 = vcmask 0  }
  0x10   :  { %84 = vst.msk [vmem:[#allocation2 + $0xe8] sm:$0x3] %vm55_vm1, %v9712_v0  ;;  %86 = vst.msk [vmem:[#allocation2 + $0xf8] sm:$0x3] %vm55_vm1, %v9712_v0  ;;  %v367_v47 = vld [vmem:[#allocation2 + $0x90] sm:$0xff] }
  0x11   :  { %87 = vst.msk [vmem:[#allocation2 + $0x100] sm:$0xff] %vm53_vm0, %v9712_v0  ;;  %89 = vst.msk [vmem:[#allocation2 + $0x110] sm:$0xff] %vm53_vm0, %v9712_v0  ;;  %v383_v50 = vld [vmem:[#allocation2 + $0x91] sm:$0xff] }
  0x12   :  { %88 = vst.msk [vmem:[#allocation2 + $0x108] sm:$0x3] %vm55_vm1, %v9712_v0  ;;  %90 = vst.msk [vmem:[#allocation2 + $0x118] sm:$0x3] %vm55_vm1, %v9712_v0  ;;  %v399_v53 = vld [vmem:[#allocation2 + $0x92] sm:$0xff] }
  0x13   :  { %91 = vst.msk [vmem:[#allocation2 + $0x120] sm:$0xff] %vm53_vm0, %v9712_v0  ;;  %93 = vst.msk [vmem:[#allocation2 + $0x130] sm:$0xff] %vm53_vm0, %v9712_v0  ;;  %v287_v57 = vld [vmem:[#allocation2 + $0xa1] sm:$0xff] }
  0x14   :  { %92 = vst.msk [vmem:[#allocation2 + $0x128] sm:$0x3] %vm55_vm1, %v9712_v0  ;;  %94 = vst.msk [vmem:[#allocation2 + $0x138] sm:$0x3] %vm55_vm1, %v9712_v0  ;;  %v303_v61 = vld [vmem:[#allocation2 + $0xa2] sm:$0xff]  ;;  %vm3375_vm1 = vcmask 516096  }
  0x15   :  { %247 = vst.msk [vmem:[#allocation2 + $0x11] sm:$0xff] %vm53_vm0, %v230_v1  ;;  %248 = vst.msk [vmem:[#allocation2 + $0x21] sm:$0xff] %vm53_vm0, %v231_v2 }
  0x16   :  { %249 = vst.msk [vmem:[#allocation2 + $0x31] sm:$0xff] %vm53_vm0, %v232_v3  ;;  %250 = vst.msk [vmem:[#allocation2 + $0x41] sm:$0xff] %vm53_vm0, %v233_v4 }
  0x17   :  { %251 = vst.msk [vmem:[#allocation2 + $0x51] sm:$0xff] %vm53_vm0, %v234_v5  ;;  %252 = vst.msk [vmem:[#allocation2 + $0x61] sm:$0xff] %vm53_vm0, %v235_v6 }
  0x18   :  { %253 = vst.msk [vmem:[#allocation2 + $0x71] sm:$0xff] %vm53_vm0, %v236_v7  ;;  %254 = vst.msk [vmem:[#allocation2 + $0x81] sm:$0xff] %vm53_vm0, %v237_v8  ;;  %v263_v8 = vld [vmem:[#allocation2] sm:$0xff] }
  0x19   :  { %255 = vst.msk [vmem:[#allocation2 + $0xb1] sm:$0xff] %vm53_vm0, %v238_v9  ;;  %256 = vst.msk [vmem:[#allocation2 + $0xc1] sm:$0xff] %vm53_vm0, %v239_v17 }
  0x1a   :  { %257 = vst.msk [vmem:[#allocation2 + $0xd1] sm:$0xff] %vm53_vm0, %v240_v18  ;;  %258 = vst.msk [vmem:[#allocation2 + $0xe1] sm:$0xff] %vm53_vm0, %v241_v27 }
  0x1b   :  { %259 = vst.msk [vmem:[#allocation2 + $0xf1] sm:$0xff] %vm53_vm0, %v242_v30  ;;  %260 = vst.msk [vmem:[#allocation2 + $0x101] sm:$0xff] %vm53_vm0, %v243_v35 }
  0x1c   :  { %v296_v12 = vld [vmem:[#allocation2 + $0x12] sm:$0xff]  ;;  %v7048_v14 = vld [vmem:[#allocation2 + $0x20] sm:$0xff]  ;;  %261 = vst.msk [vmem:[#allocation2 + $0x111] sm:$0xff] %vm53_vm0, %v244_v38  ;;  %262 = vst.msk [vmem:[#allocation2 + $0x121] sm:$0xff] %vm53_vm0, %v245_v43 }
  0x1d   :  { %v280_v13 = vld [vmem:[#allocation2 + $0x11] sm:$0xff]  ;;  %490 = vrot.lane.b32.xlu1 %v296_v12, %s6837_s21  ;;  %v328_v16 = vld [vmem:[#allocation2 + $0x21] sm:$0xff]  ;;  %101 = vst.msk [vmem:[#allocation3 + $0x20] sm:$0xff] %vm95_vm11, %v9712_v0  ;;  %96 = vst.msk [vmem:[#allocation3] sm:$0xff] %vm95_vm11, %v9712_v0 }
  0x1e   :  { %426 = vrot.lane.b32.xlu0 %v280_v13, %s6838_s22  ;;  %v7050_v15 = vld [vmem:[#allocation2 + $0x10] sm:$0xff]  ;;  %v344_v19 = vld [vmem:[#allocation2 + $0x22] sm:$0xff]  ;;  %102 = vst.msk [vmem:[#allocation3 + $0x28] sm:$0x3] %vm97_vm12, %v9712_v0  ;;  %98 = vst.msk [vmem:[#allocation3 + $0x8] sm:$0x3] %vm97_vm12, %v9712_v0 }
  0x1f   :  { %v282_v20 = vld [vmem:[#allocation2 + $0x31] sm:$0xff]  ;;  %v7096_v28 = vld [vmem:[#allocation2 + $0x40] sm:$0xff]  ;;  %99 = vst.msk [vmem:[#allocation3 + $0x10] sm:$0xff] %vm95_vm11, %v9712_v0  ;;  %103 = vst.msk [vmem:[#allocation3 + $0x30] sm:$0xff] %vm95_vm11, %v9712_v0 }
  0x20   :  { %v7079_v23 = vld [vmem:[#allocation2 + $0x30] sm:$0xff]  ;;  %v330_v29 = vld [vmem:[#allocation2 + $0x41] sm:$0xff]  ;;  %100 = vst.msk [vmem:[#allocation3 + $0x18] sm:$0x3] %vm97_vm12, %v9712_v0  ;;  %104 = vst.msk [vmem:[#allocation3 + $0x38] sm:$0x3] %vm97_vm12, %v9712_v0 }
  0x21   :  { %554 = vrot.lane.b32.xlu1 %v7048_v14, %s6839_s23  ;;  %v298_v26 = vld [vmem:[#allocation2 + $0x32] sm:$0xff]  ;;  %v346_v31 = vld [vmem:[#allocation2 + $0x42] sm:$0xff]  ;;  %105 = vst.msk [vmem:[#allocation3 + $0x40] sm:$0xff] %vm95_vm11, %v9712_v0  ;;  %107 = vst.msk [vmem:[#allocation3 + $0x50] sm:$0xff] %vm95_vm11, %v9712_v0 }
  0x22   :  { %552 = vrot.lane.b32.xlu0 %v7050_v15, %s6839_s23  ;;  %v7109_v32 = vld [vmem:[#allocation2 + $0x50] sm:$0xff]  ;;  %v7127_v36 = vld [vmem:[#allocation2 + $0x60] sm:$0xff]  ;;  %106 = vst.msk [vmem:[#allocation3 + $0x48] sm:$0x3] %vm97_vm12, %v9712_v0  ;;  %108 = vst.msk [vmem:[#allocation3 + $0x58] sm:$0x3] %vm97_vm12, %v9712_v0 }
  0x23   :  { %v379_v33 = vld [vmem:[#allocation2 + $0x51] sm:$0xff]  ;;  %v332_v37 = vld [vmem:[#allocation2 + $0x61] sm:$0xff]  ;;  %109 = vst.msk [vmem:[#allocation3 + $0x60] sm:$0xff] %vm95_vm11, %v9712_v0  ;;  %111 = vst.msk [vmem:[#allocation3 + $0x70] sm:$0xff] %vm95_vm11, %v9712_v0 }
  0x24   :  { %v395_v34 = vld [vmem:[#allocation2 + $0x52] sm:$0xff]  ;;  %v348_v39 = vld [vmem:[#allocation2 + $0x62] sm:$0xff]  ;;  %110 = vst.msk [vmem:[#allocation3 + $0x68] sm:$0x3] %vm97_vm12, %v9712_v0  ;;  %112 = vst.msk [vmem:[#allocation3 + $0x78] sm:$0x3] %vm97_vm12, %v9712_v0 }
  0x25   :  { %618 = vrot.lane.b32.xlu1 %v328_v16, %s6840_s26  ;;  %v7141_v40 = vld [vmem:[#allocation2 + $0x70] sm:$0xff]  ;;  %v318_v44 = vld [vmem:[#allocation2 + $0x80] sm:$0xff]  ;;  %113 = vst.msk [vmem:[#allocation3 + $0x80] sm:$0xff] %vm95_vm11, %v9712_v0  ;;  %115 = vst.msk [vmem:[#allocation3 + $0x90] sm:$0xff] %vm95_vm11, %v9712_v0 }
  0x26   :  { %616 = vrot.lane.b32.xlu0 %v280_v13, %s6840_s26  ;;  %v381_v41 = vld [vmem:[#allocation2 + $0x71] sm:$0xff]  ;;  %v334_v45 = vld [vmem:[#allocation2 + $0x81] sm:$0xff]  ;;  %114 = vst.msk [vmem:[#allocation3 + $0x88] sm:$0x3] %vm97_vm12, %v9712_v0  ;;  %116 = vst.msk [vmem:[#allocation3 + $0x98] sm:$0x3] %vm97_vm12, %v9712_v0 }
  0x27   :  { %v397_v42 = vld [vmem:[#allocation2 + $0x72] sm:$0xff]  ;;  %v350_v46 = vld [vmem:[#allocation2 + $0x82] sm:$0xff]  ;;  %117 = vst.msk [vmem:[#allocation3 + $0xa0] sm:$0xff] %vm95_vm11, %v9712_v0  ;;  %119 = vst.msk [vmem:[#allocation3 + $0xb0] sm:$0xff] %vm95_vm11, %v9712_v0 }
  0x28   :  { %v288_v56 = vld [vmem:[#allocation2 + $0xb1] sm:$0xff]  ;;  %v7182_v1 = vld [vmem:[#allocation2 + $0xc0] sm:$0xff]  ;;  %118 = vst.msk [vmem:[#allocation3 + $0xa8] sm:$0x3] %vm97_vm12, %v9712_v0  ;;  %120 = vst.msk [vmem:[#allocation3 + $0xb8] sm:$0x3] %vm97_vm12, %v9712_v0 }
  0x29   :  { %428 = vrot.lane.b32.xlu1 %v328_v16, %s6838_s22  ;;  %v304_v60 = vld [vmem:[#allocation2 + $0xb2] sm:$0xff]  ;;  %v336_v5 = vld [vmem:[#allocation2 + $0xc1] sm:$0xff]  ;;  %121 = vst.msk [vmem:[#allocation3 + $0xc0] sm:$0xff] %vm95_vm11, %v9712_v0  ;;  %123 = vst.msk [vmem:[#allocation3 + $0xd0] sm:$0xff] %vm95_vm11, %v9712_v0 }
  0x2a   :  { %680 = vrot.lane.b32.xlu0 %v296_v12, %s6841_s29  ;;  %v7184_v2 = vld [vmem:[#allocation2 + $0xb0] sm:$0xff]  ;;  %v352_v13 = vld [vmem:[#allocation2 + $0xc2] sm:$0xff]  ;;  %122 = vst.msk [vmem:[#allocation3 + $0xc8] sm:$0x3] %vm97_vm12, %v9712_v0  ;;  %124 = vst.msk [vmem:[#allocation3 + $0xd8] sm:$0x3] %vm97_vm12, %v9712_v0 }
  0x2b   :  { %v290_v22 = vld [vmem:[#allocation2 + $0xd1] sm:$0xff]  ;;  %125 = vst.msk [vmem:[#allocation3 + $0xe0] sm:$0xff] %vm95_vm11, %v9712_v0  ;;  %127 = vst.msk [vmem:[#allocation3 + $0xf0] sm:$0xff] %vm95_vm11, %v9712_v0 }
  0x2c   :  { %126 = vst.msk [vmem:[#allocation3 + $0xe8] sm:$0x3] %vm97_vm12, %v9712_v0  ;;  %128 = vst.msk [vmem:[#allocation3 + $0xf8] sm:$0x3] %vm97_vm12, %v9712_v0 }
  0x2d   :  { %744 = vrot.lane.b32.xlu1 %v7048_v14, %s6842_s30  ;;  %129 = vst.msk [vmem:[#allocation3 + $0x100] sm:$0xff] %vm95_vm11, %v9712_v0  ;;  %131 = vst.msk [vmem:[#allocation3 + $0x110] sm:$0xff] %vm95_vm11, %v9712_v0 }
  0x2e   :  { %682 = vrot.lane.b32.xlu0 %v344_v19, %s6841_s29  ;;  %130 = vst.msk [vmem:[#allocation3 + $0x108] sm:$0x3] %vm97_vm12, %v9712_v0  ;;  %132 = vst.msk [vmem:[#allocation3 + $0x118] sm:$0x3] %vm97_vm12, %v9712_v0 }
  0x2f   :  { %133 = vst.msk [vmem:[#allocation3 + $0x120] sm:$0xff] %vm95_vm11, %v9712_v0  ;;  %135 = vst.msk [vmem:[#allocation3 + $0x130] sm:$0xff] %vm95_vm11, %v9712_v0 }
  0x30   :  { %134 = vst.msk [vmem:[#allocation3 + $0x128] sm:$0x3] %vm97_vm12, %v9712_v0  ;;  %136 = vst.msk [vmem:[#allocation3 + $0x138] sm:$0x3] %vm97_vm12, %v9712_v0 }
  0x31   :  { %492 = vrot.lane.b32.xlu1 %v344_v19, %s6837_s21  ;;  %137 = vst.msk [vmem:[#allocation4] sm:$0xff] %vm95_vm11, %v9712_v0  ;;  %139 = vst.msk [vmem:[#allocation4 + $0x10] sm:$0xff] %vm95_vm11, %v9712_v0 }
  0x32   :  { %430 = vrot.lane.b32.xlu0 %v282_v20, %s6838_s22  ;;  %138 = vst.msk [vmem:[#allocation4 + $0x8] sm:$0x3] %vm97_vm12, %v9712_v0  ;;  %140 = vst.msk [vmem:[#allocation4 + $0x18] sm:$0x3] %vm97_vm12, %v9712_v0 }
  0x33   :  { %141 = vst.msk [vmem:[#allocation4 + $0x20] sm:$0xff] %vm95_vm11, %v9712_v0  ;;  %143 = vst.msk [vmem:[#allocation4 + $0x30] sm:$0xff] %vm95_vm11, %v9712_v0 }
  0x34   :  { %142 = vst.msk [vmem:[#allocation4 + $0x28] sm:$0x3] %vm97_vm12, %v9712_v0  ;;  %144 = vst.msk [vmem:[#allocation4 + $0x38] sm:$0x3] %vm97_vm12, %v9712_v0 }
  0x35   :  { %808 = vrot.lane.b32.xlu1 %v328_v16, %s6843_s20  ;;  %145 = vst.msk [vmem:[#allocation4 + $0x40] sm:$0xff] %vm95_vm11, %v9712_v0  ;;  %147 = vst.msk [vmem:[#allocation4 + $0x50] sm:$0xff] %vm95_vm11, %v9712_v0 }
  0x36   :  { %746 = vrot.lane.b32.xlu0 %v7079_v23, %s6842_s30  ;;  %146 = vst.msk [vmem:[#allocation4 + $0x48] sm:$0x3] %vm97_vm12, %v9712_v0  ;;  %148 = vst.msk [vmem:[#allocation4 + $0x58] sm:$0x3] %vm97_vm12, %v9712_v0 }
  0x37   :  { %149 = vst.msk [vmem:[#allocation4 + $0x60] sm:$0xff] %vm95_vm11, %v9712_v0  ;;  %151 = vst.msk [vmem:[#allocation4 + $0x70] sm:$0xff] %vm95_vm11, %v9712_v0 }
  0x38   :  { %150 = vst.msk [vmem:[#allocation4 + $0x68] sm:$0x3] %vm97_vm12, %v9712_v0  ;;  %152 = vst.msk [vmem:[#allocation4 + $0x78] sm:$0x3] %vm97_vm12, %v9712_v0 }
  0x39   :  { %556 = vrot.lane.b32.xlu1 %v7079_v23, %s6839_s23  ;;  %153 = vst.msk [vmem:[#allocation4 + $0x80] sm:$0xff] %vm95_vm11, %v9712_v0  ;;  %155 = vst.msk [vmem:[#allocation4 + $0x90] sm:$0xff] %vm95_vm11, %v9712_v0 }
  0x3a   :  { %494 = vrot.lane.b32.xlu0 %v298_v26, %s6837_s21  ;;  %154 = vst.msk [vmem:[#allocation4 + $0x88] sm:$0x3] %vm97_vm12, %v9712_v0  ;;  %156 = vst.msk [vmem:[#allocation4 + $0x98] sm:$0x3] %vm97_vm12, %v9712_v0 }
  0x3b   :  { %157 = vst.msk [vmem:[#allocation4 + $0xa0] sm:$0xff] %vm95_vm11, %v9712_v0  ;;  %159 = vst.msk [vmem:[#allocation4 + $0xb0] sm:$0xff] %vm95_vm11, %v9712_v0 }
  0x3c   :  { %158 = vst.msk [vmem:[#allocation4 + $0xa8] sm:$0x3] %vm97_vm12, %v9712_v0  ;;  %160 = vst.msk [vmem:[#allocation4 + $0xb8] sm:$0x3] %vm97_vm12, %v9712_v0 }
  0x3d   :  { %872 = vrot.lane.b32.xlu1 %v344_v19, %s6844_s16  ;;  %161 = vst.msk [vmem:[#allocation4 + $0xc0] sm:$0xff] %vm95_vm11, %v9712_v0  ;;  %163 = vst.msk [vmem:[#allocation4 + $0xd0] sm:$0xff] %vm95_vm11, %v9712_v0 }
  0x3e   :  { %810 = vrot.lane.b32.xlu0 %v282_v20, %s6843_s20  ;;  %162 = vst.msk [vmem:[#allocation4 + $0xc8] sm:$0x3] %vm97_vm12, %v9712_v0  ;;  %164 = vst.msk [vmem:[#allocation4 + $0xd8] sm:$0x3] %vm97_vm12, %v9712_v0 }
  0x3f   :  { %165 = vst.msk [vmem:[#allocation4 + $0xe0] sm:$0xff] %vm95_vm11, %v9712_v0  ;;  %167 = vst.msk [vmem:[#allocation4 + $0xf0] sm:$0xff] %vm95_vm11, %v9712_v0 }
  0x40   :  { %166 = vst.msk [vmem:[#allocation4 + $0xe8] sm:$0x3] %vm97_vm12, %v9712_v0  ;;  %168 = vst.msk [vmem:[#allocation4 + $0xf8] sm:$0x3] %vm97_vm12, %v9712_v0 }
  0x41   :  { %620 = vrot.lane.b32.xlu1 %v282_v20, %s6840_s26  ;;  %169 = vst.msk [vmem:[#allocation4 + $0x100] sm:$0xff] %vm95_vm11, %v9712_v0  ;;  %171 = vst.msk [vmem:[#allocation4 + $0x110] sm:$0xff] %vm95_vm11, %v9712_v0 }
  0x42   :  { %558 = vrot.lane.b32.xlu0 %v7096_v28, %s6839_s23  ;;  %170 = vst.msk [vmem:[#allocation4 + $0x108] sm:$0x3] %vm97_vm12, %v9712_v0  ;;  %172 = vst.msk [vmem:[#allocation4 + $0x118] sm:$0x3] %vm97_vm12, %v9712_v0 }
  0x43   :  { %173 = vst.msk [vmem:[#allocation4 + $0x120] sm:$0xff] %vm95_vm11, %v9712_v0  ;;  %175 = vst.msk [vmem:[#allocation4 + $0x130] sm:$0xff] %vm95_vm11, %v9712_v0 }
  0x44   :  { %174 = vst.msk [vmem:[#allocation4 + $0x128] sm:$0x3] %vm97_vm12, %v9712_v0  ;;  %176 = vst.msk [vmem:[#allocation4 + $0x138] sm:$0x3] %vm97_vm12, %v9712_v0 }
  0x45   :  { %622 = vrot.lane.b32.xlu1 %v330_v29, %s6840_s26  ;;  %177 = vst.msk [vmem:[#allocation5] sm:$0xff] %vm95_vm11, %v9712_v0  ;;  %179 = vst.msk [vmem:[#allocation5 + $0x10] sm:$0xff] %vm95_vm11, %v9712_v0 }
  0x46   :  { %874 = vrot.lane.b32.xlu0 %v298_v26, %s6844_s16  ;;  %178 = vst.msk [vmem:[#allocation5 + $0x8] sm:$0x3] %vm97_vm12, %v9712_v0  ;;  %180 = vst.msk [vmem:[#allocation5 + $0x18] sm:$0x3] %vm97_vm12, %v9712_v0 }
  0x47   :  { %181 = vst.msk [vmem:[#allocation5 + $0x20] sm:$0xff] %vm95_vm11, %v9712_v0  ;;  %183 = vst.msk [vmem:[#allocation5 + $0x30] sm:$0xff] %vm95_vm11, %v9712_v0 }
  0x48   :  { %182 = vst.msk [vmem:[#allocation5 + $0x28] sm:$0x3] %vm97_vm12, %v9712_v0  ;;  %184 = vst.msk [vmem:[#allocation5 + $0x38] sm:$0x3] %vm97_vm12, %v9712_v0 }
  0x49   :  { %686 = vrot.lane.b32.xlu1 %v346_v31, %s6841_s29  ;;  %185 = vst.msk [vmem:[#allocation5 + $0x40] sm:$0xff] %vm95_vm11, %v9712_v0  ;;  %187 = vst.msk [vmem:[#allocation5 + $0x50] sm:$0xff] %vm95_vm11, %v9712_v0 }
  0x4a   :  { %684 = vrot.lane.b32.xlu0 %v298_v26, %s6841_s29  ;;  %186 = vst.msk [vmem:[#allocation5 + $0x48] sm:$0x3] %vm97_vm12, %v9712_v0  ;;  %188 = vst.msk [vmem:[#allocation5 + $0x58] sm:$0x3] %vm97_vm12, %v9712_v0 }
  0x4b   :  { %189 = vst.msk [vmem:[#allocation5 + $0x60] sm:$0xff] %vm95_vm11, %v9712_v0  ;;  %191 = vst.msk [vmem:[#allocation5 + $0x70] sm:$0xff] %vm95_vm11, %v9712_v0 }
  0x4c   :  { %190 = vst.msk [vmem:[#allocation5 + $0x68] sm:$0x3] %vm97_vm12, %v9712_v0  ;;  %192 = vst.msk [vmem:[#allocation5 + $0x78] sm:$0x3] %vm97_vm12, %v9712_v0 }
  0x4d   :  { %750 = vrot.lane.b32.xlu1 %v7109_v32, %s6842_s30  ;;  %193 = vst.msk [vmem:[#allocation5 + $0x80] sm:$0xff] %vm95_vm11, %v9712_v0  ;;  %195 = vst.msk [vmem:[#allocation5 + $0x90] sm:$0xff] %vm95_vm11, %v9712_v0 }
  0x4e   :  { %748 = vrot.lane.b32.xlu0 %v7096_v28, %s6842_s30  ;;  %194 = vst.msk [vmem:[#allocation5 + $0x88] sm:$0x3] %vm97_vm12, %v9712_v0  ;;  %196 = vst.msk [vmem:[#allocation5 + $0x98] sm:$0x3] %vm97_vm12, %v9712_v0 }
  0x4f   :  { %197 = vst.msk [vmem:[#allocation5 + $0xa0] sm:$0xff] %vm95_vm11, %v9712_v0  ;;  %199 = vst.msk [vmem:[#allocation5 + $0xb0] sm:$0xff] %vm95_vm11, %v9712_v0 }
  0x50   :  { %198 = vst.msk [vmem:[#allocation5 + $0xa8] sm:$0x3] %vm97_vm12, %v9712_v0  ;;  %200 = vst.msk [vmem:[#allocation5 + $0xb8] sm:$0x3] %vm97_vm12, %v9712_v0 }
  0x51   :  { %814 = vrot.lane.b32.xlu1 %v379_v33, %s6843_s20  ;;  %201 = vst.msk [vmem:[#allocation5 + $0xc0] sm:$0xff] %vm95_vm11, %v9712_v0  ;;  %203 = vst.msk [vmem:[#allocation5 + $0xd0] sm:$0xff] %vm95_vm11, %v9712_v0 }
  0x52   :  { %812 = vrot.lane.b32.xlu0 %v330_v29, %s6843_s20  ;;  %202 = vst.msk [vmem:[#allocation5 + $0xc8] sm:$0x3] %vm97_vm12, %v9712_v0  ;;  %204 = vst.msk [vmem:[#allocation5 + $0xd8] sm:$0x3] %vm97_vm12, %v9712_v0 }
  0x53   :  { %205 = vst.msk [vmem:[#allocation5 + $0xe0] sm:$0xff] %vm95_vm11, %v9712_v0  ;;  %207 = vst.msk [vmem:[#allocation5 + $0xf0] sm:$0xff] %vm95_vm11, %v9712_v0 }
  0x54   :  { %206 = vst.msk [vmem:[#allocation5 + $0xe8] sm:$0x3] %vm97_vm12, %v9712_v0  ;;  %208 = vst.msk [vmem:[#allocation5 + $0xf8] sm:$0x3] %vm97_vm12, %v9712_v0 }
  0x55   :  { %878 = vrot.lane.b32.xlu1 %v395_v34, %s6844_s16  ;;  %209 = vst.msk [vmem:[#allocation5 + $0x100] sm:$0xff] %vm95_vm11, %v9712_v0  ;;  %211 = vst.msk [vmem:[#allocation5 + $0x110] sm:$0xff] %vm95_vm11, %v9712_v0 }
  0x56   :  { %876 = vrot.lane.b32.xlu0 %v346_v31, %s6844_s16  ;;  %210 = vst.msk [vmem:[#allocation5 + $0x108] sm:$0x3] %vm97_vm12, %v9712_v0  ;;  %212 = vst.msk [vmem:[#allocation5 + $0x118] sm:$0x3] %vm97_vm12, %v9712_v0 }
  0x57   :  { %213 = vst.msk [vmem:[#allocation5 + $0x120] sm:$0xff] %vm95_vm11, %v9712_v0  ;;  %215 = vst.msk [vmem:[#allocation5 + $0x130] sm:$0xff] %vm95_vm11, %v9712_v0 }
  0x58   :  { %214 = vst.msk [vmem:[#allocation5 + $0x128] sm:$0x3] %vm97_vm12, %v9712_v0  ;;  %216 = vst.msk [vmem:[#allocation5 + $0x138] sm:$0x3] %vm97_vm12, %v9712_v0 }
  0x59   :  { %434 = vrot.lane.b32.xlu1 %v379_v33, %s6838_s22 }
  0x5a   :  { %432 = vrot.lane.b32.xlu0 %v330_v29, %s6838_s22 }
  0x5d   :  { %498 = vrot.lane.b32.xlu1 %v395_v34, %s6837_s21 }
  0x5e   :  { %496 = vrot.lane.b32.xlu0 %v346_v31, %s6837_s21  ;;  %v7216_v31 = vld [vmem:[#allocation2 + $0xd0] sm:$0xff] }
  0x61   :  { %562 = vrot.lane.b32.xlu1 %v7127_v36, %s6839_s23 }
  0x62   :  { %560 = vrot.lane.b32.xlu0 %v7109_v32, %s6839_s23 }
  0x65   :  { %626 = vrot.lane.b32.xlu1 %v332_v37, %s6840_s26 }
  0x66   :  { %624 = vrot.lane.b32.xlu0 %v379_v33, %s6840_s26 }
  0x69   :  { %690 = vrot.lane.b32.xlu1 %v348_v39, %s6841_s29 }
  0x6a   :  { %688 = vrot.lane.b32.xlu0 %v395_v34, %s6841_s29 }
  0x6d   :  { %754 = vrot.lane.b32.xlu1 %v7141_v40, %s6842_s30 }
  0x6e   :  { %752 = vrot.lane.b32.xlu0 %v7127_v36, %s6842_s30 }
  0x71   :  { %818 = vrot.lane.b32.xlu1 %v381_v41, %s6843_s20 }
  0x72   :  { %816 = vrot.lane.b32.xlu0 %v332_v37, %s6843_s20 }
  0x75   :  { %436 = vrot.lane.b32.xlu1 %v332_v37, %s6838_s22 }
  0x76   :  { %880 = vrot.lane.b32.xlu0 %v348_v39, %s6844_s16 }
  0x79   :  { %438 = vrot.lane.b32.xlu1 %v381_v41, %s6838_s22 }
  0x7a   :  { %882 = vrot.lane.b32.xlu0 %v397_v42, %s6844_s16 }
  0x7c   :  { %v489_v48 = vpop.permute.xlu1 %488 }
  0x7d   :  { %502 = vrot.lane.b32.xlu1 %v397_v42, %s6837_s21  ;;  %v425_v49 = vpop.permute.xlu0 %424 }
  0x7e   :  { %500 = vrot.lane.b32.xlu0 %v348_v39, %s6837_s21  ;;  %v920_v9 = vsel %vm53_vm0, %v263_v8, %v425_v49  ;;  %v306_v39 = vld [vmem:[#allocation2 + $0xd2] sm:$0xff] }
  0x7f   :  { %v937_v12 = vsel %vm936_vm3, %v920_v9, %v489_v48  ;;  %v7265_v9 = vld [vmem:[#allocation2 + $0xf0] sm:$0xff] }
  0x81   :  { %566 = vrot.lane.b32.xlu1 %v318_v44, %s6839_s23 }
  0x82   :  { %564 = vrot.lane.b32.xlu0 %v7141_v40, %s6839_s23 }
  0x85   :  { %630 = vrot.lane.b32.xlu1 %v334_v45, %s6840_s26 }
  0x86   :  { %628 = vrot.lane.b32.xlu0 %v381_v41, %s6840_s26 }
  0x89   :  { %694 = vrot.lane.b32.xlu1 %v350_v46, %s6841_s29 }
  0x8a   :  { %692 = vrot.lane.b32.xlu0 %v397_v42, %s6841_s29 }
  0x8d   :  { %758 = vrot.lane.b32.xlu1 %v367_v47, %s6842_s30  ;;  %v7234_v47 = vld [vmem:[#allocation2 + $0xe0] sm:$0xff] }
  0x8e   :  { %756 = vrot.lane.b32.xlu0 %v318_v44, %s6842_s30 }
  0x8f   :  { %v7168_v51 = vpop.permute.xlu1 %490 }
  0x90   :  { %v427_v52 = vpop.permute.xlu0 %426 }
  0x91   :  { %822 = vrot.lane.b32.xlu1 %v383_v50, %s6843_s20  ;;  %v921_v24 = vsel %vm53_vm0, %v7050_v15, %v427_v52 }
  0x92   :  { %820 = vrot.lane.b32.xlu0 %v334_v45, %s6843_s20  ;;  %v938_v30 = vsel %vm936_vm3, %v921_v24, %v7168_v51 }
  0x93   :  { %v7172_v54 = vpop.permute.xlu1 %554 }
  0x94   :  { %v553_v55 = vpop.permute.xlu0 %552  ;;  %v955_v15 = vsel %vm953_vm4, %v938_v30, %v7172_v54  ;;  %v338_v54 = vld [vmem:[#allocation2 + $0xe1] sm:$0xff] }
  0x95   :  { %886 = vrot.lane.b32.xlu1 %v399_v53, %s6844_s16  ;;  %v954_v16 = vsel %vm953_vm4, %v937_v12, %v553_v55  ;;  %v387_v12 = vld [vmem:[#allocation2 + $0xf1] sm:$0xff] }
  0x96   :  { %884 = vrot.lane.b32.xlu0 %v350_v46, %s6844_s16 }
  0x97   :  { %v619_v58 = vpop.permute.xlu1 %618 }
  0x98   :  { %v617_v59 = vpop.permute.xlu0 %616  ;;  %v972_v35 = vsel %vm970_vm5, %v955_v15, %v619_v58  ;;  %v340_v15 = vld [vmem:[#allocation2 + $0x101] sm:$0xff] }
  0x99   :  { %442 = vrot.lane.b32.xlu1 %v288_v56, %s6838_s22  ;;  %v971_v19 = vsel %vm970_vm5, %v954_v16, %v617_v59 }
  0x9a   :  { %440 = vrot.lane.b32.xlu0 %v287_v57, %s6838_s22 }
  0x9b   :  { %v7178_v62 = vpop.permute.xlu1 %428 }
  0x9c   :  { %v681_v63 = vpop.permute.xlu0 %680  ;;  %v922_v50 = vsel %vm53_vm0, %v7048_v14, %v7178_v62 }
  0x9d   :  { %506 = vrot.lane.b32.xlu1 %v304_v60, %s6837_s21  ;;  %v988_v20 = vsel %vm987_vm6, %v971_v19, %v681_v63  ;;  %v354_v63 = vld [vmem:[#allocation2 + $0xe2] sm:$0xff]  ;;  %v403_v19 = vld [vmem:[#allocation2 + $0xf2] sm:$0xff] }
  0x9e   :  { %504 = vrot.lane.b32.xlu0 %v303_v61, %s6837_s21 }
  0x9f   :  { %v745_v3 = vpop.permute.xlu1 %744 }
  0xa0   :  { %v683_v4 = vpop.permute.xlu0 %682  ;;  %v1005_v21 = vsel %vm1004_vm7, %v988_v20, %v745_v3 }
  0xa1   :  { %570 = vrot.lane.b32.xlu1 %v7182_v1, %s6839_s23  ;;  %v989_v37 = vsel %vm987_vm6, %v972_v35, %v683_v4 }
  0xa2   :  { %568 = vrot.lane.b32.xlu0 %v7184_v2, %s6839_s23 }
  0xa3   :  { %v7190_v6 = vpop.permute.xlu1 %492 }
  0xa4   :  { %v7192_v7 = vpop.permute.xlu0 %430  ;;  %v939_v52 = vsel %vm936_vm3, %v922_v50, %v7190_v6 }
  0xa5   :  { %634 = vrot.lane.b32.xlu1 %v336_v5, %s6840_s26  ;;  %v923_v51 = vsel %vm53_vm0, %v7079_v23, %v7192_v7 }
  0xa6   :  { %632 = vrot.lane.b32.xlu0 %v288_v56, %s6840_s26 }
  0xa7   :  { %v809_v10 = vpop.permute.xlu1 %808 }
  0xa8   :  { %v747_v11 = vpop.permute.xlu0 %746  ;;  %v1022_v25 = vsel %vm1021_vm8, %v1005_v21, %v809_v10 }
  0xa9   :  { %444 = vrot.lane.b32.xlu1 %v336_v5, %s6838_s22  ;;  %v1006_v38 = vsel %vm1004_vm7, %v989_v37, %v747_v11 }
  0xaa   :  { %696 = vrot.lane.b32.xlu0 %v304_v60, %s6841_s29 }
  0xab   :  { %v557_v17 = vpop.permute.xlu1 %556 }
  0xac   :  { %v495_v18 = vpop.permute.xlu0 %494  ;;  %v956_v55 = vsel %vm953_vm4, %v939_v52, %v557_v17 }
  0xad   :  { %760 = vrot.lane.b32.xlu1 %v7182_v1, %s6842_s30  ;;  %v940_v53 = vsel %vm936_vm3, %v923_v51, %v495_v18  ;;  %v7307_v51 = vld [vmem:[#allocation2 + $0x110] sm:$0xff] }
  0xae   :  { %698 = vrot.lane.b32.xlu0 %v352_v13, %s6841_s29 }
  0xaf   :  { %v873_v26 = vpop.permute.xlu1 %872 }
  0xb0   :  { %v811_v27 = vpop.permute.xlu0 %810  ;;  %v1039_v29 = vsel %vm1038_vm9, %v1022_v25, %v873_v26  ;;  %v7280_v25 = vld [vmem:[#allocation2 + $0x100] sm:$0xff] }
  0xb1   :  { %508 = vrot.lane.b32.xlu1 %v352_v13, %s6837_s21  ;;  %5623 = vmatprep.mubr.msk.f32.mxu0 %vm1065_vm10, %v1039_v29  ;;  %v1023_v41 = vsel %vm1021_vm8, %v1006_v38, %v811_v27 }
  0xb2   :  { %446 = vrot.lane.b32.xlu0 %v290_v22, %s6838_s22 }
  0xb3   :  { %v621_v33 = vpop.permute.xlu1 %620 }
  0xb4   :  { %v559_v34 = vpop.permute.xlu0 %558  ;;  %v973_v58 = vsel %vm970_vm5, %v956_v55, %v621_v33 }
  0xb5   :  { %824 = vrot.lane.b32.xlu1 %v336_v5, %s6843_s20  ;;  %v957_v56 = vsel %vm953_vm4, %v940_v53, %v559_v34 }
  0xb6   :  { %762 = vrot.lane.b32.xlu0 %v7216_v31, %s6842_s30 }
  0xb7   :  { %v623_v42 = vpop.permute.xlu1 %622 }
  0xb8   :  { %v875_v43 = vpop.permute.xlu0 %874  ;;  %v974_v23 = vsel %vm970_vm5, %v957_v56, %v623_v42  ;;  %v356_v42 = vld [vmem:[#allocation2 + $0x102] sm:$0xff]  ;;  %v389_v56 = vld [vmem:[#allocation2 + $0x111] sm:$0xff] }
  0xb9   :  { %v1040_v44 = vsel %vm1038_vm9, %v1023_v41, %v875_v43  ;;  %572 = vrot.lane.b32.xlu1 %v7216_v31, %s6839_s23 }
  0xba   :  { %510 = vrot.lane.b32.xlu0 %v306_v39, %s6837_s21  ;;  %5624 = vmatmul.mubr.msk.f32.vlgmr.msra.gmra.mrb[0].mxu0 %vm1065_vm10, %v1040_v44 }
  0xbb   :  { %v687_v45 = vpop.permute.xlu1 %686 }
  0xbc   :  { %v685_v46 = vpop.permute.xlu0 %684  ;;  %v991_v59 = vsel %vm987_vm6, %v974_v23, %v687_v45 }
  0xbd   :  { %888 = vrot.lane.b32.xlu1 %v352_v13, %s6844_s16  ;;  %v990_v60 = vsel %vm987_vm6, %v973_v58, %v685_v46 }
  0xbe   :  { %826 = vrot.lane.b32.xlu0 %v290_v22, %s6843_s20 }
  0xbf   :  { %v751_v48 = vpop.permute.xlu1 %750 }
  0xc0   :  { %v749_v49 = vpop.permute.xlu0 %748  ;;  %v1008_v61 = vsel %vm1004_vm7, %v991_v59, %v751_v48  ;;  %v405_v59 = vld [vmem:[#allocation2 + $0x112] sm:$0xff] }
  0xc1   :  { %636 = vrot.lane.b32.xlu1 %v290_v22, %s6840_s26  ;;  %v1007_v62 = vsel %vm1004_vm7, %v990_v60, %v749_v49 }
  0xc2   :  { %574 = vrot.lane.b32.xlu0 %v7234_v47, %s6839_s23 }
  0xc3   :  { %v815_v14 = vpop.permute.xlu1 %814 }
  0xc4   :  { %v813_v57 = vpop.permute.xlu0 %812  ;;  %v1025_v3 = vsel %vm1021_vm8, %v1008_v61, %v815_v14 }
  0xc5   :  { %638 = vrot.lane.b32.xlu1 %v338_v54, %s6840_s26  ;;  %v1024_v4 = vsel %vm1021_vm8, %v1007_v62, %v813_v57 }
  0xc6   :  { %890 = vrot.lane.b32.xlu0 %v306_v39, %s6844_s16 }
  0xc7   :  { %v879_v5 = vpop.permute.xlu1 %878 }
  0xc8   :  { %v877_v6 = vpop.permute.xlu0 %876  ;;  %v1042_v7 = vsel %vm1038_vm9, %v1025_v3, %v879_v5  ;;  %v7324_v3 = vld [vmem:[#allocation2 + $0x120] sm:$0xff] }
  0xc9   :  { %v1041_v8 = vsel %vm1038_vm9, %v1024_v4, %v877_v6  ;;  %702 = vrot.lane.b32.xlu1 %v354_v63, %s6841_s29 }
  0xca   :  { %700 = vrot.lane.b32.xlu0 %v306_v39, %s6841_s29  ;;  %5626 = vmatprep.mubr.msk.f32.mxu0 %vm1065_vm10, %v1041_v8 }
  0xcb   :  { %5627 = vmatmul.mubr.msk.f32.gmra.mrb[2].mxu0 %vm1065_vm10, %v1042_v7  ;;  %v435_v10 = vpop.permute.xlu1 %434 }
  0xcc   :  { %v433_v11 = vpop.permute.xlu0 %432  ;;  %v925_v38 = vsel %vm53_vm0, %v7109_v32, %v435_v10 }
  0xcd   :  { %766 = vrot.lane.b32.xlu1 %v7265_v9, %s6842_s30  ;;  %v924_v29 = vsel %vm53_vm0, %v7096_v28, %v433_v11  ;;  %v7336_v11 = vld [vmem:[#allocation2 + $0x121] sm:$0xff] }
  0xce   :  { %764 = vrot.lane.b32.xlu0 %v7234_v47, %s6842_s30 }
  0xcf   :  { %v499_v13 = vpop.permute.xlu1 %498 }
  0xd0   :  { %v497_v16 = vpop.permute.xlu0 %496  ;;  %v942_v39 = vsel %vm936_vm3, %v925_v38, %v499_v13 }
  0xd1   :  { %830 = vrot.lane.b32.xlu1 %v387_v12, %s6843_s20  ;;  %v941_v30 = vsel %vm936_vm3, %v924_v29, %v497_v16 }
  0xd2   :  { %828 = vrot.lane.b32.xlu0 %v338_v54, %s6843_s20 }
  0xd3   :  { %v563_v17 = vpop.permute.xlu1 %562 }
  0xd4   :  { %v561_v18 = vpop.permute.xlu0 %560  ;;  %v959_v43 = vsel %vm953_vm4, %v942_v39, %v563_v17  ;;  %v407_v39 = vld [vmem:[#allocation2 + $0x132] sm:$0xff] }
  0xd5   :  { %448 = vrot.lane.b32.xlu1 %v338_v54, %s6838_s22  ;;  %v958_v33 = vsel %vm953_vm4, %v941_v30, %v561_v18 }
  0xd6   :  { %892 = vrot.lane.b32.xlu0 %v354_v63, %s6844_s16 }
  0xd7   :  { %v627_v20 = vpop.permute.xlu1 %626 }
  0xd8   :  { %v625_v21 = vpop.permute.xlu0 %624  ;;  %v976_v48 = vsel %vm970_vm5, %v959_v43, %v627_v20 }
  0xd9   :  { %450 = vrot.lane.b32.xlu1 %v387_v12, %s6838_s22  ;;  %v975_v37 = vsel %vm970_vm5, %v958_v33, %v625_v21  ;;  %v7359_v33 = vld [vmem:[#allocation2 + $0x130] sm:$0xff] }
  0xda   :  { %894 = vrot.lane.b32.xlu0 %v403_v19, %s6844_s16 }
  0xdb   :  { %v691_v22 = vpop.permute.xlu1 %690 }
  0xdc   :  { %v689_v24 = vpop.permute.xlu0 %688  ;;  %v993_v49 = vsel %vm987_vm6, %v976_v48, %v691_v22  ;;  %v7349_v22 = vld [vmem:[#allocation2 + $0x122] sm:$0xff] }
  0xdd   :  { %514 = vrot.lane.b32.xlu1 %v403_v19, %s6837_s21  ;;  %v992_v28 = vsel %vm987_vm6, %v975_v37, %v689_v24  ;;  %v391_v37 = vld [vmem:[#allocation2 + $0x131] sm:$0xff] }
  0xde   :  { %512 = vrot.lane.b32.xlu0 %v354_v63, %s6837_s21 }
  0xdf   :  { %v755_v26 = vpop.permute.xlu1 %754 }
  0xe0   :  { %v753_v27 = vpop.permute.xlu0 %752  ;;  %v1010_v50 = vsel %vm1004_vm7, %v993_v49, %v755_v26 }
  0xe1   :  { %578 = vrot.lane.b32.xlu1 %v7280_v25, %s6839_s23  ;;  %v1009_v41 = vsel %vm1004_vm7, %v992_v28, %v753_v27 }
  0xe2   :  { %576 = vrot.lane.b32.xlu0 %v7265_v9, %s6839_s23 }
  0xe3   :  { %v819_v34 = vpop.permute.xlu1 %818 }
  0xe4   :  { %v817_v35 = vpop.permute.xlu0 %816  ;;  %v1027_v52 = vsel %vm1021_vm8, %v1010_v50, %v819_v34 }
  0xe5   :  { %642 = vrot.lane.b32.xlu1 %v340_v15, %s6840_s26  ;;  %v1026_v44 = vsel %vm1021_vm8, %v1009_v41, %v817_v35 }
  0xe6   :  { %640 = vrot.lane.b32.xlu0 %v387_v12, %s6840_s26 }
  0xe7   :  { %v437_v45 = vpop.permute.xlu1 %436 }
  0xe8   :  { %v881_v46 = vpop.permute.xlu0 %880  ;;  %v926_v6 = vsel %vm53_vm0, %v7127_v36, %v437_v45 }
  0xe9   :  { %v1043_v32 = vsel %vm1038_vm9, %v1026_v44, %v881_v46  ;;  %706 = vrot.lane.b32.xlu1 %v356_v42, %s6841_s29 }
  0xea   :  { %704 = vrot.lane.b32.xlu0 %v403_v19, %s6841_s29  ;;  %5629 = vmatprep.mubr.msk.f32.mxu0 %vm1065_vm10, %v1043_v32 }
  0xeb   :  { %v439_v53 = vpop.permute.xlu1 %438 }
  0xec   :  { %v883_v54 = vpop.permute.xlu0 %882  ;;  %v927_v7 = vsel %vm53_vm0, %v7141_v40, %v439_v53 }
  0xed   :  { %v1044_v55 = vsel %vm1038_vm9, %v1027_v52, %v883_v54  ;;  %770 = vrot.lane.b32.xlu1 %v7307_v51, %s6842_s30  ;;  %v271_v52 = vld [vmem:[#allocation2 + $0xa0] sm:$0xff] }
  0xee   :  { %768 = vrot.lane.b32.xlu0 %v7280_v25, %s6842_s30  ;;  %5630 = vmatmul.mubr.msk.f32.gmra.mrb[4].mxu0 %vm1065_vm10, %v1044_v55 }
  0xef   :  { %v503_v14 = vpop.permute.xlu1 %502 }
  0xf0   :  { %v501_v57 = vpop.permute.xlu0 %500  ;;  %v944_v8 = vsel %vm936_vm3, %v927_v7, %v503_v14 }
  0xf1   :  { %834 = vrot.lane.b32.xlu1 %v389_v56, %s6843_s20  ;;  %v943_v10 = vsel %vm936_vm3, %v926_v6, %v501_v57 }
  0xf2   :  { %832 = vrot.lane.b32.xlu0 %v340_v15, %s6843_s20 }
  0xf3   :  { %v567_v58 = vpop.permute.xlu1 %566 }
  0xf4   :  { %v565_v23 = vpop.permute.xlu0 %564  ;;  %v961_v12 = vsel %vm953_vm4, %v944_v8, %v567_v58 }
  0xf5   :  { %452 = vrot.lane.b32.xlu1 %v340_v15, %s6838_s22  ;;  %v960_v13 = vsel %vm953_vm4, %v943_v10, %v565_v23 }
  0xf6   :  { %896 = vrot.lane.b32.xlu0 %v356_v42, %s6844_s16 }
  0xf7   :  { %v631_v60 = vpop.permute.xlu1 %630 }
  0xf8   :  { %v629_v61 = vpop.permute.xlu0 %628  ;;  %v978_v40 = vsel %vm970_vm5, %v961_v12, %v631_v60 }
  0xf9   :  { %454 = vrot.lane.b32.xlu1 %v389_v56, %s6838_s22  ;;  %v977_v17 = vsel %vm970_vm5, %v960_v13, %v629_v61 }
  0xfa   :  { %898 = vrot.lane.b32.xlu0 %v405_v59, %s6844_s16 }
  0xfb   :  { %v695_v62 = vpop.permute.xlu1 %694 }
  0xfc   :  { %v693_v63 = vpop.permute.xlu0 %692  ;;  %v995_v18 = vsel %vm987_vm6, %v978_v40, %v695_v62 }
  0xfd   :  { %518 = vrot.lane.b32.xlu1 %v405_v59, %s6837_s21  ;;  %v994_v19 = vsel %vm987_vm6, %v977_v17, %v693_v63 }
  0xfe   :  { %516 = vrot.lane.b32.xlu0 %v356_v42, %s6837_s21 }
  0xff   :  { %v759_v4 = vpop.permute.xlu1 %758 }
 0x100   :  { %v757_v5 = vpop.permute.xlu0 %756  ;;  %v1012_v20 = vsel %vm1004_vm7, %v995_v18, %v759_v4 }
 0x101   :  { %582 = vrot.lane.b32.xlu1 %v7324_v3, %s6839_s23  ;;  %v1011_v21 = vsel %vm1004_vm7, %v994_v19, %v757_v5 }
 0x102   :  { %580 = vrot.lane.b32.xlu0 %v7307_v51, %s6839_s23 }
 0x103   :  { %v823_v36 = vpop.permute.xlu1 %822 }
 0x104   :  { %v821_v16 = vpop.permute.xlu0 %820  ;;  %v1029_v24 = vsel %vm1021_vm8, %v1012_v20, %v823_v36 }
 0x105   :  { %646 = vrot.lane.b32.xlu1 %v7336_v11, %s6840_s26  ;;  %v1028_v26 = vsel %vm1021_vm8, %v1011_v21, %v821_v16 }
 0x106   :  { %644 = vrot.lane.b32.xlu0 %v389_v56, %s6840_s26 }
 0x107   :  { %v887_v27 = vpop.permute.xlu1 %886 }
 0x108   :  { %v885_v29 = vpop.permute.xlu0 %884  ;;  %v1046_v30 = vsel %vm1038_vm9, %v1029_v24, %v887_v27 }
 0x109   :  { %v1045_v15 = vsel %vm1038_vm9, %v1028_v26, %v885_v29  ;;  %710 = vrot.lane.b32.xlu1 %v7349_v22, %s6841_s29 }
 0x10a   :  { %708 = vrot.lane.b32.xlu0 %v405_v59, %s6841_s29  ;;  %5632 = vmatprep.mubr.msk.f32.mxu0 %vm1065_vm10, %v1045_v15 }
 0x10b   :  { %5633 = vmatmul.mubr.msk.f32.gmra.mrb[6].mxu0 %vm1065_vm10, %v1046_v30  ;;  %v7362_v34 = vpop.permute.xlu1 %442 }
 0x10c   :  { %v7364_v35 = vpop.permute.xlu0 %440  ;;  %v929_v4 = vsel %vm53_vm0, %v7184_v2, %v7362_v34 }
 0x10d   :  { %774 = vrot.lane.b32.xlu1 %v7359_v33, %s6842_s30  ;;  %v928_v55 = vsel %vm53_vm0, %v271_v52, %v7364_v35 }
 0x10e   :  { %772 = vrot.lane.b32.xlu0 %v7324_v3, %s6842_s30 }
 0x10f   :  { %v507_v38 = vpop.permute.xlu1 %506 }
 0x110   :  { %v505_v28 = vpop.permute.xlu0 %504  ;;  %v946_v5 = vsel %vm936_vm3, %v929_v4, %v507_v38 }
 0x111   :  { %838 = vrot.lane.b32.xlu1 %v391_v37, %s6843_s20  ;;  %v945_v56 = vsel %vm936_vm3, %v928_v55, %v505_v28 }
 0x112   :  { %836 = vrot.lane.b32.xlu0 %v7336_v11, %s6843_s20 }
 0x113   :  { %v571_v41 = vpop.permute.xlu1 %570 }
 0x114   :  { %v569_v42 = vpop.permute.xlu0 %568  ;;  %v963_v6 = vsel %vm953_vm4, %v946_v5, %v571_v41 }
 0x115   :  { %902 = vrot.lane.b32.xlu1 %v407_v39, %s6844_s16  ;;  %v962_v14 = vsel %vm953_vm4, %v945_v56, %v569_v42 }
 0x116   :  { %900 = vrot.lane.b32.xlu0 %v7349_v22, %s6844_s16 }
 0x117   :  { %v635_v43 = vpop.permute.xlu1 %634 }
 0x118   :  { %v633_v44 = vpop.permute.xlu0 %632  ;;  %v980_v10 = vsel %vm970_vm5, %v963_v6, %v635_v43 }
 0x119   :  { %v979_v23 = vsel %vm970_vm5, %v962_v14, %v633_v44 }
 0x11b   :  { %v445_v45 = vpop.permute.xlu1 %444 }
 0x11c   :  { %v697_v46 = vpop.permute.xlu0 %696  ;;  %v930_v20 = vsel %vm53_vm0, %v7182_v1, %v445_v45 }
 0x11d   :  { %v996_v59 = vsel %vm987_vm6, %v979_v23, %v697_v46 }
 0x11f   :  { %v761_v48 = vpop.permute.xlu1 %760 }
 0x120   :  { %v699_v32 = vpop.permute.xlu0 %698  ;;  %v1013_v60 = vsel %vm1004_vm7, %v996_v59, %v761_v48 }
 0x121   :  { %v997_v11 = vsel %vm987_vm6, %v980_v10, %v699_v32 }
 0x123   :  { %v509_v49 = vpop.permute.xlu1 %508 }
 0x124   :  { %v447_v50 = vpop.permute.xlu0 %446  ;;  %v947_v21 = vsel %vm936_vm3, %v930_v20, %v509_v49 }
 0x125   :  { %v931_v29 = vsel %vm53_vm0, %v7216_v31, %v447_v50 }
 0x127   :  { %v825_v53 = vpop.permute.xlu1 %824 }
 0x128   :  { %v763_v54 = vpop.permute.xlu0 %762  ;;  %v1030_v61 = vsel %vm1021_vm8, %v1013_v60, %v825_v53 }
 0x129   :  { %v1014_v12 = vsel %vm1004_vm7, %v997_v11, %v763_v54 }
 0x12b   :  { %v573_v57 = vpop.permute.xlu1 %572 }
 0x12c   :  { %v511_v58 = vpop.permute.xlu0 %510  ;;  %v964_v22 = vsel %vm953_vm4, %v947_v21, %v573_v57 }
 0x12d   :  { %v948_v15 = vsel %vm936_vm3, %v931_v29, %v511_v58  ;;  %v1942_v29 = vld [vmem:[%s9698_s4 + $0x98] sm:$0xff] }
 0x12f   :  { %v889_v62 = vpop.permute.xlu1 %888 }
 0x130   :  { %v827_v63 = vpop.permute.xlu0 %826  ;;  %v1047_v3 = vsel %vm1038_vm9, %v1030_v61, %v889_v62 }
 0x131   :  { %5635 = vmatprep.mubr.msk.f32.mxu0 %vm1065_vm10, %v1047_v3  ;;  %v1031_v13 = vsel %vm1021_vm8, %v1014_v12, %v827_v63 }
 0x133   :  { %v637_v7 = vpop.permute.xlu1 %636 }
 0x134   :  { %v575_v8 = vpop.permute.xlu0 %574  ;;  %v981_v27 = vsel %vm970_vm5, %v964_v22, %v637_v7 }
 0x135   :  { %v965_v34 = vsel %vm953_vm4, %v948_v15, %v575_v8 }
 0x137   :  { %v639_v36 = vpop.permute.xlu1 %638 }
 0x138   :  { %v891_v16 = vpop.permute.xlu0 %890  ;;  %v982_v38 = vsel %vm970_vm5, %v965_v34, %v639_v36 }
 0x139   :  { %v1048_v2 = vsel %vm1038_vm9, %v1031_v13, %v891_v16 }
 0x13a   :  { %5636 = vmatmul.mubr.msk.f32.gmra.mrb[8].mxu0 %vm1065_vm10, %v1048_v2 }
 0x13b   :  { %v703_v40 = vpop.permute.xlu1 %702 }
 0x13c   :  { %v701_v17 = vpop.permute.xlu0 %700  ;;  %v999_v39 = vsel %vm987_vm6, %v982_v38, %v703_v40 }
 0x13d   :  { %v998_v30 = vsel %vm987_vm6, %v981_v27, %v701_v17  ;;  %v1939_v17 = vld [vmem:[%s9698_s4 + $0x80] sm:$0xff]  ;;  %v1941_v27 = vld [vmem:[%s9698_s4 + $0x90] sm:$0xff] }
 0x13e   :  { %v5803_v34 = vpack.c.bf16 %v1942_v29, %v1941_v27  ;;  %v1936_v27 = vld [vmem:[%s9698_s4 + $0x68] sm:$0xff] }
 0x13f   :  { %v767_v18 = vpop.permute.xlu1 %766 }
 0x140   :  { %v765_v19 = vpop.permute.xlu0 %764  ;;  %v1016_v31 = vsel %vm1004_vm7, %v999_v39, %v767_v18  ;;  %v1940_v18 = vld [vmem:[%s9698_s4 + $0x88] sm:$0xff]  ;;  %v1927_v39 = vld [vmem:[%s9698_s4 + $0x20] sm:$0xff] }
 0x141   :  { %v1015_v33 = vsel %vm1004_vm7, %v998_v30, %v765_v19  ;;  %v1923_v19 = vld [vmem:[%s9698_s4] sm:$0xff]  ;;  %v5799_v22 = vpack.c.bf16 %v1940_v18, %v1939_v17  ;;  %v1925_v30 = vld [vmem:[%s9698_s4 + $0x10] sm:$0xff] }
 0x143   :  { %v831_v24 = vpop.permute.xlu1 %830  ;;  %5800 = vmatprep.subr.bf16.mxu0 %v5799_v22  ;;  %5991 = vmatprep.subr.bf16.mxu1 %v5799_v22 }
 0x144   :  { %v829_v26 = vpop.permute.xlu0 %828  ;;  %v1033_v41 = vsel %vm1021_vm8, %v1016_v31, %v831_v24  ;;  %v1924_v24 = vld [vmem:[%s9698_s4 + $0x8] sm:$0xff] }
 0x145   :  { %v1032_v1 = vsel %vm1021_vm8, %v1015_v33, %v829_v26  ;;  %v5801_v26 = vpack.c.bf16 %v1924_v24, %v1923_v19  ;;  %v1928_v31 = vld [vmem:[%s9698_s4 + $0x28] sm:$0xff] }
 0x147   :  { %v449_v35 = vpop.permute.xlu1 %448  ;;  %5802 = vmatpush3.bf16.msra.mxu0 %v5801_v26  ;;  %5999 = vmatpush3.bf16.msra.mxu1 %v5801_v26  ;;  %v1935_v26 = vld [vmem:[%s9698_s4 + $0x60] sm:$0xff] }
 0x148   :  { %v893_v37 = vpop.permute.xlu0 %892  ;;  %v932_v56 = vsel %vm53_vm0, %v7234_v47, %v449_v35  ;;  %v1943_v35 = vld [vmem:[%s9698_s4 + $0xa0] sm:$0xff]  ;;  %5804 = vmatprep.subr.bf16.mxu0 %v5803_v34  ;;  %5992 = vmatprep.subr.bf16.mxu1 %v5803_v34  ;;  %v1954_v34 = vld [vmem:[%s9698_s4 + $0xf8] sm:$0xff] }
 0x149   :  { %v1049_v28 = vsel %vm1038_vm9, %v1032_v1, %v893_v37  ;;  %v1926_v1 = vld [vmem:[%s9698_s4 + $0x18] sm:$0xff]  ;;  %v1944_v37 = vld [vmem:[%s9698_s4 + $0xa8] sm:$0xff] }
 0x14a   :  { %5638 = vmatprep.mubr.msk.f32.mxu0 %vm1065_vm10, %v1049_v28  ;;  %v5805_v38 = vpack.c.bf16 %v1926_v1, %v1925_v30  ;;  %v5807_v28 = vpack.c.bf16 %v1944_v37, %v1943_v35  ;;  %v5825_v30 = vpack.c.bf16 %v1936_v27, %v1935_v26  ;;  %v1937_v35 = vld [vmem:[%s9698_s4 + $0x70] sm:$0xff]  ;;  %v1938_v37 = vld [vmem:[%s9698_s4 + $0x78] sm:$0xff] }
 0x14b   :  { %v451_v42 = vpop.permute.xlu1 %450 }
 0x14c   :  { %v895_v43 = vpop.permute.xlu0 %894  ;;  %v933_v60 = vsel %vm53_vm0, %v7265_v9, %v451_v42  ;;  %v1946_v42 = vld [vmem:[%s9698_s4 + $0xb8] sm:$0xff]  ;;  %5806 = vmatpush3.bf16.msra.mxu0 %v5805_v38  ;;  %6000 = vmatpush3.bf16.msra.mxu1 %v5805_v38  ;;  %v5829_v38 = vpack.c.bf16 %v1938_v37, %v1937_v35 }
 0x14d   :  { %v1050_v44 = vsel %vm1038_vm9, %v1033_v41, %v895_v43  ;;  %v1945_v41 = vld [vmem:[%s9698_s4 + $0xb0] sm:$0xff]  ;;  %v5809_v43 = vpack.c.bf16 %v1928_v31, %v1927_v39  ;;  %5808 = vmatprep.subr.bf16.mxu0 %v5807_v28  ;;  %5993 = vmatprep.subr.bf16.mxu1 %v5807_v28  ;;  %v1328_v28 = vld [vmem:[#allocation3 + $0x2] sm:$0xff] }
 0x14e   :  { %5639 = vmatmul.mubr.msk.f32.gmra.mrb[10].mxu0 %vm1065_vm10, %v1050_v44  ;;  %v1312_v39 = vld [vmem:[#allocation3 + $0x1] sm:$0xff] }
 0x14f   :  { %v515_v45 = vpop.permute.xlu1 %514 }
 0x150   :  { %v513_v46 = vpop.permute.xlu0 %512  ;;  %v950_v62 = vsel %vm936_vm3, %v933_v60, %v515_v45  ;;  %5810 = vmatpush3.bf16.msra.mxu0 %v5809_v43  ;;  %6001 = vmatpush3.bf16.msra.mxu1 %v5809_v43  ;;  %v1931_v60 = vld [vmem:[%s9698_s4 + $0x40] sm:$0xff] }
 0x151   :  { %v949_v14 = vsel %vm936_vm3, %v932_v56, %v513_v46  ;;  %v5811_v46 = vpack.c.bf16 %v1946_v42, %v1945_v41 }
 0x153   :  { %v579_v48 = vpop.permute.xlu1 %578  ;;  %5812 = vmatprep.subr.bf16.mxu0 %v5811_v46  ;;  %5994 = vmatprep.subr.bf16.mxu1 %v5811_v46 }
 0x154   :  { %v577_v32 = vpop.permute.xlu0 %576  ;;  %v967_v3 = vsel %vm953_vm4, %v950_v62, %v579_v48  ;;  %v1929_v48 = vld [vmem:[%s9698_s4 + $0x30] sm:$0xff] }
 0x155   :  { %v966_v57 = vsel %vm953_vm4, %v949_v14, %v577_v32  ;;  %v1930_v32 = vld [vmem:[%s9698_s4 + $0x38] sm:$0xff] }
 0x156   :  { %v5813_v56 = vpack.c.bf16 %v1930_v32, %v1929_v48 }
 0x157   :  { %v643_v49 = vpop.permute.xlu1 %642 }
 0x158   :  { %v641_v50 = vpop.permute.xlu0 %640  ;;  %v984_v6 = vsel %vm970_vm5, %v967_v3, %v643_v49  ;;  %v1947_v49 = vld [vmem:[%s9698_s4 + $0xc0] sm:$0xff]  ;;  %v1949_v3 = vld [vmem:[%s9698_s4 + $0xd0] sm:$0xff]  ;;  %5814 = vmatpush3.bf16.msra.mxu0 %v5813_v56  ;;  %6002 = vmatpush3.bf16.msra.mxu1 %v5813_v56 }
 0x159   :  { %v983_v59 = vsel %vm970_vm5, %v966_v57, %v641_v50  ;;  %v1948_v50 = vld [vmem:[%s9698_s4 + $0xc8] sm:$0xff] }
 0x15b   :  { %v707_v52 = vpop.permute.xlu1 %706 }
 0x15c   :  { %v705_v53 = vpop.permute.xlu0 %704  ;;  %v1001_v8 = vsel %vm987_vm6, %v984_v6, %v707_v52 }
 0x15d   :  { %v1000_v61 = vsel %vm987_vm6, %v983_v59, %v705_v53  ;;  %v5815_v59 = vpack.c.bf16 %v1948_v50, %v1947_v49 }
 0x15f   :  { %v771_v54 = vpop.permute.xlu1 %770  ;;  %5816 = vmatprep.subr.bf16.mxu0 %v5815_v59  ;;  %5995 = vmatprep.subr.bf16.mxu1 %v5815_v59 }
 0x160   :  { %v769_v55 = vpop.permute.xlu0 %768  ;;  %v1018_v9 = vsel %vm1004_vm7, %v1001_v8, %v771_v54 }
 0x161   :  { %v1017_v63 = vsel %vm1004_vm7, %v1000_v61, %v769_v55  ;;  %v1932_v61 = vld [vmem:[%s9698_s4 + $0x48] sm:$0xff] }
 0x163   :  { %v835_v58 = vpop.permute.xlu1 %834 }
 0x164   :  { %v833_v23 = vpop.permute.xlu0 %832  ;;  %v1035_v10 = vsel %vm1021_vm8, %v1018_v9, %v835_v58 }
 0x165   :  { %v1034_v47 = vsel %vm1021_vm8, %v1017_v63, %v833_v23 }
 0x167   :  { %v453_v4 = vpop.permute.xlu1 %452 }
 0x168   :  { %v897_v5 = vpop.permute.xlu0 %896  ;;  %v934_v52 = vsel %vm53_vm0, %v7280_v25, %v453_v4 }
 0x169   :  { %v1051_v7 = vsel %vm1038_vm9, %v1034_v47, %v897_v5  ;;  %v1950_v47 = vld [vmem:[%s9698_s4 + $0xd8] sm:$0xff] }
 0x16a   :  { %5641 = vmatprep.mubr.msk.f32.mxu0 %vm1065_vm10, %v1051_v7 }
 0x16b   :  { %v455_v11 = vpop.permute.xlu1 %454 }
 0x16c   :  { %v899_v12 = vpop.permute.xlu0 %898  ;;  %v935_v53 = vsel %vm53_vm0, %v7307_v51, %v455_v11  ;;  %vm4587_vm0 = vcmask 257024  }
 0x16d   :  { %v1052_v13 = vsel %vm1038_vm9, %v1035_v10, %v899_v12  ;;  %v5817_v10 = vpack.c.bf16 %v1932_v61, %v1931_v60 }
 0x16e   :  { %5642 = vmatmul.mubr.msk.f32.gmra.mrb[12].mxu0 %vm1065_vm10, %v1052_v13  ;;  %v5819_v13 = vpack.c.bf16 %v1950_v47, %v1949_v3 }
 0x16f   :  { %v519_v36 = vpop.permute.xlu1 %518  ;;  %6003 = vmatpush3.bf16.msra.mxu1 %v5817_v10  ;;  %5818 = vmatpush3.bf16.msra.mxu0 %v5817_v10 }
 0x170   :  { %v517_v16 = vpop.permute.xlu0 %516  ;;  %v952_v54 = vsel %vm936_vm3, %v935_v53, %v519_v36  ;;  %v7766_v36 = vld [vmem:[%s9699_s3] ss:$0 sm:$0xff]  ;;  %5996 = vmatprep.subr.bf16.mxu1 %v5819_v13  ;;  %5820 = vmatprep.subr.bf16.mxu0 %v5819_v13 }
 0x171   :  { %v951_v55 = vsel %vm936_vm3, %v934_v52, %v517_v16  ;;  %v1933_v16 = vld [vmem:[%s9698_s4 + $0x50] sm:$0xff] }
 0x173   :  { %v583_v2 = vpop.permute.xlu1 %582 }
 0x174   :  { %v581_v40 = vpop.permute.xlu0 %580  ;;  %v969_v14 = vsel %vm953_vm4, %v952_v54, %v583_v2  ;;  %v1934_v2 = vld [vmem:[%s9698_s4 + $0x58] sm:$0xff] }
 0x175   :  { %v968_v57 = vsel %vm953_vm4, %v951_v55, %v581_v40  ;;  %v5821_v40 = vpack.c.bf16 %v1934_v2, %v1933_v16 }
 0x177   :  { %v647_v20 = vpop.permute.xlu1 %646  ;;  %6004 = vmatpush3.bf16.msra.mxu1 %v5821_v40  ;;  %5822 = vmatpush3.bf16.msra.mxu0 %v5821_v40 }
 0x178   :  { %v645_v21 = vpop.permute.xlu0 %644  ;;  %v986_v25 = vsel %vm970_vm5, %v969_v14, %v647_v20  ;;  %v1951_v20 = vld [vmem:[%s9698_s4 + $0xe0] sm:$0xff] }
 0x179   :  { %v985_v51 = vsel %vm970_vm5, %v968_v57, %v645_v21  ;;  %v1952_v21 = vld [vmem:[%s9698_s4 + $0xe8] sm:$0xff]  ;;  %v1955_v14 = vld [vmem:[%s9698_s4 + $0x100] sm:$0xff] }
 0x17a   :  { %v5823_v24 = vpack.c.bf16 %v1952_v21, %v1951_v20  ;;  %v1956_v57 = vld [vmem:[%s9698_s4 + $0x108] sm:$0xff] }
 0x17b   :  { %v711_v15 = vpop.permute.xlu1 %710 }
 0x17c   :  { %v709_v33 = vpop.permute.xlu0 %708  ;;  %v1003_v62 = vsel %vm987_vm6, %v986_v25, %v711_v15  ;;  %5824 = vmatprep.subr.bf16.mxu0 %v5823_v24  ;;  %5997 = vmatprep.subr.bf16.mxu1 %v5823_v24 }
 0x17d   :  { %v1002_v63 = vsel %vm987_vm6, %v985_v51, %v709_v33  ;;  %v1953_v33 = vld [vmem:[%s9698_s4 + $0xf0] sm:$0xff]  ;;  %6005 = vmatpush3.bf16.msra.mxu1 %v5825_v30  ;;  %5826 = vmatpush3.bf16.msra.mxu0 %v5825_v30 }
 0x17e   :  { %v5827_v1 = vpack.c.bf16 %v1954_v34, %v1953_v33 }
 0x17f   :  { %v775_v44 = vpop.permute.xlu1 %774 }
 0x180   :  { %v773_v45 = vpop.permute.xlu0 %772  ;;  %v1020_v4 = vsel %vm1004_vm7, %v1003_v62, %v775_v44  ;;  %5828 = vmatprep.subr.bf16.mxu0 %v5827_v1  ;;  %5998 = vmatprep.subr.bf16.mxu1 %v5827_v1 }
 0x181   :  { %v1019_v5 = vsel %vm1004_vm7, %v1002_v63, %v773_v45  ;;  %6006 = vmatpush3.bf16.msra.mxu1 %v5829_v38  ;;  %5830 = vmatpush3.bf16.msra.mxu0 %v5829_v38 }
 0x183   :  { %v839_v58 = vpop.permute.xlu1 %838 }
 0x184   :  { %v837_v23 = vpop.permute.xlu0 %836  ;;  %v1037_v6 = vsel %vm1021_vm8, %v1020_v4, %v839_v58  ;;  %v7851_v58 = vpack.c.bf16 %v1956_v57, %v1955_v14 }
 0x185   :  { %v1036_v7 = vsel %vm1021_vm8, %v1019_v5, %v837_v23 }
 0x186   :  { %5832 = vmatprep.subr.bf16.mxu0 %v7851_v58 }
 0x187   :  { %v903_v8 = vpop.permute.xlu1 %902 }
 0x188   :  { %v901_v9 = vpop.permute.xlu0 %900  ;;  %v1054_v11 = vsel %vm1038_vm9, %v1037_v6, %v903_v8 }
 0x189   :  { %v1053_v12 = vsel %vm1038_vm9, %v1036_v7, %v901_v9 }
 0x18a   :  { %5644 = vmatprep.mubr.msk.f32.mxu0 %vm1065_vm10, %v1053_v12 }
 0x18b   :  { %5645 = vmatmul.mubr.msk.f32.gmra.mrb[14].mxu0 %vm1065_vm10, %v1054_v11 }
 0x18d   :  { %v5625_v17 = vpop.f32.mrb[0].mxu0 }
 0x18e   :  { %v7775_v18 = vadd.f32 %v5625_v17, %v7766_v36  ;;  %v1184_v19 = vpop.f32.mrb[1].mxu0 }
 0x18f   :  { %v7784_v22 = vadd.f32 %v7766_v36, %v1184_v19 }
 0x190   :  { %v1264_v29 = vmax.f32 %v7775_v18, 0.0 }
 0x191   :  { %v1263_v15 = vmax.f32 %v7784_v22, 0.0 }
 0x192   :  { %1281 = vst.msk [vmem:[#allocation3 + $0x21] sm:$0xff] %vm95_vm11, %v1264_v29 }
 0x193   :  { %1280 = vst.msk [vmem:[#allocation3 + $0x11] sm:$0xff] %vm95_vm11, %v1263_v15 }
 0x199   :  { %v7812_v31 = vld [vmem:[#allocation3 + $0x20] sm:$0xff] }
 0x19a   :  { %v6019_v41 = vpack.i.bf16 %v1328_v28, %v7812_v31  ;;  %v1376_v42 = vld [vmem:[#allocation3 + $0x12] sm:$0xff]  ;;  %v7817_v45 = vld [vmem:[#allocation3 + $0x22] sm:$0xff] }
 0x19b   :  { %v6024_v43 = vpack.i.bf16 %v1312_v39, %v1376_v42  ;;  %v7815_v44 = vld [vmem:[#allocation3 + $0x11] sm:$0xff]  ;;  %v7822_v48 = vld [vmem:[#allocation3 + $0x21] sm:$0xff] }
 0x19c   :  { %6020 = vrot.lane.b32.xlu1 %v6019_v41, %s6845_s25  ;;  %v7820_v46 = vld [vmem:[#allocation3 + $0x10] sm:$0xff]  ;;  %v6034_v49 = vpack.i.bf16 %v7815_v44, %v7817_v45 }
 0x19d   :  { %6025 = vrot.lane.b32.xlu0 %v6024_v43, %s6846_s27  ;;  %v6029_v53 = vpack.i.bf16 %v7820_v46, %v7822_v48 }
 0x19e   :  { %v5628_v32 = vpop.f32.mrb[2].mxu0 }
 0x19f   :  { %v7828_v50 = vadd.f32 %v5628_v32, %v7766_v36  ;;  %v1194_v52 = vpop.f32.mrb[3].mxu0 }
 0x1a0   :  { %v7833_v54 = vadd.f32 %v7766_v36, %v1194_v52  ;;  %6035 = vrot.lane.b32.xlu1 %v6034_v49, %s6846_s27 }
 0x1a1   :  { %v1266_v55 = vmax.f32 %v7828_v50, 0.0  ;;  %6030 = vrot.lane.b32.xlu0 %v6029_v53, %s6847_s28  ;;  %v2994_v50 = vld [vmem:[%s9700_s6 + $0x100] sm:$0xff] }
 0x1a2   :  { %v1265_v56 = vmax.f32 %v7833_v54, 0.0  ;;  %v2995_v54 = vld [vmem:[%s9700_s6 + $0x108] sm:$0xff] }
 0x1a3   :  { %1283 = vst.msk [vmem:[#allocation3 + $0x41] sm:$0xff] %vm95_vm11, %v1266_v55 }
 0x1a4   :  { %1282 = vst.msk [vmem:[#allocation3 + $0x31] sm:$0xff] %vm95_vm11, %v1265_v56 }
 0x1aa   :  { %v7853_v23 = vld [vmem:[#allocation3 + $0x40] sm:$0xff] }
 0x1ab   :  { %v6039_v59 = vpack.i.bf16 %v7817_v45, %v7853_v23  ;;  %v7858_v25 = vld [vmem:[#allocation3 + $0x30] sm:$0xff]  ;;  %v7871_v3 = vld [vmem:[#allocation3 + $0x42] sm:$0xff] }
 0x1ac   :  { %v6044_v51 = vpack.i.bf16 %v1376_v42, %v7858_v25  ;;  %v7861_v60 = vld [vmem:[#allocation3 + $0x31] sm:$0xff]  ;;  %v7874_v47 = vld [vmem:[#allocation3 + $0x41] sm:$0xff] }
 0x1ad   :  { %6040 = vrot.lane.b32.xlu1 %v6039_v59, %s6845_s25  ;;  %v7864_v61 = vld [vmem:[#allocation3 + $0x32] sm:$0xff]  ;;  %v6049_v62 = vpack.i.bf16 %v7812_v31, %v7861_v60  ;;  %v6064_v4 = vpack.i.bf16 %v7861_v60, %v7871_v3  ;;  %v6059_v5 = vpack.i.bf16 %v7858_v25, %v7874_v47 }
 0x1ae   :  { %6045 = vrot.lane.b32.xlu0 %v6044_v51, %s6845_s25  ;;  %v6054_v63 = vpack.i.bf16 %v7822_v48, %v7864_v61  ;;  %v1416_v42 = vld [vmem:[#allocation3 + $0x91] sm:$0xff] }
 0x1af   :  { %v1400_v51 = vld [vmem:[#allocation3 + $0x90] sm:$0xff] }
 0x1b1   :  { %6050 = vrot.lane.b32.xlu1 %v6049_v62, %s6847_s28 }
 0x1b2   :  { %6055 = vrot.lane.b32.xlu0 %v6054_v63, %s6846_s27 }
 0x1b5   :  { %6065 = vrot.lane.b32.xlu1 %v6064_v4, %s6846_s27 }
 0x1b6   :  { %6060 = vrot.lane.b32.xlu0 %v6059_v5, %s6847_s28 }
 0x1c1   :  { %v5631_v6 = vpop.f32.mrb[4].mxu0 }
 0x1c2   :  { %v7884_v7 = vadd.f32 %v5631_v6, %v7766_v36  ;;  %v1204_v8 = vpop.f32.mrb[5].mxu0 }
 0x1c3   :  { %v7887_v9 = vadd.f32 %v7766_v36, %v1204_v8 }
 0x1c4   :  { %v1268_v10 = vmax.f32 %v7884_v7, 0.0  ;;  %v1304_v7 = vld [vmem:[#allocation3 + $0xa0] sm:$0xff] }
 0x1c5   :  { %v9724_v11 = vmax.f32 %v7887_v9, 0.0  ;;  %v9725_v18 = vmax.f32 %v7887_v9, 0.0  ;;  %v5871_v9 = vpack.c.bf16 %v2995_v54, %v2994_v50 }
 0x1c6   :  { %1285 = vst.msk [vmem:[#allocation3 + $0x61] sm:$0xff] %vm95_vm11, %v1268_v10 }
 0x1c7   :  { %1284 = vst.msk [vmem:[#allocation3 + $0x51] sm:$0xff] %vm95_vm11, %v9724_v11  ;;  %5872 = vmatprep.subr.bf16.mxu1 %v5871_v9 }
 0x1cd   :  { %v7897_v12 = vld [vmem:[#allocation3 + $0x60] sm:$0xff] }
 0x1ce   :  { %v6069_v13 = vpack.i.bf16 %v7871_v3, %v7897_v12  ;;  %v7901_v16 = vld [vmem:[#allocation3 + $0x50] sm:$0xff]  ;;  %v7915_v21 = vld [vmem:[#allocation3 + $0x62] sm:$0xff] }
 0x1cf   :  { %v6074_v2 = vpack.i.bf16 %v7864_v61, %v7901_v16  ;;  %v7905_v40 = vld [vmem:[#allocation3 + $0x51] sm:$0xff]  ;;  %v7918_v24 = vld [vmem:[#allocation3 + $0x61] sm:$0xff] }
 0x1d0   :  { %6070 = vrot.lane.b32.xlu1 %v6069_v13, %s6845_s25  ;;  %v7908_v17 = vld [vmem:[#allocation3 + $0x52] sm:$0xff]  ;;  %v6079_v19 = vpack.i.bf16 %v7853_v23, %v7905_v40  ;;  %v6094_v26 = vpack.i.bf16 %v7905_v40, %v7915_v21  ;;  %v6089_v27 = vpack.i.bf16 %v7901_v16, %v7918_v24 }
 0x1d1   :  { %6075 = vrot.lane.b32.xlu0 %v6074_v2, %s6845_s25  ;;  %v6084_v20 = vpack.i.bf16 %v7874_v47, %v7908_v17  ;;  %v1296_v2 = vld [vmem:[#allocation3] sm:$0xff] }
 0x1d4   :  { %6080 = vrot.lane.b32.xlu1 %v6079_v19, %s6847_s28 }
 0x1d5   :  { %6085 = vrot.lane.b32.xlu0 %v6084_v20, %s6846_s27 }
 0x1d8   :  { %6095 = vrot.lane.b32.xlu1 %v6094_v26, %s6846_s27 }
 0x1d9   :  { %6090 = vrot.lane.b32.xlu0 %v6089_v27, %s6847_s28 }
 0x1de   :  { %v5634_v30 = vpop.f32.mrb[6].mxu0 }
 0x1df   :  { %v7928_v33 = vadd.f32 %v5634_v30, %v7766_v36  ;;  %v1214_v34 = vpop.f32.mrb[7].mxu0 }
 0x1e0   :  { %v7931_v1 = vadd.f32 %v7766_v36, %v1214_v34 }
 0x1e1   :  { %v9723_v35 = vmax.f32 %v7928_v33, 0.0  ;;  %v9726_v22 = vmax.f32 %v7928_v33, 0.0 }
 0x1e2   :  { %v9716_v37 = vmax.f32 %v7931_v1, 0.0 }
 0x1e3   :  { %1287 = vst.msk [vmem:[#allocation3 + $0x81] sm:$0xff] %vm95_vm11, %v9723_v35 }
 0x1e4   :  { %1286 = vst.msk [vmem:[#allocation3 + $0x71] sm:$0xff] %vm95_vm11, %v9716_v37 }
 0x1ea   :  { %v1399_v38 = vld [vmem:[#allocation3 + $0x80] sm:$0xff] }
 0x1eb   :  { %v6099_v28 = vpack.i.bf16 %v7915_v21, %v1399_v38  ;;  %v7942_v39 = vld [vmem:[#allocation3 + $0x70] sm:$0xff]  ;;  %v6104_v32 = vpack.i.bf16 %v1399_v38, %v1416_v42  ;;  %v7955_v53 = vld [vmem:[#allocation3 + $0x81] sm:$0xff] }
 0x1ec   :  { %v6109_v41 = vpack.i.bf16 %v7908_v17, %v7942_v39  ;;  %v7947_v43 = vld [vmem:[#allocation3 + $0x72] sm:$0xff]  ;;  %v6124_v57 = vpack.i.bf16 %v7942_v39, %v7955_v53  ;;  %v7962_v59 = vld [vmem:[#allocation3 + $0x82] sm:$0xff] }
 0x1ed   :  { %6100 = vrot.lane.b32.xlu1 %v6099_v28, %s6845_s25  ;;  %v6119_v49 = vpack.i.bf16 %v7918_v24, %v7947_v43  ;;  %v7952_v52 = vld [vmem:[#allocation3 + $0x71] sm:$0xff]  ;;  %v6134_v63 = vpack.i.bf16 %v7947_v43, %v1400_v51 }
 0x1ee   :  { %6110 = vrot.lane.b32.xlu0 %v6109_v41, %s6845_s25  ;;  %v6114_v14 = vpack.i.bf16 %v7897_v12, %v7952_v52  ;;  %v6129_v62 = vpack.i.bf16 %v7952_v52, %v7962_v59 }
 0x1f1   :  { %6105 = vrot.lane.b32.xlu1 %v6104_v32, %s6847_s28  ;;  %v1957_v32 = vld [vmem:[%s9698_s4 + $0x110] sm:$0xff] }
 0x1f2   :  { %6120 = vrot.lane.b32.xlu0 %v6119_v49, %s6846_s27  ;;  %v1958_v49 = vld [vmem:[%s9698_s4 + $0x118] sm:$0xff] }
 0x1f5   :  { %6115 = vrot.lane.b32.xlu1 %v6114_v14, %s6847_s28 }
 0x1f6   :  { %6125 = vrot.lane.b32.xlu0 %v6124_v57, %s6847_s28 }
 0x1f9   :  { %6130 = vrot.lane.b32.xlu1 %v6129_v62, %s6846_s27 }
 0x1fa   :  { %6135 = vrot.lane.b32.xlu0 %v6134_v63, %s6845_s25 }
 0x20d   :  { %v5637_v4 = vpop.f32.mrb[8].mxu0 }
 0x20e   :  { %v7972_v5 = vadd.f32 %v5637_v4, %v7766_v36  ;;  %v1224_v6 = vpop.f32.mrb[9].mxu0  ;;  %v6021_v20 = vpop.permute.xlu1 %6020  ;;  %v1336_v4 = vld [vmem:[#allocation3 + $0xa2] sm:$0xff] }
 0x20f   :  { %v7975_v8 = vadd.f32 %v7766_v36, %v1224_v6  ;;  %v6026_v19 = vpop.permute.xlu0 %6025  ;;  %v6023_v28 = vunpack.i.h.bf16 %v6021_v20  ;;  %v6022_v41 = vunpack.i.l.bf16 %v6021_v20  ;;  %v5835_v6 = vpack.c.bf16 %v1958_v49, %v1957_v32 }
 0x210   :  { %v9715_v13 = vmax.f32 %v7972_v5, 0.0  ;;  %v6028_v27 = vunpack.i.h.bf16 %v6026_v19  ;;  %v6027_v30 = vunpack.i.l.bf16 %v6026_v19 }
 0x211   :  { %v9714_v26 = vmax.f32 %v7975_v8, 0.0 }
 0x212   :  { %1289 = vst.msk [vmem:[#allocation3 + $0xc1] sm:$0xff] %vm95_vm11, %v9715_v13  ;;  %v1825_v34 = vsel %vm95_vm11, %v1296_v2, %v6028_v27  ;;  %v1875_v38 = vsel %vm95_vm11, %v7815_v44, %v6027_v30  ;;  %v1320_v2 = vld [vmem:[#allocation3 + $0xa1] sm:$0xff] }
 0x213   :  { %1288 = vst.msk [vmem:[#allocation3 + $0xb1] sm:$0xff] %vm95_vm11, %v9714_v26  ;;  %v6031_v42 = vpop.permute.xlu0 %6030  ;;  %v1891_v51 = vsel %vm1841_vm13, %v1875_v38, %v6022_v41  ;;  %v1842_v62 = vsel %vm1841_vm13, %v1825_v34, %v6023_v28  ;;  %v6036_v28 = vpop.permute.xlu1 %6035 }
 0x214   :  { %v6033_v14 = vunpack.i.h.bf16 %v6031_v42  ;;  %v6032_v57 = vunpack.i.l.bf16 %v6031_v42  ;;  %v6037_v49 = vunpack.i.l.bf16 %v6036_v28 }
 0x216   :  { %v1907_v44 = vsel %vm1858_vm14, %v1891_v51, %v6032_v57  ;;  %v1859_v63 = vsel %vm1858_vm14, %v1842_v62, %v6033_v14  ;;  %v6038_v57 = vunpack.i.h.bf16 %v6036_v28 }
 0x217   :  { %2078 = vmatprep.mubr.f32.mxu0 %v1907_v44 }
 0x218   :  { %2079 = vmatmul.mubr.f32.vlgmr.msra.gmra.mrb[16].mxu0 %v1859_v63 }
 0x219   :  { %v7998_v19 = vld [vmem:[#allocation3 + $0xc0] sm:$0xff]  ;;  %5834 = vmatpush3.bf16.msra.mxu0 %v7851_v58 }
 0x21a   :  { %v6139_v20 = vpack.i.bf16 %v1336_v4, %v7998_v19  ;;  %v8001_v27 = vld [vmem:[#allocation3 + $0xb2] sm:$0xff]  ;;  %v8007_v38 = vld [vmem:[#allocation3 + $0xc2] sm:$0xff]  ;;  %5836 = vmatprep.subr.bf16.mxu0 %v5835_v6 }
 0x21b   :  { %v6144_v30 = vpack.i.bf16 %v1320_v2, %v8001_v27  ;;  %v8005_v34 = vld [vmem:[#allocation3 + $0xb1] sm:$0xff]  ;;  %v8012_v42 = vld [vmem:[#allocation3 + $0xc1] sm:$0xff] }
 0x21c   :  { %6140 = vrot.lane.b32.xlu1 %v6139_v20, %s6845_s25  ;;  %v8010_v41 = vld [vmem:[#allocation3 + $0xb0] sm:$0xff]  ;;  %v6154_v32 = vpack.i.bf16 %v8005_v34, %v8007_v38 }
 0x21d   :  { %6145 = vrot.lane.b32.xlu0 %v6144_v30, %s6846_s27  ;;  %5838 = vmatpush3.bf16.msra.mxu0 %v5835_v6  ;;  %v6149_v58 = vpack.i.bf16 %v8010_v41, %v8012_v42 }
 0x21f   :  { %v6041_v14 = vpop.permute.xlu1 %6040 }
 0x220   :  { %6155 = vrot.lane.b32.xlu1 %v6154_v32, %s6846_s27  ;;  %v6046_v51 = vpop.permute.xlu0 %6045  ;;  %v1876_v32 = vsel %vm95_vm11, %v7822_v48, %v6037_v49 }
 0x221   :  { %v5640_v62 = vpop.f32.mrb[10].mxu0  ;;  %6150 = vrot.lane.b32.xlu0 %v6149_v58, %s6847_s28  ;;  %v6048_v44 = vunpack.i.h.bf16 %v6046_v51  ;;  %v6047_v63 = vunpack.i.l.bf16 %v6046_v51  ;;  %v1826_v51 = vsel %vm95_vm11, %v7820_v46, %v6038_v57 }
 0x222   :  { %v8022_v4 = vadd.f32 %v5640_v62, %v7766_v36  ;;  %v1234_v2 = vpop.f32.mrb[11].mxu0 }
 0x223   :  { %v8025_v6 = vadd.f32 %v7766_v36, %v1234_v2  ;;  %v6051_v30 = vpop.permute.xlu1 %6050  ;;  %v1892_v13 = vsel %vm1841_vm13, %v1876_v32, %v6047_v63  ;;  %v1843_v37 = vsel %vm1841_vm13, %v1826_v51, %v6048_v44 }
 0x224   :  { %v9717_v20 = vmax.f32 %v8022_v4, 0.0  ;;  %v6053_v0 = vunpack.i.h.bf16 %v6051_v30  ;;  %v6052_v26 = vunpack.i.l.bf16 %v6051_v30  ;;  %v6056_v58 = vpop.permute.xlu0 %6055  ;;  %v6043_v30 = vunpack.i.h.bf16 %v6041_v14 }
 0x225   :  { %v9722_v28 = vmax.f32 %v8025_v6, 0.0  ;;  %v6058_v62 = vunpack.i.h.bf16 %v6056_v58  ;;  %v6057_v2 = vunpack.i.l.bf16 %v6056_v58  ;;  %v6042_v58 = vunpack.i.l.bf16 %v6041_v14 }
 0x226   :  { %1291 = vst.msk [vmem:[#allocation3 + $0xe1] sm:$0xff] %vm95_vm11, %v9717_v20  ;;  %v1908_v48 = vsel %vm1858_vm14, %v1892_v13, %v6052_v26  ;;  %v1860_v49 = vsel %vm1858_vm14, %v1843_v37, %v6053_v0 }
 0x227   :  { %1290 = vst.msk [vmem:[#allocation3 + $0xd1] sm:$0xff] %vm95_vm11, %v9722_v28  ;;  %2083 = vmatprep.mubr.f32.mxu0 %v1908_v48  ;;  %v1877_v46 = vsel %vm95_vm11, %v7861_v60, %v6057_v2  ;;  %v1827_v57 = vsel %vm95_vm11, %v7812_v31, %v6058_v62  ;;  %v6066_v48 = vpop.permute.xlu1 %6065 }
 0x228   :  { %v6061_v63 = vpop.permute.xlu0 %6060  ;;  %2084 = vmatmul.mubr.f32.gmra.mrb[18].mxu0 %v1860_v49  ;;  %v1893_v51 = vsel %vm1841_vm13, %v1877_v46, %v6042_v58  ;;  %v1844_v20 = vsel %vm1841_vm13, %v1827_v57, %v6043_v30  ;;  %v6067_v30 = vunpack.i.l.bf16 %v6066_v48 }
 0x229   :  { %v6063_v44 = vunpack.i.h.bf16 %v6061_v63  ;;  %v6062_v32 = vunpack.i.l.bf16 %v6061_v63 }
 0x22b   :  { %v1909_v13 = vsel %vm1858_vm14, %v1893_v51, %v6062_v32  ;;  %v1861_v0 = vsel %vm1858_vm14, %v1844_v20, %v6063_v44 }
 0x22c   :  { %2088 = vmatprep.mubr.f32.mxu0 %v1909_v13 }
 0x22d   :  { %v8051_v37 = vld [vmem:[#allocation3 + $0xe0] sm:$0xff]  ;;  %2089 = vmatmul.mubr.f32.gmra.mrb[20].mxu0 %v1861_v0 }
 0x22e   :  { %v6159_v31 = vpack.i.bf16 %v8007_v38, %v8051_v37  ;;  %v8055_v60 = vld [vmem:[#allocation3 + $0xd0] sm:$0xff]  ;;  %5655 = vmatprep.mubr.msk.f32.mxu0 %vm95_vm11, %v7817_v45  ;;  %v8078_v2 = vld [vmem:[#allocation3 + $0xe1] sm:$0xff] }
 0x22f   :  { %v6164_v26 = vpack.i.bf16 %v8001_v27, %v8055_v60  ;;  %v8061_v14 = vld [vmem:[#allocation3 + $0xd1] sm:$0xff]  ;;  %v8075_v27 = vld [vmem:[#allocation3 + $0xe2] sm:$0xff] }
 0x230   :  { %6160 = vrot.lane.b32.xlu1 %v6159_v31, %s6845_s25  ;;  %v8064_v20 = vld [vmem:[#allocation3 + $0xd2] sm:$0xff]  ;;  %v6169_v62 = vpack.i.bf16 %v7998_v19, %v8061_v14 }
 0x231   :  { %6165 = vrot.lane.b32.xlu0 %v6164_v26, %s6845_s25  ;;  %5656 = vmatmul.mubr.msk.f32.vlgmr.msra.gmra.mrb[22].mxu0 %vm95_vm11, %v7864_v61  ;;  %v6174_v45 = vpack.i.bf16 %v8012_v42, %v8064_v20  ;;  %v6184_v61 = vpack.i.bf16 %v8061_v14, %v8075_v27  ;;  %v1878_v26 = vsel %vm95_vm11, %v7874_v47, %v6067_v30 }
 0x232   :  { %5658 = vmatprep.mubr.msk.f32.mxu0 %vm95_vm11, %v7871_v3  ;;  %v6179_v3 = vpack.i.bf16 %v8055_v60, %v8078_v2 }
 0x234   :  { %6170 = vrot.lane.b32.xlu1 %v6169_v62, %s6847_s28 }
 0x235   :  { %6175 = vrot.lane.b32.xlu0 %v6174_v45, %s6846_s27  ;;  %5659 = vmatmul.mubr.msk.f32.gmra.mrb[24].mxu0 %vm95_vm11, %v7908_v17  ;;  %v1432_v17 = vld [vmem:[#allocation3 + $0x92] sm:$0xff] }
 0x236   :  { %5661 = vmatprep.mubr.msk.f32.mxu0 %vm95_vm11, %v7915_v21 }
 0x238   :  { %6185 = vrot.lane.b32.xlu1 %v6184_v61, %s6846_s27 }
 0x239   :  { %6180 = vrot.lane.b32.xlu0 %v6179_v3, %s6847_s28  ;;  %5662 = vmatmul.mubr.msk.f32.gmra.mrb[26].mxu0 %vm95_vm11, %v7947_v43 }
 0x23a   :  { %5664 = vmatprep.mubr.msk.f32.mxu0 %vm95_vm11, %v7962_v59  ;;  %v6068_v59 = vunpack.i.h.bf16 %v6066_v48 }
 0x23c   :  { %v1828_v62 = vsel %vm95_vm11, %v7858_v25, %v6068_v59 }
 0x23d   :  { %5665 = vmatmul.mubr.msk.f32.gmra.mrb[28].mxu0 %vm95_vm11, %v1432_v17 }
 0x23e   :  { %5667 = vmatprep.mubr.msk.f32.mxu0 %vm95_vm11, %v8007_v38 }
 0x241   :  { %v5643_v21 = vpop.f32.mrb[12].mxu0  ;;  %5668 = vmatmul.mubr.msk.f32.gmra.mrb[30].mxu0 %vm95_vm11, %v8064_v20 }
 0x242   :  { %v8099_v49 = vadd.f32 %v5643_v21, %v7766_v36  ;;  %v1244_v46 = vpop.f32.mrb[13].mxu0  ;;  %v6071_v57 = vpop.permute.xlu1 %6070  ;;  %5670 = vmatprep.mubr.msk.f32.mxu0 %vm95_vm11, %v8075_v27 }
 0x243   :  { %v8104_v43 = vadd.f32 %v7766_v36, %v1244_v46  ;;  %v6076_v38 = vpop.permute.xlu0 %6075  ;;  %v6073_v30 = vunpack.i.h.bf16 %v6071_v57 }
 0x244   :  { %v9719_v58 = vmax.f32 %v8099_v49, 0.0  ;;  %v6078_v44 = vunpack.i.h.bf16 %v6076_v38  ;;  %v6077_v32 = vunpack.i.l.bf16 %v6076_v38  ;;  %v6072_v38 = vunpack.i.l.bf16 %v6071_v57 }
 0x245   :  { %v9721_v63 = vmax.f32 %v8104_v43, 0.0 }
 0x246   :  { %1293 = vst.msk [vmem:[#allocation3 + $0x101] sm:$0xff] %vm95_vm11, %v9719_v58  ;;  %v6081_v51 = vpop.permute.xlu1 %6080  ;;  %v1894_v3 = vsel %vm1841_vm13, %v1878_v26, %v6077_v32  ;;  %v1845_v17 = vsel %vm1841_vm13, %v1828_v62, %v6078_v44 }
 0x247   :  { %1292 = vst.msk [vmem:[#allocation3 + $0xf1] sm:$0xff] %vm95_vm11, %v9721_v63  ;;  %v6083_v13 = vunpack.i.h.bf16 %v6081_v51  ;;  %v6082_v0 = vunpack.i.l.bf16 %v6081_v51  ;;  %v6086_v31 = vpop.permute.xlu0 %6085 }
 0x248   :  { %v6088_v45 = vunpack.i.h.bf16 %v6086_v31  ;;  %v6087_v61 = vunpack.i.l.bf16 %v6086_v31 }
 0x249   :  { %v1910_v48 = vsel %vm1858_vm14, %v1894_v3, %v6082_v0  ;;  %v1862_v21 = vsel %vm1858_vm14, %v1845_v17, %v6083_v13 }
 0x24a   :  { %2093 = vmatprep.mubr.f32.mxu1 %v1910_v48  ;;  %v1879_v46 = vsel %vm95_vm11, %v7905_v40, %v6087_v61  ;;  %v1829_v47 = vsel %vm95_vm11, %v7853_v23, %v6088_v45  ;;  %v6096_v48 = vpop.permute.xlu1 %6095 }
 0x24b   :  { %v6091_v25 = vpop.permute.xlu0 %6090  ;;  %2094 = vmatmul.mubr.f32.vlgmr.msra.gmra.mrb[0].mxu1 %v1862_v21  ;;  %v1895_v44 = vsel %vm1841_vm13, %v1879_v46, %v6072_v38  ;;  %v1846_v40 = vsel %vm1841_vm13, %v1829_v47, %v6073_v30 }
 0x24c   :  { %v6093_v59 = vunpack.i.h.bf16 %v6091_v25  ;;  %v6092_v51 = vunpack.i.l.bf16 %v6091_v25  ;;  %5874 = vmatpush3.bf16.msra.mxu1 %v5871_v9 }
 0x24d   :  { %v8128_v32 = vld [vmem:[#allocation3 + $0x100] sm:$0xff] }
 0x24e   :  { %v8131_v0 = vld [vmem:[#allocation3 + $0xf2] sm:$0xff]  ;;  %v6189_v13 = vpack.i.bf16 %v8075_v27, %v8128_v32  ;;  %v1911_v23 = vsel %vm1858_vm14, %v1895_v44, %v6092_v51  ;;  %v1863_v57 = vsel %vm1858_vm14, %v1846_v40, %v6093_v59  ;;  %v8147_v27 = vld [vmem:[#allocation3 + $0x102] sm:$0xff]  ;;  %v6097_v44 = vunpack.i.l.bf16 %v6096_v48 }
 0x24f   :  { %v8136_v31 = vld [vmem:[#allocation3 + $0xf0] sm:$0xff]  ;;  %5671 = vmatmul.mubr.msk.f32.gmra.mrb[32].mxu0 %vm95_vm11, %v8131_v0  ;;  %2098 = vmatprep.mubr.f32.mxu1 %v1911_v23  ;;  %v8157_v61 = vld [vmem:[#allocation3 + $0x101] sm:$0xff]  ;;  %v6098_v40 = vunpack.i.h.bf16 %v6096_v48 }
 0x250   :  { %v6194_v26 = vpack.i.bf16 %v8064_v20, %v8136_v31  ;;  %v8144_v62 = vld [vmem:[#allocation3 + $0xf1] sm:$0xff]  ;;  %6190 = vrot.lane.b32.xlu1 %v6189_v13, %s6845_s25  ;;  %2099 = vmatmul.mubr.f32.gmra.mrb[2].mxu1 %v1863_v57  ;;  %v6204_v20 = vpack.i.bf16 %v8078_v2, %v8131_v0  ;;  %v6209_v17 = vpack.i.bf16 %v8136_v31, %v8157_v61 }
 0x251   :  { %5673 = vmatprep.mubr.msk.f32.mxu0 %vm95_vm11, %v8147_v27  ;;  %v6199_v45 = vpack.i.bf16 %v8051_v37, %v8144_v62  ;;  %v6214_v3 = vpack.i.bf16 %v8144_v62, %v8147_v27 }
 0x252   :  { %6195 = vrot.lane.b32.xlu0 %v6194_v26, %s6845_s25 }
 0x254   :  { %6200 = vrot.lane.b32.xlu1 %v6199_v45, %s6847_s28 }
 0x256   :  { %6205 = vrot.lane.b32.xlu0 %v6204_v20, %s6846_s27 }
 0x258   :  { %6215 = vrot.lane.b32.xlu1 %v6214_v3, %s6846_s27  ;;  %v1880_v3 = vsel %vm95_vm11, %v7918_v24, %v6097_v44 }
 0x25a   :  { %6210 = vrot.lane.b32.xlu0 %v6209_v17, %s6847_s28 }
 0x25e   :  { %v5646_v21 = vpop.f32.mrb[14].mxu0 }
 0x25f   :  { %v8167_v46 = vadd.f32 %v5646_v21, %v7766_v36  ;;  %v1254_v47 = vpop.f32.mrb[15].mxu0  ;;  %v6101_v38 = vpop.permute.xlu1 %6100 }
 0x260   :  { %v8170_v30 = vadd.f32 %v7766_v36, %v1254_v47  ;;  %v6111_v59 = vpop.permute.xlu0 %6110  ;;  %v6102_v21 = vunpack.i.l.bf16 %v6101_v38 }
 0x261   :  { %v9718_v25 = vmax.f32 %v8167_v46, 0.0  ;;  %v6113_v23 = vunpack.i.h.bf16 %v6111_v59  ;;  %v6112_v57 = vunpack.i.l.bf16 %v6111_v59 }
 0x262   :  { %v9720_v51 = vmax.f32 %v8170_v30, 0.0 }
 0x263   :  { %1295 = vst.msk [vmem:[#allocation3 + $0x121] sm:$0xff] %vm95_vm11, %v9718_v25  ;;  %v8180_v13 = vpop.permute.xlu1 %6105  ;;  %v1896_v63 = vsel %vm1841_vm13, %v1880_v3, %v6112_v57 }
 0x264   :  { %1294 = vst.msk [vmem:[#allocation3 + $0x111] sm:$0xff] %vm95_vm11, %v9720_v51  ;;  %v6121_v36 = vpop.permute.xlu0 %6120  ;;  %v1830_v51 = vsel %vm95_vm11, %v7901_v16, %v6098_v40 }
 0x265   :  { %v6122_v26 = vunpack.i.l.bf16 %v6121_v36  ;;  %v6123_v45 = vunpack.i.h.bf16 %v6121_v36  ;;  %v1847_v59 = vsel %vm1841_vm13, %v1830_v51, %v6113_v23 }
 0x267   :  { %v6116_v20 = vpop.permute.xlu1 %6115  ;;  %v1881_v17 = vsel %vm95_vm11, %v7952_v52, %v6122_v26 }
 0x268   :  { %v6118_v47 = vunpack.i.h.bf16 %v6116_v20  ;;  %v6117_v25 = vunpack.i.l.bf16 %v6116_v20  ;;  %v6126_v58 = vpop.permute.xlu0 %6125  ;;  %v1897_v26 = vsel %vm1841_vm13, %v1881_v17, %v6102_v21 }
 0x269   :  { %v6127_v48 = vunpack.i.l.bf16 %v6126_v58  ;;  %v6128_v35 = vunpack.i.h.bf16 %v6126_v58  ;;  %v6107_v58 = vunpack.i.l.bf16 %v8180_v13 }
 0x26a   :  { %v1407_v36 = vld [vmem:[#allocation3 + $0x120] sm:$0xff]  ;;  %v1912_v28 = vsel %vm1858_vm14, %v1896_v63, %v6117_v25  ;;  %v1864_v24 = vsel %vm1858_vm14, %v1847_v59, %v6118_v47  ;;  %v1831_v63 = vsel %vm95_vm11, %v7897_v12, %v6123_v45 }
 0x26b   :  { %v1438_v44 = vld [vmem:[#allocation3 + $0x112] sm:$0xff]  ;;  %v6219_v52 = vpack.i.bf16 %v8147_v27, %v1407_v36  ;;  %v6131_v11 = vpop.permute.xlu1 %6130  ;;  %2103 = vmatprep.mubr.f32.mxu1 %v1912_v28  ;;  %v1913_v16 = vsel %vm1858_vm14, %v1897_v26, %v6127_v48  ;;  %v6103_v27 = vunpack.i.h.bf16 %v6101_v38  ;;  %v1439_v28 = vld [vmem:[#allocation3 + $0x122] sm:$0xff] }
 0x26c   :  { %v8194_v20 = vld [vmem:[#allocation3 + $0x110] sm:$0xff]  ;;  %5674 = vmatmul.mubr.msk.f32.gmra.mrb[34].mxu0 %vm95_vm11, %v1438_v44  ;;  %v6133_v40 = vunpack.i.h.bf16 %v6131_v11  ;;  %v6132_v23 = vunpack.i.l.bf16 %v6131_v11  ;;  %v6136_v57 = vpop.permute.xlu0 %6135  ;;  %2104 = vmatmul.mubr.f32.gmra.mrb[4].mxu1 %v1864_v24  ;;  %v6234_v48 = vpack.i.bf16 %v8157_v61, %v1438_v44  ;;  %v6108_v24 = vunpack.i.h.bf16 %v8180_v13 }
 0x26d   :  { %v6224_v51 = vpack.i.bf16 %v8131_v0, %v8194_v20  ;;  %v8202_v25 = vld [vmem:[#allocation3 + $0x111] sm:$0xff]  ;;  %6220 = vrot.lane.b32.xlu1 %v6219_v52, %s6845_s25  ;;  %v6138_v3 = vunpack.i.h.bf16 %v6136_v57  ;;  %v6137_v17 = vunpack.i.l.bf16 %v6136_v57  ;;  %2108 = vmatprep.mubr.f32.mxu1 %v1913_v16  ;;  %v1848_v12 = vsel %vm1841_vm13, %v1831_v63, %v6103_v27 }
 0x26e   :  { %5676 = vmatprep.mubr.msk.f32.mxu0 %vm95_vm11, %v1439_v28  ;;  %v6229_v0 = vpack.i.bf16 %v8128_v32, %v8202_v25  ;;  %v1882_v11 = vsel %vm95_vm11, %v7955_v53, %v6132_v23  ;;  %v1832_v38 = vsel %vm95_vm11, %v7942_v39, %v6133_v40  ;;  %v1865_v45 = vsel %vm1858_vm14, %v1848_v12, %v6128_v35  ;;  %v8222_v53 = vld [vmem:[#allocation3 + $0x121] sm:$0xff]  ;;  %v1440_v52 = vld [vmem:[#allocation3 + $0x132] sm:$0xff] }
 0x26f   :  { %6225 = vrot.lane.b32.xlu0 %v6224_v51, %s6845_s25  ;;  %v1898_v21 = vsel %vm1841_vm13, %v1882_v11, %v6137_v17  ;;  %v1849_v59 = vsel %vm1841_vm13, %v1832_v38, %v6138_v3  ;;  %v6244_v35 = vpack.i.bf16 %v8202_v25, %v1439_v28  ;;  %v1424_v26 = vld [vmem:[#allocation3 + $0x131] sm:$0xff]  ;;  %v6239_v16 = vpack.i.bf16 %v8194_v20, %v8222_v53 }
 0x270   :  { %2109 = vmatmul.mubr.f32.gmra.mrb[6].mxu1 %v1865_v45  ;;  %v1914_v47 = vsel %vm1858_vm14, %v1898_v21, %v6107_v58  ;;  %5677 = vmatmul.mubr.msk.f32.gmra.mrb[36].mxu0 %vm95_vm11, %v1440_v52  ;;  %v1866_v39 = vsel %vm1858_vm14, %v1849_v59, %v6108_v24  ;;  %v1408_v13 = vld [vmem:[#allocation3 + $0x130] sm:$0xff]  ;;  %v6254_v51 = vpack.i.bf16 %v1407_v36, %v1424_v26  ;;  %v9730_v23 = vmax.f32 %v8025_v6, 0.0 }
 0x271   :  { %6230 = vrot.lane.b32.xlu1 %v6229_v0, %s6847_s28  ;;  %2113 = vmatprep.mubr.f32.mxu1 %v1914_v47  ;;  %v6249_v63 = vpack.i.bf16 %v1438_v44, %v1408_v13  ;;  %v2996_v44 = vld [vmem:[%s9700_s6 + $0x110] sm:$0xff]  ;;  %v9731_v11 = vmax.f32 %v8022_v4, 0.0  ;;  %v9732_v6 = vmax.f32 %v8104_v43, 0.0  ;;  %v9733_v45 = vmax.f32 %v8099_v49, 0.0 }
 0x272   :  { %v9734_v59 = vmax.f32 %v8170_v30, 0.0  ;;  %v9735_v43 = vmax.f32 %v8167_v46, 0.0 }
 0x273   :  { %6235 = vrot.lane.b32.xlu0 %v6234_v48, %s6846_s27 }
 0x274   :  { %2114 = vmatmul.mubr.f32.gmra.mrb[8].mxu1 %v1866_v39 }
 0x275   :  { %6245 = vrot.lane.b32.xlu1 %v6244_v35, %s6846_s27 }
 0x277   :  { %6240 = vrot.lane.b32.xlu0 %v6239_v16, %s6847_s28 }
 0x279   :  { %6255 = vrot.lane.b32.xlu1 %v6254_v51, %s6847_s28 }
 0x27b   :  { %6250 = vrot.lane.b32.xlu0 %v6249_v63, %s6845_s25 }
 0x27d   :  { %3400 = vrot.lane.b32.xlu1 %v1264_v29, %s6847_s28  ;;  %v9727_v29 = vmax.f32 %v7931_v1, 0.0 }
 0x27f   :  { %3398 = vrot.lane.b32.xlu0 %v1263_v15, %s6847_s28  ;;  %v9728_v15 = vmax.f32 %v7972_v5, 0.0 }
 0x281   :  { %3404 = vrot.lane.b32.xlu1 %v1266_v55, %s6847_s28  ;;  %v9729_v55 = vmax.f32 %v7975_v8, 0.0  ;;  %v2997_v8 = vld [vmem:[%s9700_s6 + $0x118] sm:$0xff] }
 0x282   :  { %v5875_v58 = vpack.c.bf16 %v2997_v8, %v2996_v44 }
 0x283   :  { %3402 = vrot.lane.b32.xlu0 %v1265_v56, %s6847_s28 }
 0x284   :  { %5876 = vmatprep.subr.bf16.mxu1 %v5875_v58 }
 0x285   :  { %3408 = vrot.lane.b32.xlu1 %v1268_v10, %s6847_s28  ;;  %5878 = vmatpush3.bf16.msra.mxu1 %v5875_v58 }
 0x287   :  { %3406 = vrot.lane.b32.xlu0 %v9725_v18, %s6847_s28 }
 0x289   :  { %3412 = vrot.lane.b32.xlu1 %v9726_v22, %s6847_s28 }
 0x28b   :  { %3410 = vrot.lane.b32.xlu0 %v9727_v29, %s6847_s28 }
 0x28d   :  { %3416 = vrot.lane.b32.xlu1 %v9728_v15, %s6847_s28 }
 0x28e   :  { %v6141_v10 = vpop.permute.xlu1 %6140 }
 0x28f   :  { %3414 = vrot.lane.b32.xlu0 %v9729_v55, %s6847_s28  ;;  %v6146_v56 = vpop.permute.xlu0 %6145  ;;  %v6143_v27 = vunpack.i.h.bf16 %v6141_v10  ;;  %v6142_v40 = vunpack.i.l.bf16 %v6141_v10 }
 0x290   :  { %v6148_v33 = vunpack.i.h.bf16 %v6146_v56  ;;  %v6147_v1 = vunpack.i.l.bf16 %v6146_v56 }
 0x292   :  { %v1883_v5 = vsel %vm95_vm11, %v8005_v34, %v6147_v1  ;;  %v1833_v36 = vsel %vm95_vm11, %v1304_v7, %v6148_v33  ;;  %v6156_v38 = vpop.permute.xlu1 %6155 }
 0x293   :  { %3418 = vrot.lane.b32.xlu0 %v9730_v23, %s6847_s28  ;;  %v6151_v57 = vpop.permute.xlu0 %6150  ;;  %v1899_v3 = vsel %vm1841_vm13, %v1883_v5, %v6142_v40  ;;  %v1850_v17 = vsel %vm1841_vm13, %v1833_v36, %v6143_v27  ;;  %v6158_v47 = vunpack.i.h.bf16 %v6156_v38  ;;  %v6157_v48 = vunpack.i.l.bf16 %v6156_v38 }
 0x294   :  { %v6153_v28 = vunpack.i.h.bf16 %v6151_v57  ;;  %v6152_v34 = vunpack.i.l.bf16 %v6151_v57 }
 0x295   :  { %v1884_v49 = vsel %vm95_vm11, %v8012_v42, %v6157_v48  ;;  %v1834_v13 = vsel %vm95_vm11, %v8010_v41, %v6158_v47 }
 0x296   :  { %v1915_v12 = vsel %vm1858_vm14, %v1899_v3, %v6152_v34  ;;  %v1867_v0 = vsel %vm1858_vm14, %v1850_v17, %v6153_v28 }
 0x297   :  { %3420 = vrot.lane.b32.xlu0 %v9731_v11, %s6847_s28  ;;  %2118 = vmatprep.mubr.f32.mxu1 %v1915_v12 }
 0x298   :  { %2119 = vmatmul.mubr.f32.gmra.mrb[10].mxu1 %v1867_v0 }
 0x29b   :  { %3422 = vrot.lane.b32.xlu0 %v9732_v6, %s6847_s28 }
 0x29f   :  { %3424 = vrot.lane.b32.xlu0 %v9733_v45, %s6847_s28 }
 0x2a2   :  { %v6161_v21 = vpop.permute.xlu1 %6160 }
 0x2a3   :  { %3426 = vrot.lane.b32.xlu0 %v9734_v59, %s6847_s28  ;;  %v6166_v4 = vpop.permute.xlu0 %6165  ;;  %v6163_v15 = vunpack.i.h.bf16 %v6161_v21  ;;  %v6162_v50 = vunpack.i.l.bf16 %v6161_v21 }
 0x2a4   :  { %v6168_v24 = vunpack.i.h.bf16 %v6166_v4  ;;  %v6167_v52 = vunpack.i.l.bf16 %v6166_v4 }
 0x2a6   :  { %v6171_v35 = vpop.permute.xlu1 %6170  ;;  %v1900_v63 = vsel %vm1841_vm13, %v1884_v49, %v6167_v52  ;;  %v1851_v18 = vsel %vm1841_vm13, %v1834_v13, %v6168_v24 }
 0x2a7   :  { %3428 = vrot.lane.b32.xlu0 %v9735_v43, %s6847_s28  ;;  %v6173_v39 = vunpack.i.h.bf16 %v6171_v35  ;;  %v6172_v26 = vunpack.i.l.bf16 %v6171_v35  ;;  %v6176_v16 = vpop.permute.xlu0 %6175 }
 0x2a8   :  { %v6178_v51 = vunpack.i.h.bf16 %v6176_v16  ;;  %v6177_v30 = vunpack.i.l.bf16 %v6176_v16 }
 0x2a9   :  { %v1916_v22 = vsel %vm1858_vm14, %v1900_v63, %v6172_v26  ;;  %v1868_v46 = vsel %vm1858_vm14, %v1851_v18, %v6173_v39 }
 0x2aa   :  { %2123 = vmatprep.mubr.f32.mxu1 %v1916_v22  ;;  %v1885_v29 = vsel %vm95_vm11, %v8061_v14, %v6177_v30  ;;  %v1835_v42 = vsel %vm95_vm11, %v7998_v19, %v6178_v51  ;;  %v6186_v14 = vpop.permute.xlu1 %6185 }
 0x2ab   :  { %v6181_v41 = vpop.permute.xlu0 %6180  ;;  %2124 = vmatmul.mubr.f32.gmra.mrb[12].mxu1 %v1868_v46  ;;  %v1901_v56 = vsel %vm1841_vm13, %v1885_v29, %v6162_v50  ;;  %v1852_v7 = vsel %vm1841_vm13, %v1835_v42, %v6163_v15  ;;  %v6188_v1 = vunpack.i.h.bf16 %v6186_v14  ;;  %v6187_v19 = vunpack.i.l.bf16 %v6186_v14 }
 0x2ac   :  { %v6183_v54 = vunpack.i.h.bf16 %v6181_v41  ;;  %v6182_v55 = vunpack.i.l.bf16 %v6181_v41 }
 0x2ad   :  { %v1886_v23 = vsel %vm95_vm11, %v8078_v2, %v6187_v19  ;;  %v1836_v57 = vsel %vm95_vm11, %v8055_v60, %v6188_v1 }
 0x2ae   :  { %v1917_v9 = vsel %vm1858_vm14, %v1901_v56, %v6182_v55  ;;  %v1869_v10 = vsel %vm1858_vm14, %v1852_v7, %v6183_v54 }
 0x2af   :  { %2128 = vmatprep.mubr.f32.mxu1 %v1917_v9 }
 0x2b0   :  { %2129 = vmatmul.mubr.f32.gmra.mrb[14].mxu1 %v1869_v10 }
 0x2c2   :  { %v6191_v33 = vpop.permute.xlu1 %6190 }
 0x2c3   :  { %v6193_v60 = vunpack.i.h.bf16 %v6191_v33  ;;  %v6192_v6 = vunpack.i.l.bf16 %v6191_v33 }
 0x2c4   :  { %v6196_v5 = vpop.permute.xlu0 %6195 }
 0x2c5   :  { %v6198_v36 = vunpack.i.h.bf16 %v6196_v5  ;;  %v6197_v44 = vunpack.i.l.bf16 %v6196_v5 }
 0x2c6   :  { %v6201_v8 = vpop.permute.xlu1 %6200 }
 0x2c7   :  { %v6203_v27 = vunpack.i.h.bf16 %v6201_v8  ;;  %v6202_v40 = vunpack.i.l.bf16 %v6201_v8  ;;  %v1902_v34 = vsel %vm1841_vm13, %v1886_v23, %v6197_v44  ;;  %v1853_v58 = vsel %vm1841_vm13, %v1836_v57, %v6198_v36 }
 0x2c8   :  { %v6206_v28 = vpop.permute.xlu0 %6205 }
 0x2c9   :  { %v6208_v3 = vunpack.i.h.bf16 %v6206_v28  ;;  %v6207_v17 = vunpack.i.l.bf16 %v6206_v28  ;;  %v1918_v12 = vsel %vm1858_vm14, %v1902_v34, %v6202_v40  ;;  %v1870_v0 = vsel %vm1858_vm14, %v1853_v58, %v6203_v27 }
 0x2ca   :  { %2133 = vmatprep.mubr.f32.mxu1 %v1918_v12  ;;  %v6216_v24 = vpop.permute.xlu1 %6215 }
 0x2cb   :  { %2134 = vmatmul.mubr.f32.gmra.mrb[16].mxu1 %v1870_v0  ;;  %v1887_v11 = vsel %vm95_vm11, %v8144_v62, %v6207_v17  ;;  %v1837_v2 = vsel %vm95_vm11, %v8051_v37, %v6208_v3  ;;  %v6218_v52 = vunpack.i.h.bf16 %v6216_v24  ;;  %v6217_v35 = vunpack.i.l.bf16 %v6216_v24 }
 0x2cc   :  { %v6211_v38 = vpop.permute.xlu0 %6210  ;;  %v1903_v47 = vsel %vm1841_vm13, %v1887_v11, %v6192_v6  ;;  %v1854_v48 = vsel %vm1841_vm13, %v1837_v2, %v6193_v60  ;;  %v2978_v11 = vld [vmem:[%s9700_s6 + $0x80] sm:$0xff]  ;;  %v2979_v2 = vld [vmem:[%s9700_s6 + $0x88] sm:$0xff] }
 0x2cd   :  { %v6213_v45 = vunpack.i.h.bf16 %v6211_v38  ;;  %v6212_v21 = vunpack.i.l.bf16 %v6211_v38  ;;  %v1888_v13 = vsel %vm95_vm11, %v8157_v61, %v6217_v35  ;;  %v1838_v51 = vsel %vm95_vm11, %v8136_v31, %v6218_v52  ;;  %v2962_v60 = vld [vmem:[%s9700_s6] sm:$0xff]  ;;  %v2963_v38 = vld [vmem:[%s9700_s6 + $0x8] sm:$0xff] }
 0x2ce   :  { %v5839_v6 = vpack.c.bf16 %v2979_v2, %v2978_v11  ;;  %v2986_v2 = vld [vmem:[%s9700_s6 + $0xc0] sm:$0xff] }
 0x2cf   :  { %v1919_v59 = vsel %vm1858_vm14, %v1903_v47, %v6212_v21  ;;  %v1871_v4 = vsel %vm1858_vm14, %v1854_v48, %v6213_v45  ;;  %v2361_v47 = vld [vmem:[#allocation4 + $0xa1] sm:$0xff]  ;;  %v5841_v48 = vpack.c.bf16 %v2963_v38, %v2962_v60 }
 0x2d0   :  { %2138 = vmatprep.mubr.f32.mxu1 %v1919_v59  ;;  %5840 = vmatprep.subr.bf16.mxu0 %v5839_v6  ;;  %v2987_v6 = vld [vmem:[%s9700_s6 + $0xc8] sm:$0xff]  ;;  %v2970_v38 = vld [vmem:[%s9700_s6 + $0x40] sm:$0xff] }
 0x2d1   :  { %2139 = vmatmul.mubr.f32.gmra.mrb[18].mxu1 %v1871_v4  ;;  %5842 = vmatpush3.bf16.msra.mxu0 %v5841_v48  ;;  %v5855_v48 = vpack.c.bf16 %v2987_v6, %v2986_v2 }
 0x2df   :  { %v6221_v62 = vpop.permute.xlu1 %6220 }
 0x2e0   :  { %v6223_v50 = vunpack.i.h.bf16 %v6221_v62  ;;  %v6222_v41 = vunpack.i.l.bf16 %v6221_v62  ;;  %v2457_v62 = vld [vmem:[#allocation4 + $0x91] sm:$0xff] }
 0x2e1   :  { %v6226_v37 = vpop.permute.xlu0 %6225 }
 0x2e2   :  { %v6228_v43 = vunpack.i.h.bf16 %v6226_v37  ;;  %v6227_v39 = vunpack.i.l.bf16 %v6226_v37 }
 0x2e3   :  { %v6231_v26 = vpop.permute.xlu1 %6230 }
 0x2e4   :  { %v6233_v16 = vunpack.i.h.bf16 %v6231_v26  ;;  %v6232_v49 = vunpack.i.l.bf16 %v6231_v26  ;;  %v1904_v63 = vsel %vm1841_vm13, %v1888_v13, %v6227_v39  ;;  %v1855_v18 = vsel %vm1841_vm13, %v1838_v51, %v6228_v43  ;;  %v2377_v43 = vld [vmem:[#allocation4 + $0xa2] sm:$0xff]  ;;  %v2980_v51 = vld [vmem:[%s9700_s6 + $0x90] sm:$0xff] }
 0x2e5   :  { %v6236_v30 = vpop.permute.xlu0 %6235 }
 0x2e6   :  { %v6238_v22 = vunpack.i.h.bf16 %v6236_v30  ;;  %v6237_v46 = vunpack.i.l.bf16 %v6236_v30  ;;  %v1920_v29 = vsel %vm1858_vm14, %v1904_v63, %v6232_v49  ;;  %v1872_v42 = vsel %vm1858_vm14, %v1855_v18, %v6233_v16  ;;  %v2981_v30 = vld [vmem:[%s9700_s6 + $0x98] sm:$0xff] }
 0x2e7   :  { %v6246_v15 = vpop.permute.xlu1 %6245  ;;  %2143 = vmatprep.mubr.f32.mxu1 %v1920_v29  ;;  %v2965_v29 = vld [vmem:[%s9700_s6 + $0x18] sm:$0xff] }
 0x2e8   :  { %2144 = vmatmul.mubr.f32.gmra.mrb[20].mxu1 %v1872_v42  ;;  %v1889_v61 = vsel %vm95_vm11, %v8202_v25, %v6237_v46  ;;  %v1839_v31 = vsel %vm95_vm11, %v8128_v32, %v6238_v22  ;;  %v6248_v7 = vunpack.i.h.bf16 %v6246_v15  ;;  %v6247_v9 = vunpack.i.l.bf16 %v6246_v15  ;;  %v2964_v46 = vld [vmem:[%s9700_s6 + $0x10] sm:$0xff] }
 0x2e9   :  { %v6241_v54 = vpop.permute.xlu0 %6240  ;;  %v1905_v14 = vsel %vm1841_vm13, %v1889_v61, %v6222_v41  ;;  %v1856_v33 = vsel %vm1841_vm13, %v1839_v31, %v6223_v50  ;;  %v5843_v22 = vpack.c.bf16 %v2981_v30, %v2980_v51  ;;  %v5845_v15 = vpack.c.bf16 %v2965_v29, %v2964_v46  ;;  %v2982_v50 = vld [vmem:[%s9700_s6 + $0xa0] sm:$0xff]  ;;  %v2983_v41 = vld [vmem:[%s9700_s6 + $0xa8] sm:$0xff]  ;;  %v2988_v51 = vld [vmem:[%s9700_s6 + $0xd0] sm:$0xff] }
 0x2ea   :  { %v6243_v55 = vunpack.i.h.bf16 %v6241_v54  ;;  %v6242_v56 = vunpack.i.l.bf16 %v6241_v54  ;;  %v1890_v57 = vsel %vm95_vm11, %v8222_v53, %v6247_v9  ;;  %v1840_v28 = vsel %vm95_vm11, %v8194_v20, %v6248_v7  ;;  %v2441_v53 = vld [vmem:[#allocation4 + $0x90] sm:$0xff]  ;;  %v2966_v7 = vld [vmem:[%s9700_s6 + $0x20] sm:$0xff]  ;;  %v2967_v9 = vld [vmem:[%s9700_s6 + $0x28] sm:$0xff] }
 0x2eb   :  { %v6256_v10 = vpop.permute.xlu1 %6255  ;;  %v5277_v1 = vpop.f32.mrb[16].mxu0  ;;  %5844 = vmatprep.subr.bf16.mxu0 %v5843_v22  ;;  %v2989_v30 = vld [vmem:[%s9700_s6 + $0xd8] sm:$0xff] }
 0x2ec   :  { %v1921_v19 = vsel %vm1858_vm14, %v1905_v14, %v6242_v56  ;;  %v1873_v25 = vsel %vm1858_vm14, %v1856_v33, %v6243_v55  ;;  %v5278_v5 = vpop.f32.mrb[17].mxu0  ;;  %v6258_v27 = vunpack.i.h.bf16 %v6256_v10  ;;  %v6257_v40 = vunpack.i.l.bf16 %v6256_v10  ;;  %5846 = vmatpush3.bf16.msra.mxu0 %v5845_v15  ;;  %v8415_v55 = vld [vmem:[%s9701_s5] ss:$0 sm:$0xff]  ;;  %v2973_v46 = vld [vmem:[%s9700_s6 + $0x58] sm:$0xff] }
 0x2ed   :  { %v6251_v36 = vpop.permute.xlu0 %6250  ;;  %2148 = vmatprep.mubr.f32.mxu1 %v1921_v19  ;;  %v8349_v32 = vadd.f32 %v5278_v5, %v5277_v1  ;;  %v5847_v56 = vpack.c.bf16 %v2983_v41, %v2982_v50  ;;  %v5849_v14 = vpack.c.bf16 %v2967_v9, %v2966_v7  ;;  %v2449_v5 = vld [vmem:[#allocation4 + $0x130] sm:$0xff]  ;;  %v5859_v22 = vpack.c.bf16 %v2989_v30, %v2988_v51  ;;  %v2990_v9 = vld [vmem:[%s9700_s6 + $0xe0] sm:$0xff] }
 0x2ee   :  { %v6253_v44 = vunpack.i.h.bf16 %v6251_v36  ;;  %v6252_v8 = vunpack.i.l.bf16 %v6251_v36  ;;  %2149 = vmatmul.mubr.f32.gmra.mrb[22].mxu1 %v1873_v25  ;;  %v2984_v36 = vld [vmem:[%s9700_s6 + $0xb0] sm:$0xff] }
 0x2ef   :  { %v3401_v23 = vpop.permute.xlu1 %3400  ;;  %5848 = vmatprep.subr.bf16.mxu0 %v5847_v56  ;;  %v2081_v25 = vadd.f32 %v8349_v32, %v8415_v55  ;;  %v2969_v32 = vld [vmem:[%s9700_s6 + $0x38] sm:$0xff] }
 0x2f0   :  { %3448 = vst.msk [vmem:[#allocation5 + $0x21] sm:$0xff] %vm95_vm11, %v3401_v23  ;;  %v1906_v34 = vsel %vm1841_vm13, %v1890_v57, %v6252_v8  ;;  %v1857_v58 = vsel %vm1841_vm13, %v1840_v28, %v6253_v44  ;;  %5850 = vmatpush3.bf16.msra.mxu0 %v5849_v14  ;;  %v2985_v44 = vld [vmem:[%s9700_s6 + $0xb8] sm:$0xff]  ;;  %v2968_v23 = vld [vmem:[%s9700_s6 + $0x30] sm:$0xff]  ;;  %v2991_v14 = vld [vmem:[%s9700_s6 + $0xe8] sm:$0xff] }
 0x2f1   :  { %v3399_v3 = vpop.permute.xlu0 %3398  ;;  %v1922_v17 = vsel %vm1858_vm14, %v1906_v34, %v6257_v40  ;;  %v1874_v12 = vsel %vm1858_vm14, %v1857_v58, %v6258_v27  ;;  %v5851_v40 = vpack.c.bf16 %v2985_v44, %v2984_v36  ;;  %v5853_v34 = vpack.c.bf16 %v2969_v32, %v2968_v23  ;;  %v2992_v44 = vld [vmem:[%s9700_s6 + $0xf0] sm:$0xff] }
 0x2f2   :  { %3447 = vst.msk [vmem:[#allocation5 + $0x11] sm:$0xff] %vm95_vm11, %v3399_v3  ;;  %2153 = vmatprep.mubr.f32.mxu1 %v1922_v17 }
 0x2f3   :  { %2154 = vmatmul.mubr.f32.gmra.mrb[24].mxu1 %v1874_v12  ;;  %v3405_v0 = vpop.permute.xlu1 %3404  ;;  %5852 = vmatprep.subr.bf16.mxu0 %v5851_v40 }
 0x2f4   :  { %3450 = vst.msk [vmem:[#allocation5 + $0x41] sm:$0xff] %vm95_vm11, %v3405_v0  ;;  %5854 = vmatpush3.bf16.msra.mxu0 %v5853_v34  ;;  %v2369_v34 = vld [vmem:[#allocation4 + $0x2] sm:$0xff] }
 0x2f5   :  { %v3403_v20 = vpop.permute.xlu0 %3402  ;;  %5856 = vmatprep.subr.bf16.mxu0 %v5855_v48 }
 0x2f6   :  { %3449 = vst.msk [vmem:[#allocation5 + $0x31] sm:$0xff] %vm95_vm11, %v3403_v20  ;;  %v2465_v20 = vld [vmem:[#allocation4 + $0x131] sm:$0xff] }
 0x2f7   :  { %v3409_v45 = vpop.permute.xlu1 %3408  ;;  %v8375_v21 = vld [vmem:[#allocation5 + $0x20] sm:$0xff] }
 0x2f8   :  { %3452 = vst.msk [vmem:[#allocation5 + $0x61] sm:$0xff] %vm95_vm11, %v3409_v45  ;;  %v6259_v59 = vpack.i.bf16 %v8375_v21, %v2441_v53  ;;  %v8379_v52 = vld [vmem:[#allocation5 + $0x21] sm:$0xff] }
 0x2f9   :  { %v3407_v4 = vpop.permute.xlu0 %3406  ;;  %v3480_v24 = vld [vmem:[#allocation5 + $0x11] sm:$0xff]  ;;  %v6264_v16 = vpack.i.bf16 %v8379_v52, %v2457_v62  ;;  %v2971_v45 = vld [vmem:[%s9700_s6 + $0x48] sm:$0xff] }
 0x2fa   :  { %3451 = vst.msk [vmem:[#allocation5 + $0x51] sm:$0xff] %vm95_vm11, %v3407_v4  ;;  %6260 = vrot.lane.b32.xlu1 %v6259_v59, %s6845_s25  ;;  %v6269_v35 = vpack.i.bf16 %v3480_v24, %v2361_v47  ;;  %v8383_v39 = vld [vmem:[#allocation5 + $0x12] sm:$0xff]  ;;  %v5857_v59 = vpack.c.bf16 %v2971_v45, %v2970_v38 }
 0x2fb   :  { %v3413_v37 = vpop.permute.xlu1 %3412  ;;  %v5280_v26 = vpop.f32.mrb[18].mxu0  ;;  %v6274_v18 = vpack.i.bf16 %v8383_v39, %v2377_v43 }
 0x2fc   :  { %6270 = vrot.lane.b32.xlu0 %v6269_v35, %s6846_s27  ;;  %3454 = vst.msk [vmem:[#allocation5 + $0x81] sm:$0xff] %vm95_vm11, %v3413_v37  ;;  %v5281_v13 = vpop.f32.mrb[19].mxu0  ;;  %5858 = vmatpush3.bf16.msra.mxu0 %v5857_v59 }
 0x2fd   :  { %v3411_v49 = vpop.permute.xlu0 %3410  ;;  %v5282_v63 = vadd.f32 %v5281_v13, %v5280_v26  ;;  %5860 = vmatprep.subr.bf16.mxu0 %v5859_v22 }
 0x2fe   :  { %3453 = vst.msk [vmem:[#allocation5 + $0x71] sm:$0xff] %vm95_vm11, %v3411_v49  ;;  %6265 = vrot.lane.b32.xlu1 %v6264_v16, %s6847_s28 }
 0x2ff   :  { %v3417_v42 = vpop.permute.xlu1 %3416  ;;  %v2086_v33 = vadd.f32 %v5282_v63, %v8415_v55  ;;  %v2972_v63 = vld [vmem:[%s9700_s6 + $0x50] sm:$0xff] }
 0x300   :  { %6275 = vrot.lane.b32.xlu0 %v6274_v18, %s6845_s25  ;;  %3456 = vst.msk [vmem:[#allocation5 + $0xc1] sm:$0xff] %vm95_vm11, %v3417_v42  ;;  %v5283_v31 = vpop.f32.mrb[20].mxu0  ;;  %v5861_v42 = vpack.c.bf16 %v2973_v46, %v2972_v63 }
 0x301   :  { %v3415_v61 = vpop.permute.xlu0 %3414  ;;  %v5284_v54 = vpop.f32.mrb[21].mxu0 }
 0x302   :  { %3455 = vst.msk [vmem:[#allocation5 + $0xb1] sm:$0xff] %vm95_vm11, %v3415_v61  ;;  %v5285_v10 = vadd.f32 %v5284_v54, %v5283_v31  ;;  %5862 = vmatpush3.bf16.msra.mxu0 %v5861_v42 }
 0x304   :  { %v5657_v19 = vpop.f32.mrb[22].mxu0  ;;  %v2091_v53 = vadd.f32 %v5285_v10, %v8415_v55 }
 0x305   :  { %v3419_v1 = vpop.permute.xlu0 %3418  ;;  %v2231_v8 = vadd.f32 %v5657_v19, %v2086_v33  ;;  %v2225_v27 = vpop.f32.mrb[23].mxu0  ;;  %v2974_v33 = vld [vmem:[%s9700_s6 + $0x60] sm:$0xff] }
 0x306   :  { %3457 = vst.msk [vmem:[#allocation5 + $0xd1] sm:$0xff] %vm95_vm11, %v3419_v1  ;;  %v2226_v57 = vadd.f32 %v2225_v27, %v2081_v25  ;;  %v2975_v1 = vld [vmem:[%s9700_s6 + $0x68] sm:$0xff]  ;;  %v2976_v27 = vld [vmem:[%s9700_s6 + $0x70] sm:$0xff] }
 0x307   :  { %v8439_v28 = vld [vmem:[#allocation5 + $0xc0] sm:$0xff]  ;;  %v2305_v58 = vmax.f32 %v2231_v8, 0.0  ;;  %v5865_v36 = vpack.c.bf16 %v2975_v1, %v2974_v33  ;;  %v2993_v8 = vld [vmem:[%s9700_s6 + $0xf8] sm:$0xff] }
 0x308   :  { %v6279_v3 = vpack.i.bf16 %v8439_v28, %v2449_v5  ;;  %v2304_v17 = vmax.f32 %v2226_v57, 0.0  ;;  %v8442_v0 = vpop.f32.mrb[24].mxu0  ;;  %v3584_v11 = vld [vmem:[#allocation5 + $0xc1] sm:$0xff]  ;;  %v5863_v5 = vpack.c.bf16 %v2991_v14, %v2990_v9  ;;  %v5867_v57 = vpack.c.bf16 %v2993_v8, %v2992_v44 }
 0x309   :  { %v3421_v12 = vpop.permute.xlu0 %3420  ;;  %2322 = vst.msk [vmem:[#allocation4 + $0x21] sm:$0xff] %vm95_vm11, %v2305_v58  ;;  %v2235_v60 = vpop.f32.mrb[25].mxu0  ;;  %v6284_v4 = vpack.i.bf16 %v3584_v11, %v2465_v20  ;;  %v3552_v24 = vld [vmem:[#allocation5 + $0xc2] sm:$0xff]  ;;  %v3504_v43 = vld [vmem:[#allocation5 + $0xb2] sm:$0xff] }
 0x30a   :  { %3458 = vst.msk [vmem:[#allocation5 + $0xe1] sm:$0xff] %vm95_vm11, %v3421_v12  ;;  %6280 = vrot.lane.b32.xlu1 %v6279_v3, %s6845_s25  ;;  %2321 = vst.msk [vmem:[#allocation4 + $0x11] sm:$0xff] %vm95_vm11, %v2304_v17  ;;  %v2236_v47 = vadd.f32 %v2235_v60, %v2091_v53  ;;  %v3488_v16 = vld [vmem:[#allocation5 + $0xb1] sm:$0xff]  ;;  %5864 = vmatprep.subr.bf16.mxu0 %v5863_v5  ;;  %v2353_v20 = vld [vmem:[#allocation4 + $0x1] sm:$0xff] }
 0x30b   :  { %v6289_v29 = vpack.i.bf16 %v3488_v16, %v3552_v24  ;;  %v2977_v3 = vld [vmem:[%s9700_s6 + $0x78] sm:$0xff]  ;;  %5866 = vmatpush3.bf16.msra.mxu0 %v5865_v36 }
 0x30c   :  { %v2306_v62 = vmax.f32 %v2236_v47, 0.0  ;;  %v8461_v37 = vpop.f32.mrb[26].mxu0  ;;  %v5869_v12 = vpack.c.bf16 %v2977_v3, %v2976_v27  ;;  %5868 = vmatprep.subr.bf16.mxu0 %v5867_v57  ;;  %v4105_v57 = vld [vmem:[%s9702_s8 + $0x88] sm:$0xff] }
 0x30d   :  { %v3423_v35 = vpop.permute.xlu0 %3422  ;;  %v3569_v26 = vld [vmem:[#allocation5 + $0xd0] sm:$0xff]  ;;  %v8464_v49 = vpop.f32.mrb[27].mxu0 }
 0x30e   :  { %3459 = vst.msk [vmem:[#allocation5 + $0xf1] sm:$0xff] %vm95_vm11, %v3423_v35  ;;  %6285 = vrot.lane.b32.xlu1 %v6284_v4, %s6847_s28  ;;  %v6299_v13 = vpack.i.bf16 %v3504_v43, %v3569_v26  ;;  %2323 = vst.msk [vmem:[#allocation4 + $0x31] sm:$0xff] %vm95_vm11, %v2306_v62  ;;  %v3553_v18 = vld [vmem:[#allocation5 + $0xd2] sm:$0xff] }
 0x30f   :  { %v6309_v41 = vpack.i.bf16 %v3584_v11, %v3553_v18  ;;  %v3585_v7 = vld [vmem:[#allocation5 + $0xd1] sm:$0xff]  ;;  %5870 = vmatpush3.bf16.msra.mxu0 %v5869_v12 }
 0x310   :  { %6300 = vrot.lane.b32.xlu0 %v6299_v13, %s6845_s25  ;;  %v8481_v61 = vld [vmem:[#allocation4 + $0x22] sm:$0xff]  ;;  %v8483_v31 = vpop.f32.mrb[28].mxu0  ;;  %v6304_v17 = vpack.i.bf16 %v8439_v28, %v3585_v7 }
 0x311   :  { %v3425_v15 = vpop.permute.xlu0 %3424  ;;  %v3570_v50 = vld [vmem:[#allocation5 + $0xe0] sm:$0xff]  ;;  %5687 = vmatprep.mubr.msk.f32.mxu1 %vm95_vm11, %v8481_v61  ;;  %v8489_v54 = vpop.f32.mrb[29].mxu0  ;;  %v2417_v11 = vld [vmem:[#allocation4 + $0x12] sm:$0xff] }
 0x312   :  { %3460 = vst.msk [vmem:[#allocation5 + $0x101] sm:$0xff] %vm95_vm11, %v3425_v15  ;;  %6290 = vrot.lane.b32.xlu1 %v6289_v29, %s6846_s27  ;;  %v3586_v56 = vld [vmem:[#allocation5 + $0xe1] sm:$0xff]  ;;  %v6294_v10 = vpack.i.bf16 %v3552_v24, %v3570_v50  ;;  %v6324_v60 = vpack.i.bf16 %v2353_v20, %v2417_v11  ;;  %v8534_v6 = vld [vmem:[#allocation4 + $0x10] sm:$0xff] }
 0x313   :  { %v6314_v32 = vpack.i.bf16 %v3569_v26, %v3586_v56  ;;  %v8523_v58 = vld [vmem:[#allocation4 + $0x20] sm:$0xff]  ;;  %v8541_v59 = vld [vmem:[#allocation4 + $0x11] sm:$0xff]  ;;  %v4089_v20 = vld [vmem:[%s9702_s8 + $0x8] sm:$0xff] }
 0x314   :  { %6310 = vrot.lane.b32.xlu0 %v6309_v41, %s6846_s27  ;;  %v8504_v25 = vpop.f32.mrb[30].mxu0  ;;  %v6319_v2 = vpack.i.bf16 %v2369_v34, %v8523_v58  ;;  %v8536_v38 = vld [vmem:[#allocation4 + $0x21] sm:$0xff]  ;;  %v6334_v43 = vpack.i.bf16 %v8541_v59, %v8481_v61 }
 0x315   :  { %v3427_v19 = vpop.permute.xlu0 %3426  ;;  %v8516_v40 = vpop.f32.mrb[31].mxu0  ;;  %v8519_v23 = vld [vmem:[#allocation4 + $0x32] sm:$0xff]  ;;  %v6329_v47 = vpack.i.bf16 %v8534_v6, %v8536_v38 }
 0x316   :  { %3461 = vst.msk [vmem:[#allocation5 + $0x111] sm:$0xff] %vm95_vm11, %v3427_v19  ;;  %6295 = vrot.lane.b32.xlu1 %v6294_v10, %s6845_s25  ;;  %5688 = vmatmul.mubr.msk.f32.vlgmr.msra.gmra.mrb[26].mxu1 %vm95_vm11, %v8519_v23  ;;  %v8552_v13 = vld [vmem:[#allocation4 + $0x31] sm:$0xff] }
 0x317   :  { %v6349_v18 = vpack.i.bf16 %v8523_v58, %v8552_v13  ;;  %v8565_v29 = vld [vmem:[#allocation4 + $0x30] sm:$0xff] }
 0x318   :  { %6315 = vrot.lane.b32.xlu0 %v6314_v32, %s6847_s28  ;;  %v6344_v7 = vpack.i.bf16 %v2417_v11, %v8565_v29  ;;  %v4104_v32 = vld [vmem:[%s9702_s8 + $0x80] sm:$0xff] }
 0x319   :  { %v3429_v53 = vpop.permute.xlu0 %3428  ;;  %v5879_v12 = vpack.c.bf16 %v4105_v57, %v4104_v32 }
 0x31a   :  { %3462 = vst.msk [vmem:[#allocation5 + $0x121] sm:$0xff] %vm95_vm11, %v3429_v53  ;;  %6305 = vrot.lane.b32.xlu1 %v6304_v17, %s6847_s28  ;;  %v4088_v53 = vld [vmem:[%s9702_s8] sm:$0xff] }
 0x31b   :  { %5880 = vmatprep.subr.bf16.mxu1 %v5879_v12  ;;  %v4112_v12 = vld [vmem:[%s9702_s8 + $0xc0] sm:$0xff] }
 0x31c   :  { %6320 = vrot.lane.b32.xlu0 %v6319_v2, %s6845_s25  ;;  %v5881_v2 = vpack.c.bf16 %v4089_v20, %v4088_v53  ;;  %v4113_v53 = vld [vmem:[%s9702_s8 + $0xc8] sm:$0xff] }
 0x31e   :  { %6325 = vrot.lane.b32.xlu1 %v6324_v60, %s6846_s27  ;;  %v5286_v28 = vpop.f32.mrb[0].mxu1  ;;  %5882 = vmatpush3.bf16.msra.mxu1 %v5881_v2  ;;  %v5895_v2 = vpack.c.bf16 %v4113_v53, %v4112_v12  ;;  %v3511_v12 = vld [vmem:[#allocation5 + $0x10] sm:$0xff] }
 0x31f   :  { %v5287_v45 = vpop.f32.mrb[1].mxu1 }
 0x320   :  { %v5288_v48 = vadd.f32 %v5287_v45, %v5286_v28 }
 0x322   :  { %v8543_v4 = vpop.f32.mrb[32].mxu0  ;;  %6330 = vrot.lane.b32.xlu1 %v6329_v47, %s6847_s28  ;;  %v2096_v24 = vadd.f32 %v5288_v48, %v8415_v55  ;;  %v4106_v47 = vld [vmem:[%s9702_s8 + $0x90] sm:$0xff]  ;;  %v4107_v48 = vld [vmem:[%s9702_s8 + $0x98] sm:$0xff] }
 0x323   :  { %v8547_v62 = vpop.f32.mrb[33].mxu0  ;;  %v5289_v35 = vpop.f32.mrb[2].mxu1 }
 0x324   :  { %v2241_v26 = vadd.f32 %v8442_v0, %v2096_v24  ;;  %v5290_v16 = vpop.f32.mrb[3].mxu1  ;;  %v6354_v0 = vpack.i.bf16 %v8536_v38, %v8519_v23 }
 0x325   :  { %v5291_v51 = vadd.f32 %v5290_v16, %v5289_v35  ;;  %v4091_v16 = vld [vmem:[%s9702_s8 + $0x18] sm:$0xff] }
 0x326   :  { %6335 = vrot.lane.b32.xlu1 %v6334_v43, %s6846_s27  ;;  %v2307_v30 = vmax.f32 %v2241_v26, 0.0  ;;  %v5883_v43 = vpack.c.bf16 %v4107_v48, %v4106_v47  ;;  %v4090_v26 = vld [vmem:[%s9702_s8 + $0x10] sm:$0xff] }
 0x327   :  { %v2101_v63 = vadd.f32 %v5291_v51, %v8415_v55  ;;  %v5885_v51 = vpack.c.bf16 %v4091_v16, %v4090_v26  ;;  %v4098_v16 = vld [vmem:[%s9702_s8 + $0x50] sm:$0xff] }
 0x328   :  { %2324 = vst.msk [vmem:[#allocation4 + $0x41] sm:$0xff] %vm95_vm11, %v2307_v30  ;;  %5884 = vmatprep.subr.bf16.mxu1 %v5883_v43 }
 0x329   :  { %v2246_v22 = vadd.f32 %v8464_v49, %v2101_v63  ;;  %5886 = vmatpush3.bf16.msra.mxu1 %v5885_v51 }
 0x32a   :  { %6350 = vrot.lane.b32.xlu1 %v6349_v18, %s6847_s28  ;;  %v4109_v18 = vld [vmem:[%s9702_s8 + $0xa8] sm:$0xff] }
 0x32b   :  { %v2308_v46 = vmax.f32 %v2246_v22, 0.0 }
 0x32d   :  { %2325 = vst.msk [vmem:[#allocation4 + $0x51] sm:$0xff] %vm95_vm11, %v2308_v46 }
 0x32e   :  { %6355 = vrot.lane.b32.xlu1 %v6354_v0, %s6846_s27  ;;  %v4092_v0 = vld [vmem:[%s9702_s8 + $0x20] sm:$0xff] }
 0x32f   :  { %v8567_v42 = vld [vmem:[#allocation4 + $0x42] sm:$0xff] }
 0x330   :  { %v2436_v15 = vld [vmem:[#allocation4 + $0x40] sm:$0xff]  ;;  %5690 = vmatprep.mubr.msk.f32.mxu1 %vm95_vm11, %v8567_v42  ;;  %v6364_v9 = vpack.i.bf16 %v8552_v13, %v8567_v42 }
 0x331   :  { %v8569_v50 = vld [vmem:[#allocation4 + $0x41] sm:$0xff]  ;;  %v6339_v49 = vpack.i.bf16 %v8481_v61, %v2436_v15 }
 0x332   :  { %v6359_v41 = vpack.i.bf16 %v8565_v29, %v8569_v50 }
 0x333   :  { %6340 = vrot.lane.b32.xlu0 %v6339_v49, %s6845_s25 }
 0x334   :  { %6360 = vrot.lane.b32.xlu1 %v6359_v41, %s6847_s28  ;;  %v8578_v56 = vld [vmem:[#allocation4 + $0x52] sm:$0xff] }
 0x335   :  { %5691 = vmatmul.mubr.msk.f32.gmra.mrb[28].mxu1 %vm95_vm11, %v8578_v56  ;;  %v8585_v10 = vld [vmem:[#allocation4 + $0x51] sm:$0xff]  ;;  %v6384_v14 = vpack.i.bf16 %v8569_v50, %v8578_v56 }
 0x336   :  { %v6379_v61 = vpack.i.bf16 %v2436_v15, %v8585_v10  ;;  %v4093_v15 = vld [vmem:[%s9702_s8 + $0x28] sm:$0xff] }
 0x337   :  { %6345 = vrot.lane.b32.xlu0 %v6344_v7, %s6845_s25  ;;  %v5889_v49 = vpack.c.bf16 %v4093_v15, %v4092_v0  ;;  %v2389_v7 = vld [vmem:[#allocation4 + $0x50] sm:$0xff]  ;;  %v4100_v0 = vld [vmem:[%s9702_s8 + $0x60] sm:$0xff]  ;;  %v4101_v15 = vld [vmem:[%s9702_s8 + $0x68] sm:$0xff] }
 0x338   :  { %6365 = vrot.lane.b32.xlu1 %v6364_v9, %s6846_s27  ;;  %v6374_v57 = vpack.i.bf16 %v8519_v23, %v2389_v7  ;;  %v4097_v23 = vld [vmem:[%s9702_s8 + $0x48] sm:$0xff] }
 0x33c   :  { %6380 = vrot.lane.b32.xlu1 %v6379_v61, %s6847_s28 }
 0x33f   :  { %v8594_v33 = vpop.f32.mrb[34].mxu0  ;;  %v5292_v1 = vpop.f32.mrb[4].mxu1 }
 0x340   :  { %6385 = vrot.lane.b32.xlu1 %v6384_v14, %s6846_s27  ;;  %v8596_v19 = vpop.f32.mrb[35].mxu0  ;;  %v5293_v5 = vpop.f32.mrb[5].mxu1 }
 0x341   :  { %v5294_v36 = vadd.f32 %v5293_v5, %v5292_v1  ;;  %v4110_v5 = vld [vmem:[%s9702_s8 + $0xb0] sm:$0xff] }
 0x343   :  { %v2106_v44 = vadd.f32 %v5294_v36, %v8415_v55  ;;  %v5295_v8 = vpop.f32.mrb[6].mxu1  ;;  %v8606_v17 = vpop.f32.mrb[36].mxu0  ;;  %v4111_v36 = vld [vmem:[%s9702_s8 + $0xb8] sm:$0xff] }
 0x344   :  { %v5296_v27 = vpop.f32.mrb[7].mxu1  ;;  %v8614_v11 = vpop.f32.mrb[37].mxu0 }
 0x345   :  { %v2251_v34 = vadd.f32 %v8461_v37, %v2106_v44  ;;  %v5297_v3 = vadd.f32 %v5296_v27, %v5295_v8  ;;  %v4094_v44 = vld [vmem:[%s9702_s8 + $0x30] sm:$0xff]  ;;  %v5891_v8 = vpack.c.bf16 %v4111_v36, %v4110_v5  ;;  %v4095_v27 = vld [vmem:[%s9702_s8 + $0x38] sm:$0xff] }
 0x346   :  { %v4102_v5 = vld [vmem:[%s9702_s8 + $0x70] sm:$0xff]  ;;  %v4103_v36 = vld [vmem:[%s9702_s8 + $0x78] sm:$0xff] }
 0x347   :  { %v2309_v60 = vmax.f32 %v2251_v34, 0.0  ;;  %v2111_v28 = vadd.f32 %v5297_v3, %v8415_v55  ;;  %v5298_v45 = vpop.f32.mrb[8].mxu1 }
 0x348   :  { %v5299_v37 = vpop.f32.mrb[9].mxu1 }
 0x349   :  { %2326 = vst.msk [vmem:[#allocation4 + $0x61] sm:$0xff] %vm95_vm11, %v2309_v60  ;;  %v2256_v24 = vadd.f32 %v8489_v54, %v2111_v28  ;;  %v5300_v35 = vadd.f32 %v5299_v37, %v5298_v45  ;;  %v4108_v54 = vld [vmem:[%s9702_s8 + $0xa0] sm:$0xff]  ;;  %v2473_v28 = vld [vmem:[#allocation4 + $0x92] sm:$0xff] }
 0x34a   :  { %v5887_v46 = vpack.c.bf16 %v4109_v18, %v4108_v54  ;;  %v4096_v60 = vld [vmem:[%s9702_s8 + $0x40] sm:$0xff] }
 0x34b   :  { %v2310_v30 = vmax.f32 %v2256_v24, 0.0  ;;  %v2116_v63 = vadd.f32 %v5300_v35, %v8415_v55  ;;  %v5897_v37 = vpack.c.bf16 %v4097_v23, %v4096_v60  ;;  %v4114_v24 = vld [vmem:[%s9702_s8 + $0xd0] sm:$0xff]  ;;  %v4115_v35 = vld [vmem:[%s9702_s8 + $0xd8] sm:$0xff] }
 0x34c   :  { %5888 = vmatprep.subr.bf16.mxu1 %v5887_v46  ;;  %v5899_v26 = vpack.c.bf16 %v4115_v35, %v4114_v24  ;;  %v3479_v46 = vld [vmem:[#allocation5 + $0x1] sm:$0xff] }
 0x34d   :  { %2327 = vst.msk [vmem:[#allocation4 + $0x71] sm:$0xff] %vm95_vm11, %v2310_v30  ;;  %v2261_v22 = vadd.f32 %v8483_v31, %v2116_v63  ;;  %5890 = vmatpush3.bf16.msra.mxu1 %v5889_v49  ;;  %v4116_v30 = vld [vmem:[%s9702_s8 + $0xe0] sm:$0xff]  ;;  %v4117_v63 = vld [vmem:[%s9702_s8 + $0xe8] sm:$0xff]  ;;  %v4118_v49 = vld [vmem:[%s9702_s8 + $0xf0] sm:$0xff] }
 0x34e   :  { %5892 = vmatprep.subr.bf16.mxu1 %v5891_v8 }
 0x34f   :  { %v2311_v41 = vmax.f32 %v2261_v22, 0.0  ;;  %v5903_v22 = vpack.c.bf16 %v4117_v63, %v4116_v30 }
 0x350   :  { %v2470_v9 = vld [vmem:[#allocation4 + $0x62] sm:$0xff] }
 0x351   :  { %v2438_v61 = vld [vmem:[#allocation4 + $0x60] sm:$0xff]  ;;  %2328 = vst.msk [vmem:[#allocation4 + $0x81] sm:$0xff] %vm95_vm11, %v2311_v41  ;;  %5693 = vmatprep.mubr.msk.f32.mxu1 %vm95_vm11, %v2470_v9  ;;  %v6394_v34 = vpack.i.bf16 %v8585_v10, %v2470_v9  ;;  %v4119_v41 = vld [vmem:[%s9702_s8 + $0xf8] sm:$0xff] }
 0x352   :  { %v8646_v14 = vld [vmem:[#allocation4 + $0x61] sm:$0xff]  ;;  %v6369_v31 = vpack.i.bf16 %v8567_v42, %v2438_v61  ;;  %v5893_v42 = vpack.c.bf16 %v4095_v27, %v4094_v44  ;;  %v5909_v44 = vpack.c.bf16 %v4103_v36, %v4102_v5 }
 0x353   :  { %v6389_v1 = vpack.i.bf16 %v2389_v7, %v8646_v14  ;;  %v5905_v7 = vpack.c.bf16 %v4101_v15, %v4100_v0 }
 0x354   :  { %6370 = vrot.lane.b32.xlu0 %v6369_v31, %s6845_s25  ;;  %v2471_v32 = vld [vmem:[#allocation4 + $0x72] sm:$0xff]  ;;  %5894 = vmatpush3.bf16.msra.mxu1 %v5893_v42  ;;  %v5907_v31 = vpack.c.bf16 %v4119_v41, %v4118_v49 }
 0x355   :  { %6390 = vrot.lane.b32.xlu1 %v6389_v1, %s6847_s28  ;;  %5694 = vmatmul.mubr.msk.f32.gmra.mrb[30].mxu1 %vm95_vm11, %v2471_v32  ;;  %v2439_v3 = vld [vmem:[#allocation4 + $0x70] sm:$0xff]  ;;  %v6409_v54 = vpack.i.bf16 %v8646_v14, %v2471_v32  ;;  %v3495_v1 = vld [vmem:[#allocation5 + $0x2] sm:$0xff] }
 0x356   :  { %v2455_v20 = vld [vmem:[#allocation4 + $0x71] sm:$0xff]  ;;  %5896 = vmatprep.subr.bf16.mxu1 %v5895_v2  ;;  %v6399_v47 = vpack.i.bf16 %v8578_v56, %v2439_v3  ;;  %v6419_v8 = vpack.i.bf16 %v3495_v1, %v2471_v32  ;;  %v3473_v1 = vld [vmem:[#allocation5 + $0xc0] sm:$0xff] }
 0x357   :  { %v6404_v48 = vpack.i.bf16 %v2438_v61, %v2455_v20  ;;  %v4099_v56 = vld [vmem:[%s9702_s8 + $0x58] sm:$0xff] }
 0x358   :  { %6375 = vrot.lane.b32.xlu0 %v6374_v57, %s6845_s25  ;;  %v2472_v45 = vld [vmem:[#allocation4 + $0x82] sm:$0xff]  ;;  %5898 = vmatpush3.bf16.msra.mxu1 %v5897_v37  ;;  %v5901_v51 = vpack.c.bf16 %v4099_v56, %v4098_v16 }
 0x359   :  { %6395 = vrot.lane.b32.xlu1 %v6394_v34, %s6846_s27  ;;  %5696 = vmatprep.mubr.msk.f32.mxu1 %vm95_vm11, %v2472_v45  ;;  %v2440_v43 = vld [vmem:[#allocation4 + $0x80] sm:$0xff]  ;;  %v6434_v61 = vpack.i.bf16 %v8383_v39, %v2472_v45 }
 0x35a   :  { %5697 = vmatmul.mubr.msk.f32.gmra.mrb[32].mxu1 %vm95_vm11, %v2473_v28  ;;  %v6424_v18 = vpack.i.bf16 %v2470_v9, %v2440_v43  ;;  %5900 = vmatprep.subr.bf16.mxu1 %v5899_v26  ;;  %v6414_v9 = vpack.i.bf16 %v3479_v46, %v2455_v20  ;;  %v2456_v39 = vld [vmem:[#allocation4 + $0x81] sm:$0xff]  ;;  %v6439_v53 = vpack.i.bf16 %v3511_v12, %v2440_v43 }
 0x35b   :  { %v6429_v27 = vpack.i.bf16 %v2439_v3, %v2456_v39 }
 0x35c   :  { %6400 = vrot.lane.b32.xlu0 %v6399_v47, %s6845_s25  ;;  %5902 = vmatpush3.bf16.msra.mxu1 %v5901_v51  ;;  %v3544_v47 = vld [vmem:[#allocation5 + $0x22] sm:$0xff] }
 0x35d   :  { %6405 = vrot.lane.b32.xlu1 %v6404_v48, %s6847_s28  ;;  %5904 = vmatprep.subr.bf16.mxu1 %v5903_v22 }
 0x360   :  { %6410 = vrot.lane.b32.xlu0 %v6409_v54, %s6846_s27  ;;  %5906 = vmatpush3.bf16.msra.mxu1 %v5905_v7 }
 0x361   :  { %6425 = vrot.lane.b32.xlu1 %v6424_v18, %s6845_s25  ;;  %5908 = vmatprep.subr.bf16.mxu1 %v5907_v31 }
 0x364   :  { %6415 = vrot.lane.b32.xlu0 %v6414_v9, %s6846_s27  ;;  %5910 = vmatpush3.bf16.msra.mxu1 %v5909_v44 }
 0x365   :  { %6435 = vrot.lane.b32.xlu1 %v6434_v61, %s6846_s27 }
 0x368   :  { %6420 = vrot.lane.b32.xlu0 %v6419_v8, %s6845_s25 }
 0x36b   :  { %v5301_v42 = vpop.f32.mrb[10].mxu1 }
 0x36c   :  { %6430 = vrot.lane.b32.xlu0 %v6429_v27, %s6847_s28  ;;  %v5302_v57 = vpop.f32.mrb[11].mxu1  ;;  %v8735_v32 = vpop.permute.xlu1 %6260 }
 0x36d   :  { %v5303_v34 = vadd.f32 %v5302_v57, %v5301_v42 }
 0x36e   :  { %v8738_v23 = vpop.permute.xlu0 %6270 }
 0x36f   :  { %v2121_v20 = vadd.f32 %v5303_v34, %v8415_v55 }
 0x370   :  { %6440 = vrot.lane.b32.xlu0 %v6439_v53, %s6847_s28  ;;  %v8740_v3 = vpop.permute.xlu1 %6265 }
 0x371   :  { %v2266_v2 = vadd.f32 %v8516_v40, %v2121_v20 }
 0x372   :  { %v8745_v35 = vpop.permute.xlu0 %6275 }
 0x373   :  { %v2312_v60 = vmax.f32 %v2266_v2, 0.0  ;;  %v3513_v2 = vld [vmem:[#allocation5 + $0x30] sm:$0xff] }
 0x375   :  { %2329 = vst.msk [vmem:[#allocation4 + $0xb1] sm:$0xff] %vm95_vm11, %v2312_v60  ;;  %v2337_v60 = vld [vmem:[#allocation4] sm:$0xff] }
 0x37c   :  { %v8742_v28 = vpop.permute.xlu1 %6280  ;;  %v2393_v45 = vld [vmem:[#allocation4 + $0xb0] sm:$0xff] }
 0x37d   :  { %v2425_v37 = vld [vmem:[#allocation4 + $0xb2] sm:$0xff]  ;;  %v6449_v48 = vpack.i.bf16 %v8375_v21, %v2393_v45 }
 0x37e   :  { %v6444_v24 = vpack.i.bf16 %v3544_v47, %v2425_v37  ;;  %v5304_v40 = vpop.f32.mrb[12].mxu1  ;;  %v2362_v43 = vld [vmem:[#allocation4 + $0xb1] sm:$0xff] }
 0x37f   :  { %v5305_v26 = vpop.f32.mrb[13].mxu1  ;;  %6450 = vrot.lane.b32.xlu0 %v6449_v48, %s6847_s28  ;;  %v6454_v51 = vpack.i.bf16 %v8379_v52, %v2362_v43 }
 0x380   :  { %6445 = vrot.lane.b32.xlu1 %v6444_v24, %s6846_s27  ;;  %v5306_v16 = vadd.f32 %v5305_v26, %v5304_v40  ;;  %v8749_v56 = vpop.permute.xlu1 %6285  ;;  %v3482_v26 = vld [vmem:[#allocation5 + $0x31] sm:$0xff] }
 0x382   :  { %v2126_v30 = vadd.f32 %v5306_v16, %v8415_v55  ;;  %v8753_v63 = vpop.permute.xlu0 %6300 }
 0x383   :  { %v5307_v21 = vpop.f32.mrb[14].mxu1  ;;  %6455 = vrot.lane.b32.xlu0 %v6454_v51, %s6846_s27 }
 0x384   :  { %v2271_v54 = vadd.f32 %v8504_v25, %v2126_v30  ;;  %v8757_v18 = vpop.permute.xlu1 %6290  ;;  %v5308_v22 = vpop.f32.mrb[15].mxu1  ;;  %v8763_v25 = vld [vmem:[#allocation5 + $0xd1] sm:$0xff] }
 0x385   :  { %v5309_v46 = vadd.f32 %v5308_v22, %v5307_v21 }
 0x386   :  { %v2313_v0 = vmax.f32 %v2271_v54, 0.0  ;;  %v6311_v15 = vpop.permute.xlu0 %6310 }
 0x387   :  { %v2131_v49 = vadd.f32 %v5309_v46, %v8415_v55  ;;  %v6313_v41 = vunpack.i.h.bf16 %v6311_v15  ;;  %v6312_v7 = vunpack.i.l.bf16 %v6311_v15  ;;  %6460 = vrot.lane.b32.xlu0 %v6444_v24, %s6845_s25 }
 0x388   :  { %2330 = vst.msk [vmem:[#allocation4 + $0xc1] sm:$0xff] %vm95_vm11, %v2313_v0  ;;  %v6296_v52 = vpop.permute.xlu1 %6295 }
 0x389   :  { %v2276_v9 = vadd.f32 %v8547_v62, %v2131_v49  ;;  %v6298_v61 = vunpack.i.h.bf16 %v6296_v52  ;;  %v6297_v31 = vunpack.i.l.bf16 %v6296_v52  ;;  %v4050_v36 = vsel %vm95_vm11, %v8763_v25, %v6312_v7  ;;  %v3498_v7 = vld [vmem:[#allocation5 + $0x32] sm:$0xff] }
 0x38a   :  { %v6316_v5 = vpop.permute.xlu0 %6315  ;;  %v4002_v44 = vsel %vm95_vm11, %v3473_v1, %v6313_v41 }
 0x38b   :  { %v2314_v8 = vmax.f32 %v2276_v9, 0.0  ;;  %v6318_v39 = vunpack.i.h.bf16 %v6316_v5  ;;  %v6317_v27 = vunpack.i.l.bf16 %v6316_v5  ;;  %v4066_v42 = vsel %vm1841_vm13, %v4050_v36, %v6297_v31  ;;  %v3514_v31 = vld [vmem:[#allocation5 + $0x40] sm:$0xff] }
 0x38c   :  { %v8769_v57 = vpop.permute.xlu1 %6305  ;;  %v4018_v62 = vsel %vm1841_vm13, %v4002_v44, %v6298_v61 }
 0x38d   :  { %2331 = vst.msk [vmem:[#allocation4 + $0xd1] sm:$0xff] %vm95_vm11, %v2314_v8  ;;  %v8774_v34 = vsel %vm1858_vm14, %v4066_v42, %v6317_v27  ;;  %v8777_v12 = vsel %vm1858_vm14, %v4018_v62, %v6318_v39  ;;  %v3483_v39 = vld [vmem:[#allocation5 + $0x41] sm:$0xff] }
 0x38e   :  { %v6321_v47 = vpop.permute.xlu0 %6320 }
 0x38f   :  { %v2474_v53 = vld [vmem:[#allocation4 + $0xc2] sm:$0xff]  ;;  %v6323_v51 = vunpack.i.h.bf16 %v6321_v47  ;;  %v6322_v30 = vunpack.i.l.bf16 %v6321_v47 }
 0x390   :  { %v2394_v20 = vld [vmem:[#allocation4 + $0xc0] sm:$0xff]  ;;  %v6326_v45 = vpop.permute.xlu1 %6325  ;;  %5699 = vmatprep.mubr.msk.f32.mxu1 %vm95_vm11, %v2474_v53  ;;  %v6489_v9 = vpack.i.bf16 %v3498_v7, %v2474_v53 }
 0x391   :  { %v6479_v37 = vpack.i.bf16 %v3513_v2, %v2394_v20  ;;  %v6328_v48 = vunpack.i.h.bf16 %v6326_v45  ;;  %v6327_v24 = vunpack.i.l.bf16 %v6326_v45  ;;  %v2363_v40 = vld [vmem:[#allocation4 + $0xc1] sm:$0xff] }
 0x392   :  { %v6484_v22 = vpack.i.bf16 %v3482_v26, %v2363_v40  ;;  %v3499_v20 = vld [vmem:[#allocation5 + $0x42] sm:$0xff] }
 0x393   :  { %6480 = vrot.lane.b32.xlu0 %v6479_v37, %s6847_s28  ;;  %6465 = vrot.lane.b32.xlu1 %v6479_v37, %s6845_s25  ;;  %v2866_v43 = vsel %vm95_vm11, %v2337_v60, %v6328_v48  ;;  %v2914_v16 = vsel %vm95_vm11, %v8541_v59, %v6327_v24 }
 0x394   :  { %v6331_v21 = vpop.permute.xlu1 %6330  ;;  %v2475_v54 = vld [vmem:[#allocation4 + $0xd2] sm:$0xff]  ;;  %v2930_v15 = vsel %vm1841_vm13, %v2914_v16, %v6322_v30  ;;  %v2882_v49 = vsel %vm1841_vm13, %v2866_v43, %v6323_v51 }
 0x395   :  { %v6333_v46 = vunpack.i.h.bf16 %v6331_v21  ;;  %v6332_v0 = vunpack.i.l.bf16 %v6331_v21  ;;  %5700 = vmatmul.mubr.msk.f32.gmra.mrb[34].mxu1 %vm95_vm11, %v2475_v54  ;;  %v2395_v61 = vld [vmem:[#allocation4 + $0xd0] sm:$0xff]  ;;  %v6519_v45 = vpack.i.bf16 %v3499_v20, %v2475_v54 }
 0x396   :  { %v6509_v5 = vpack.i.bf16 %v3514_v31, %v2395_v61  ;;  %v2364_v36 = vld [vmem:[#allocation4 + $0xd1] sm:$0xff] }
 0x397   :  { %6485 = vrot.lane.b32.xlu0 %v6484_v22, %s6846_s27  ;;  %6470 = vrot.lane.b32.xlu1 %v6484_v22, %s6847_s28  ;;  %v2946_v41 = vsel %vm1858_vm14, %v2930_v15, %v6332_v0  ;;  %v2898_v59 = vsel %vm1858_vm14, %v2882_v49, %v6333_v46  ;;  %v6514_v42 = vpack.i.bf16 %v3483_v39, %v2364_v36  ;;  %v4121_v36 = vld [vmem:[%s9702_s8 + $0x108] sm:$0xff] }
 0x398   :  { %3117 = vmatprep.mubr.f32.mxu0 %v2946_v41  ;;  %v6336_v52 = vpop.permute.xlu1 %6335 }
 0x399   :  { %3118 = vmatmul.mubr.f32.vlgmr.msra.gmra.mrb[38].mxu0 %v2898_v59  ;;  %v6338_v37 = vunpack.i.h.bf16 %v6336_v52  ;;  %v6337_v47 = vunpack.i.l.bf16 %v6336_v52 }
 0x39b   :  { %6490 = vrot.lane.b32.xlu0 %v6489_v9, %s6845_s25  ;;  %6475 = vrot.lane.b32.xlu1 %v6489_v9, %s6846_s27  ;;  %v2915_v54 = vsel %vm95_vm11, %v8536_v38, %v6337_v47  ;;  %v2867_v22 = vsel %vm95_vm11, %v8534_v6, %v6338_v37  ;;  %v3500_v47 = vld [vmem:[#allocation5 + $0x52] sm:$0xff] }
 0x39c   :  { %v6351_v1 = vpop.permute.xlu1 %6350 }
 0x39d   :  { %v6352_v41 = vunpack.i.l.bf16 %v6351_v1 }
 0x39e   :  { %v5310_v44 = vpop.f32.mrb[16].mxu1 }
 0x39f   :  { %6510 = vrot.lane.b32.xlu0 %v6509_v5, %s6847_s28  ;;  %6495 = vrot.lane.b32.xlu1 %v6509_v5, %s6845_s25  ;;  %v5311_v8 = vpop.f32.mrb[17].mxu1 }
 0x3a0   :  { %v5312_v27 = vadd.f32 %v5311_v8, %v5310_v44  ;;  %v6356_v53 = vpop.permute.xlu1 %6355 }
 0x3a1   :  { %v6357_v26 = vunpack.i.l.bf16 %v6356_v53  ;;  %v6358_v46 = vunpack.i.h.bf16 %v6356_v53 }
 0x3a2   :  { %v2136_v62 = vadd.f32 %v5312_v27, %v8415_v55  ;;  %v3515_v27 = vld [vmem:[#allocation5 + $0x50] sm:$0xff] }
 0x3a3   :  { %6515 = vrot.lane.b32.xlu0 %v6514_v42, %s6846_s27  ;;  %6500 = vrot.lane.b32.xlu1 %v6514_v42, %s6847_s28  ;;  %v2916_v52 = vsel %vm95_vm11, %v8552_v13, %v6357_v26  ;;  %v4120_v13 = vld [vmem:[%s9702_s8 + $0x100] sm:$0xff] }
 0x3a4   :  { %v2281_v2 = vadd.f32 %v8543_v4, %v2136_v62  ;;  %v5313_v60 = vpop.f32.mrb[18].mxu1  ;;  %v6353_v4 = vunpack.i.h.bf16 %v6351_v1  ;;  %v2868_v1 = vsel %vm95_vm11, %v8523_v58, %v6358_v46  ;;  %v5911_v62 = vpack.c.bf16 %v4121_v36, %v4120_v13 }
 0x3a5   :  { %v5314_v48 = vpop.f32.mrb[19].mxu1  ;;  %v6341_v24 = vpop.permute.xlu0 %6340 }
 0x3a6   :  { %v2315_v40 = vmax.f32 %v2281_v2, 0.0  ;;  %v5315_v43 = vadd.f32 %v5314_v48, %v5313_v60  ;;  %v6342_v51 = vunpack.i.l.bf16 %v6341_v24  ;;  %v6361_v30 = vpop.permute.xlu1 %6360  ;;  %v6343_v59 = vunpack.i.h.bf16 %v6341_v24  ;;  %5912 = vmatprep.subr.bf16.mxu0 %v5911_v62  ;;  %v3484_v2 = vld [vmem:[#allocation5 + $0x51] sm:$0xff] }
 0x3a7   :  { %6520 = vrot.lane.b32.xlu0 %v6519_v45, %s6845_s25  ;;  %6505 = vrot.lane.b32.xlu1 %v6519_v45, %s6846_s27  ;;  %v6362_v7 = vunpack.i.l.bf16 %v6361_v30 }
 0x3a8   :  { %2332 = vst.msk [vmem:[#allocation4 + $0xe1] sm:$0xff] %vm95_vm11, %v2315_v40  ;;  %v2141_v16 = vadd.f32 %v5315_v43, %v8415_v55  ;;  %v2932_v38 = vsel %vm1841_vm13, %v2916_v52, %v6342_v51  ;;  %v2884_v42 = vsel %vm1841_vm13, %v2868_v1, %v6343_v59  ;;  %5914 = vmatpush3.bf16.msra.mxu0 %v5911_v62  ;;  %v3516_v43 = vld [vmem:[#allocation5 + $0x60] sm:$0xff] }
 0x3a9   :  { %v6346_v21 = vpop.permute.xlu0 %6345  ;;  %v2948_v44 = vsel %vm1858_vm14, %v2932_v38, %v6362_v7  ;;  %v3501_v7 = vld [vmem:[#allocation5 + $0x62] sm:$0xff] }
 0x3aa   :  { %v2286_v0 = vadd.f32 %v8596_v19, %v2141_v16  ;;  %v6348_v15 = vunpack.i.h.bf16 %v6346_v21  ;;  %v6347_v49 = vunpack.i.l.bf16 %v6346_v21  ;;  %v6363_v19 = vunpack.i.h.bf16 %v6361_v30  ;;  %v6366_v37 = vpop.permute.xlu1 %6365 }
 0x3ac   :  { %v2316_v9 = vmax.f32 %v2286_v0, 0.0  ;;  %v2931_v61 = vsel %vm1841_vm13, %v2915_v54, %v6347_v49  ;;  %v2883_v31 = vsel %vm1841_vm13, %v2867_v22, %v6348_v15  ;;  %v2900_v20 = vsel %vm1858_vm14, %v2884_v42, %v6363_v19  ;;  %v3485_v54 = vld [vmem:[#allocation5 + $0x61] sm:$0xff] }
 0x3ad   :  { %v2947_v6 = vsel %vm1858_vm14, %v2931_v61, %v6352_v41  ;;  %v2899_v5 = vsel %vm1858_vm14, %v2883_v31, %v6353_v4  ;;  %v6367_v61 = vunpack.i.l.bf16 %v6366_v37 }
 0x3ae   :  { %2333 = vst.msk [vmem:[#allocation4 + $0xf1] sm:$0xff] %vm95_vm11, %v2316_v9  ;;  %3122 = vmatprep.mubr.f32.mxu0 %v2947_v6  ;;  %v8836_v51 = vpop.permute.xlu1 %6380  ;;  %v6368_v9 = vunpack.i.h.bf16 %v6366_v37 }
 0x3af   :  { %3123 = vmatmul.mubr.f32.gmra.mrb[40].mxu0 %v2899_v5  ;;  %v2476_v8 = vld [vmem:[#allocation4 + $0xe2] sm:$0xff] }
 0x3b0   :  { %v2396_v39 = vld [vmem:[#allocation4 + $0xe0] sm:$0xff]  ;;  %3127 = vmatprep.mubr.f32.mxu0 %v2948_v44  ;;  %5702 = vmatprep.mubr.msk.f32.mxu1 %vm95_vm11, %v2476_v8  ;;  %v6549_v48 = vpack.i.bf16 %v3500_v47, %v2476_v8  ;;  %v2917_v8 = vsel %vm95_vm11, %v8569_v50, %v6367_v61 }
 0x3b1   :  { %v6539_v58 = vpack.i.bf16 %v3515_v27, %v2396_v39  ;;  %v2365_v53 = vld [vmem:[#allocation4 + $0xe1] sm:$0xff]  ;;  %v6383_v39 = vunpack.i.h.bf16 %v8836_v51 }
 0x3b2   :  { %v6544_v60 = vpack.i.bf16 %v3484_v2, %v2365_v53  ;;  %v6386_v49 = vpop.permute.xlu1 %6385 }
 0x3b3   :  { %6540 = vrot.lane.b32.xlu0 %v6539_v58, %s6847_s28  ;;  %6525 = vrot.lane.b32.xlu1 %v6539_v58, %s6845_s25  ;;  %v6387_v38 = vunpack.i.l.bf16 %v6386_v49  ;;  %v6388_v27 = vunpack.i.h.bf16 %v6386_v49 }
 0x3b4   :  { %3128 = vmatmul.mubr.f32.gmra.mrb[42].mxu0 %v2900_v20 }
 0x3b5   :  { %v2477_v45 = vld [vmem:[#allocation4 + $0xf2] sm:$0xff]  ;;  %v2918_v58 = vsel %vm95_vm11, %v8585_v10, %v6387_v38 }
 0x3b6   :  { %5703 = vmatmul.mubr.msk.f32.gmra.mrb[36].mxu1 %vm95_vm11, %v2477_v45  ;;  %v2397_v24 = vld [vmem:[#allocation4 + $0xf0] sm:$0xff]  ;;  %v6579_v52 = vpack.i.bf16 %v3501_v7, %v2477_v45 }
 0x3b7   :  { %6545 = vrot.lane.b32.xlu0 %v6544_v60, %s6846_s27  ;;  %6530 = vrot.lane.b32.xlu1 %v6544_v60, %s6847_s28  ;;  %v6569_v16 = vpack.i.bf16 %v3516_v43, %v2397_v24  ;;  %v2366_v4 = vld [vmem:[#allocation4 + $0xf1] sm:$0xff]  ;;  %v6382_v60 = vunpack.i.l.bf16 %v8836_v51 }
 0x3b8   :  { %v6574_v22 = vpack.i.bf16 %v3485_v54, %v2366_v4  ;;  %v3517_v24 = vld [vmem:[#allocation5 + $0x70] sm:$0xff] }
 0x3bb   :  { %6550 = vrot.lane.b32.xlu0 %v6549_v48, %s6845_s25  ;;  %6535 = vrot.lane.b32.xlu1 %v6549_v48, %s6846_s27  ;;  %v5316_v40 = vpop.f32.mrb[20].mxu1 }
 0x3bc   :  { %v5317_v26 = vpop.f32.mrb[21].mxu1 }
 0x3bd   :  { %v5318_v30 = vadd.f32 %v5317_v26, %v5316_v40 }
 0x3bf   :  { %6570 = vrot.lane.b32.xlu0 %v6569_v16, %s6847_s28  ;;  %v2146_v21 = vadd.f32 %v5318_v30, %v8415_v55  ;;  %6555 = vrot.lane.b32.xlu1 %v6569_v16, %s6845_s25  ;;  %v2341_v16 = vld [vmem:[#allocation4 + $0x40] sm:$0xff] }
 0x3c0   :  { %v2870_v54 = vsel %vm95_vm11, %v2341_v16, %v6388_v27 }
 0x3c1   :  { %v2291_v46 = vadd.f32 %v8594_v33, %v2146_v21  ;;  %v5319_v0 = vpop.f32.mrb[22].mxu1 }
 0x3c2   :  { %v5320_v15 = vpop.f32.mrb[23].mxu1 }
 0x3c3   :  { %6575 = vrot.lane.b32.xlu0 %v6574_v22, %s6846_s27  ;;  %v2317_v41 = vmax.f32 %v2291_v46, 0.0  ;;  %v5321_v59 = vadd.f32 %v5320_v15, %v5319_v0  ;;  %6560 = vrot.lane.b32.xlu1 %v6574_v22, %s6847_s28 }
 0x3c5   :  { %2334 = vst.msk [vmem:[#allocation4 + $0x101] sm:$0xff] %vm95_vm11, %v2317_v41  ;;  %v2151_v31 = vadd.f32 %v5321_v59, %v8415_v55  ;;  %v2869_v55 = vsel %vm95_vm11, %v8565_v29, %v6368_v9  ;;  %v4122_v41 = vld [vmem:[%s9702_s8 + $0x110] sm:$0xff]  ;;  %v4123_v59 = vld [vmem:[%s9702_s8 + $0x118] sm:$0xff] }
 0x3c6   :  { %v5322_v6 = vpop.f32.mrb[24].mxu1  ;;  %v6371_v33 = vpop.permute.xlu0 %6370  ;;  %v8886_v9 = vld [vmem:[#allocation5 + $0x71] sm:$0xff] }
 0x3c7   :  { %6580 = vrot.lane.b32.xlu0 %v6579_v52, %s6845_s25  ;;  %v2296_v5 = vadd.f32 %v8614_v11, %v2151_v31  ;;  %v8848_v19 = vpop.permute.xlu1 %6390  ;;  %v5323_v1 = vpop.f32.mrb[25].mxu1  ;;  %6565 = vrot.lane.b32.xlu1 %v6579_v52, %s6846_s27  ;;  %v6372_v13 = vunpack.i.l.bf16 %v6371_v33  ;;  %v6835_v11 = vld [vmem:[%s9701_s5] ss:$0 sm:$0xff]  ;;  %v6373_v53 = vunpack.i.h.bf16 %v6371_v33  ;;  %v5915_v31 = vpack.c.bf16 %v4123_v59, %v4122_v41 }
 0x3c8   :  { %v5324_v36 = vadd.f32 %v5323_v1, %v5322_v6  ;;  %v6392_v50 = vunpack.i.l.bf16 %v8848_v19  ;;  %v6393_v22 = vunpack.i.h.bf16 %v8848_v19  ;;  %v6262_v59 = vunpack.i.l.bf16 %v8735_v32 }
 0x3c9   :  { %v2318_v44 = vmax.f32 %v2296_v5, 0.0  ;;  %v2934_v40 = vsel %vm1841_vm13, %v2918_v58, %v6372_v13  ;;  %v2886_v49 = vsel %vm1841_vm13, %v2870_v54, %v6373_v53  ;;  %5916 = vmatprep.subr.bf16.mxu0 %v5915_v31  ;;  %v2342_v13 = vld [vmem:[#allocation4 + $0x50] sm:$0xff] }
 0x3ca   :  { %v2156_v42 = vadd.f32 %v6835_v11, %v5324_v36  ;;  %v6376_v62 = vpop.permute.xlu0 %6375  ;;  %v2950_v15 = vsel %vm1858_vm14, %v2934_v40, %v6392_v50  ;;  %5918 = vmatpush3.bf16.msra.mxu0 %v5915_v31  ;;  %v3503_v31 = vld [vmem:[#allocation5 + $0xa2] sm:$0xff] }
 0x3cb   :  { %2335 = vst.msk [vmem:[#allocation4 + $0x111] sm:$0xff] %vm95_vm11, %v2318_v44  ;;  %v6378_v20 = vunpack.i.h.bf16 %v6376_v62  ;;  %v6377_v2 = vunpack.i.l.bf16 %v6376_v62  ;;  %v6396_v29 = vpop.permute.xlu1 %6395 }
 0x3cc   :  { %v2301_v45 = vadd.f32 %v8606_v17, %v2156_v42  ;;  %v6397_v37 = vunpack.i.l.bf16 %v6396_v29  ;;  %v2478_v47 = vld [vmem:[#allocation4 + $0x102] sm:$0xff]  ;;  %v6398_v7 = vunpack.i.h.bf16 %v6396_v29  ;;  %v2481_v42 = vld [vmem:[#allocation4 + $0x132] sm:$0xff] }
 0x3cd   :  { %v2398_v48 = vld [vmem:[#allocation4 + $0x100] sm:$0xff]  ;;  %5705 = vmatprep.mubr.msk.f32.mxu1 %vm95_vm11, %v2478_v47  ;;  %v2933_v10 = vsel %vm1841_vm13, %v2917_v8, %v6377_v2  ;;  %v2885_v26 = vsel %vm1841_vm13, %v2869_v55, %v6378_v20  ;;  %v3502_v8 = vld [vmem:[#allocation5 + $0x72] sm:$0xff] }
 0x3ce   :  { %v6599_v43 = vpack.i.bf16 %v3517_v24, %v2398_v48  ;;  %v2319_v30 = vmax.f32 %v2301_v45, 0.0  ;;  %v6401_v4 = vpop.permute.xlu0 %6400  ;;  %v2949_v51 = vsel %vm1858_vm14, %v2933_v10, %v6382_v60  ;;  %v2901_v17 = vsel %vm1858_vm14, %v2885_v26, %v6383_v39  ;;  %v8871_v21 = vld [vmem:[#allocation4 + $0x101] sm:$0xff]  ;;  %v3527_v48 = vld [vmem:[#allocation5 + $0x11] sm:$0xff] }
 0x3cf   :  { %v6402_v46 = vunpack.i.l.bf16 %v6401_v4  ;;  %v6406_v0 = vpop.permute.xlu1 %6405  ;;  %3132 = vmatprep.mubr.f32.mxu0 %v2949_v51  ;;  %v2919_v61 = vsel %vm95_vm11, %v8646_v14, %v6397_v37  ;;  %v6403_v38 = vunpack.i.h.bf16 %v6401_v4  ;;  %v6604_v6 = vpack.i.bf16 %v8886_v9, %v8871_v21  ;;  %v3518_v29 = vld [vmem:[#allocation5 + $0x80] sm:$0xff]  ;;  %v2407_v4 = vld [vmem:[#allocation4 + $0x71] sm:$0xff] }
 0x3d0   :  { %6600 = vrot.lane.b32.xlu0 %v6599_v43, %s6847_s28  ;;  %2336 = vst.msk [vmem:[#allocation4 + $0x121] sm:$0xff] %vm95_vm11, %v2319_v30  ;;  %v6407_v52 = vunpack.i.l.bf16 %v6406_v0  ;;  %6585 = vrot.lane.b32.xlu1 %v6599_v43, %s6845_s25  ;;  %v2902_v14 = vsel %vm1858_vm14, %v2886_v49, %v6393_v22  ;;  %v6408_v36 = vunpack.i.h.bf16 %v6406_v0  ;;  %v2871_v55 = vsel %vm95_vm11, %v2342_v13, %v6398_v7  ;;  %v3487_v26 = vld [vmem:[#allocation5 + $0xa1] sm:$0xff] }
 0x3d1   :  { %3133 = vmatmul.mubr.f32.gmra.mrb[44].mxu0 %v2901_v17  ;;  %v2935_v33 = vsel %vm1841_vm13, %v2919_v61, %v6402_v46  ;;  %v6609_v39 = vpack.i.bf16 %v3502_v8, %v2478_v47  ;;  %v2887_v27 = vsel %vm1841_vm13, %v2871_v55, %v6403_v38  ;;  %v6263_v60 = vunpack.i.h.bf16 %v8735_v32  ;;  %v2343_v22 = vld [vmem:[#allocation4 + $0x60] sm:$0xff] }
 0x3d2   :  { %3137 = vmatprep.mubr.f32.mxu0 %v2950_v15  ;;  %v6411_v5 = vpop.permute.xlu0 %6410  ;;  %v8893_v19 = vld [vmem:[#allocation4 + $0x112] sm:$0xff]  ;;  %v2951_v44 = vsel %vm1858_vm14, %v2935_v33, %v6407_v52  ;;  %v2903_v2 = vsel %vm1858_vm14, %v2887_v27, %v6408_v36  ;;  %v6268_v24 = vunpack.i.h.bf16 %v8740_v3  ;;  %v2408_v46 = vld [vmem:[#allocation4 + $0x81] sm:$0xff] }
 0x3d3   :  { %v8895_v1 = vpop.permute.xlu1 %6425  ;;  %5706 = vmatmul.mubr.msk.f32.gmra.mrb[38].mxu1 %vm95_vm11, %v8893_v19  ;;  %v8907_v62 = vld [vmem:[#allocation4 + $0x110] sm:$0xff]  ;;  %v6412_v50 = vunpack.i.l.bf16 %v6411_v5  ;;  %v6413_v45 = vunpack.i.h.bf16 %v6411_v5  ;;  %v8931_v15 = vld [vmem:[#allocation5 + $0x81] sm:$0xff] }
 0x3d4   :  { %6605 = vrot.lane.b32.xlu0 %v6604_v6, %s6846_s27  ;;  %6590 = vrot.lane.b32.xlu1 %v6604_v6, %s6847_s28  ;;  %v6629_v47 = vpack.i.bf16 %v3518_v29, %v8907_v62  ;;  %v8921_v43 = vld [vmem:[#allocation4 + $0x111] sm:$0xff]  ;;  %v6427_v16 = vunpack.i.l.bf16 %v8895_v1  ;;  %v6428_v51 = vunpack.i.h.bf16 %v8895_v1  ;;  %v3463_v38 = vld [vmem:[#allocation5] sm:$0xff] }
 0x3d5   :  { %3138 = vmatmul.mubr.f32.gmra.mrb[46].mxu0 %v2902_v14  ;;  %v2920_v54 = vsel %vm95_vm11, %v2407_v4, %v6412_v50  ;;  %v6634_v0 = vpack.i.bf16 %v3487_v26, %v8921_v43  ;;  %v2872_v49 = vsel %vm95_vm11, %v2343_v22, %v6413_v45  ;;  %v6619_v61 = vpack.i.bf16 %v8931_v15, %v8921_v43  ;;  %v8949_v27 = vld [vmem:[#allocation5 + $0x82] sm:$0xff]  ;;  %v2344_v50 = vld [vmem:[#allocation4 + $0x70] sm:$0xff] }
 0x3d6   :  { %3142 = vmatprep.mubr.f32.mxu0 %v2951_v44  ;;  %v8905_v11 = vpop.permute.xlu0 %6415  ;;  %v2936_v1 = vsel %vm1841_vm13, %v2920_v54, %v6427_v16  ;;  %v2888_v32 = vsel %vm1841_vm13, %v2872_v49, %v6428_v51  ;;  %v6267_v44 = vunpack.i.l.bf16 %v8740_v3  ;;  %v3567_v45 = vld [vmem:[#allocation5 + $0x90] sm:$0xff] }
 0x3d7   :  { %v6436_v58 = vpop.permute.xlu1 %6435  ;;  %v8909_v53 = vld [vmem:[#allocation4 + $0x122] sm:$0xff]  ;;  %v6418_v7 = vunpack.i.h.bf16 %v8905_v11  ;;  %v6417_v6 = vunpack.i.l.bf16 %v8905_v11  ;;  %v8965_v26 = vld [vmem:[#allocation5 + $0xf0] sm:$0xff] }
 0x3d8   :  { %6610 = vrot.lane.b32.xlu0 %v6609_v39, %s6845_s25  ;;  %v6438_v20 = vunpack.i.h.bf16 %v6436_v58  ;;  %5708 = vmatprep.mubr.msk.f32.mxu1 %vm95_vm11, %v8909_v53  ;;  %v6437_v37 = vunpack.i.l.bf16 %v6436_v58  ;;  %v6624_v58 = vpack.i.bf16 %v8949_v27, %v8893_v19  ;;  %v8968_v16 = vld [vmem:[#allocation4 + $0x121] sm:$0xff]  ;;  %v8971_v4 = vld [vmem:[#allocation5 + $0xd2] sm:$0xff] }
 0x3d9   :  { %6595 = vrot.lane.b32.xlu1 %v6609_v39, %s6846_s27  ;;  %3143 = vmatmul.mubr.f32.gmra.mrb[48].mxu0 %v2903_v2  ;;  %v6639_v39 = vpack.i.bf16 %v3503_v31, %v8893_v19  ;;  %v3992_v11 = vsel %vm95_vm11, %v3463_v38, %v6418_v7  ;;  %v8960_v19 = vld [vmem:[#allocation5 + $0xb0] sm:$0xff]  ;;  %v6669_v51 = vpack.i.bf16 %v8971_v4, %v8965_v26  ;;  %v8989_v7 = vld [vmem:[#allocation5 + $0x101] sm:$0xff] }
 0x3da   :  { %5709 = vmatmul.mubr.msk.f32.gmra.mrb[40].mxu1 %vm95_vm11, %v2481_v42  ;;  %v6421_v40 = vpop.permute.xlu0 %6420  ;;  %v4040_v10 = vsel %vm95_vm11, %v3527_v48, %v6438_v20  ;;  %v2921_v41 = vsel %vm95_vm11, %v2408_v46, %v6437_v37  ;;  %v2400_v20 = vld [vmem:[#allocation4 + $0x120] sm:$0xff]  ;;  %v8978_v22 = vld [vmem:[#allocation5 + $0xf2] sm:$0xff]  ;;  %v6689_v31 = vpack.i.bf16 %v8965_v26, %v8989_v7 }
 0x3db   :  { %v4056_v30 = vsel %vm1841_vm13, %v4040_v10, %v6263_v60  ;;  %v6423_v14 = vunpack.i.h.bf16 %v6421_v40  ;;  %v6422_v13 = vunpack.i.l.bf16 %v6421_v40  ;;  %v2937_v36 = vsel %vm1841_vm13, %v2921_v41, %v6262_v59  ;;  %v3551_v41 = vld [vmem:[#allocation5 + $0xb2] sm:$0xff] }
 0x3dc   :  { %6630 = vrot.lane.b32.xlu0 %v6629_v47, %s6847_s28  ;;  %v4072_v17 = vsel %vm1858_vm14, %v4056_v30, %v6268_v24  ;;  %v2953_v3 = vsel %vm1858_vm14, %v2937_v36, %v6267_v44  ;;  %v2873_v60 = vsel %vm95_vm11, %v2344_v50, %v6417_v6  ;;  %v6664_v40 = vpack.i.bf16 %v8960_v19, %v2400_v20  ;;  %v3583_v30 = vld [vmem:[#allocation5 + $0x91] sm:$0xff] }
 0x3dd   :  { %6615 = vrot.lane.b32.xlu1 %v6629_v47, %s6845_s25  ;;  %4243 = vmatprep.mubr.f32.mxu1 %v4072_v17  ;;  %v4008_v37 = vsel %vm1841_vm13, %v3992_v11, %v6423_v14  ;;  %v2889_v47 = vsel %vm1841_vm13, %v2873_v60, %v6422_v13  ;;  %v6644_v10 = vpack.i.bf16 %v3567_v45, %v2400_v20  ;;  %v9005_v6 = vld [vmem:[#allocation5 + $0xf1] sm:$0xff] }
 0x3de   :  { %v6431_v52 = vpop.permute.xlu0 %6430  ;;  %v6649_v54 = vpack.i.bf16 %v3583_v30, %v8968_v16  ;;  %v6654_v59 = vpack.i.bf16 %v3551_v41, %v8909_v53  ;;  %v9002_v53 = vld [vmem:[#allocation5 + $0x110] sm:$0xff]  ;;  %v6273_v30 = vunpack.i.h.bf16 %v8738_v23  ;;  %v6278_v41 = vunpack.i.h.bf16 %v8745_v35 }
 0x3df   :  { %v6433_v33 = vunpack.i.h.bf16 %v6431_v52  ;;  %v6432_v5 = vunpack.i.l.bf16 %v6431_v52  ;;  %v21_v52 = vstv %s9703_s7  ;;  %v9016_v13 = vld [vmem:[#allocation5 + $0x112] sm:$0xff] }
 0x3e0   :  { %6635 = vrot.lane.b32.xlu0 %v6634_v0, %s6846_s27  ;;  %v8984_v0 = vld [vmem:[#allocation5 + $0xe1] sm:$0xff]  ;;  %22 = vst [vmem:[#allocation7] sm:$0x1] %v21_v52 }
 0x3e1   :  { %6620 = vrot.lane.b32.xlu1 %v6619_v61, %s6847_s28  ;;  %v2952_v8 = vsel %vm1858_vm14, %v2936_v1, %v6432_v5  ;;  %v2904_v55 = vsel %vm1858_vm14, %v2888_v32, %v6433_v33  ;;  %v6679_v49 = vpack.i.bf16 %v8984_v0, %v8978_v22  ;;  %v8995_v61 = vld [vmem:[#allocation5 + $0xe2] sm:$0xff]  ;;  %v6699_v5 = vpack.i.bf16 %v8978_v22, %v9002_v53 }
 0x3e2   :  { %v6441_v42 = vpop.permute.xlu0 %6440  ;;  %3147 = vmatprep.mubr.f32.mxu0 %v2952_v8  ;;  %v6659_v38 = vpack.i.bf16 %v8763_v25, %v8995_v61  ;;  %v9012_v1 = vld [vmem:[#allocation5 + $0xe0] sm:$0xff]  ;;  %v6709_v32 = vpack.i.bf16 %v8989_v7, %v9016_v13 }
 0x3e3   :  { %v6443_v2 = vunpack.i.h.bf16 %v6441_v42  ;;  %v6442_v29 = vunpack.i.l.bf16 %v6441_v42  ;;  %3148 = vmatmul.mubr.f32.gmra.mrb[50].mxu0 %v2904_v55  ;;  %v6674_v14 = vpack.i.bf16 %v9012_v1, %v9005_v6  ;;  %v9019_v25 = vld [vmem:[#allocation5 + $0x100] sm:$0xff]  ;;  %v3575_v42 = vld [vmem:[#allocation5 + $0x130] sm:$0xff] }
 0x3e4   :  { %6640 = vrot.lane.b32.xlu0 %v6639_v39, %s6845_s25  ;;  %3152 = vmatprep.mubr.f32.mxu0 %v2953_v3  ;;  %v6684_v44 = vpack.i.bf16 %v8995_v61, %v9019_v25  ;;  %v9028_v8 = vld [vmem:[#allocation5 + $0x121] sm:$0xff] }
 0x3e5   :  { %6625 = vrot.lane.b32.xlu1 %v6624_v58, %s6846_s27  ;;  %v4024_v48 = vsel %vm1858_vm14, %v4008_v37, %v6443_v2  ;;  %v2905_v24 = vsel %vm1858_vm14, %v2889_v47, %v6442_v29  ;;  %v9031_v55 = vld [vmem:[#allocation5 + $0x102] sm:$0xff]  ;;  %v6719_v39 = vpack.i.bf16 %v9002_v53, %v9028_v8  ;;  %v9039_v58 = vld [vmem:[#allocation5 + $0x111] sm:$0xff]  ;;  %v6729_v2 = vpack.i.bf16 %v9016_v13, %v3575_v42 }
 0x3e6   :  { %4244 = vmatmul.mubr.f32.vlgmr.msra.gmra.mrb[42].mxu1 %v4024_v48  ;;  %v6694_v11 = vpack.i.bf16 %v9005_v6, %v9031_v55  ;;  %v6704_v29 = vpack.i.bf16 %v9019_v25, %v9039_v58  ;;  %v3574_v3 = vld [vmem:[#allocation5 + $0x120] sm:$0xff]  ;;  %v6272_v48 = vunpack.i.l.bf16 %v8738_v23 }
 0x3e7   :  { %3153 = vmatmul.mubr.f32.gmra.mrb[52].mxu0 %v2905_v24 }
 0x3e8   :  { %6665 = vrot.lane.b32.xlu0 %v6664_v40, %s6847_s28 }
 0x3e9   :  { %6645 = vrot.lane.b32.xlu1 %v6644_v10, %s6845_s25  ;;  %v8975_v17 = vpop.f32.mrb[26].mxu1  ;;  %v6714_v10 = vpack.i.bf16 %v9031_v55, %v3574_v3 }
 0x3ea   :  { %v8980_v46 = vpop.f32.mrb[27].mxu1 }
 0x3ec   :  { %6670 = vrot.lane.b32.xlu0 %v6669_v51, %s6845_s25  ;;  %v6277_v51 = vunpack.i.l.bf16 %v8745_v35 }
 0x3ed   :  { %6650 = vrot.lane.b32.xlu1 %v6649_v54, %s6847_s28  ;;  %v9055_v54 = vld [vmem:[#allocation5 + $0x122] sm:$0xff] }
 0x3f0   :  { %6680 = vrot.lane.b32.xlu0 %v6679_v49, %s6846_s27  ;;  %v2345_v49 = vld [vmem:[#allocation4 + $0xa0] sm:$0xff] }
 0x3f1   :  { %6655 = vrot.lane.b32.xlu1 %v6654_v59, %s6846_s27  ;;  %v9007_v33 = vpop.permute.xlu0 %6450 }
 0x3f2   :  { %v6446_v50 = vpop.permute.xlu1 %6445  ;;  %v6453_v59 = vunpack.i.h.bf16 %v9007_v33  ;;  %v6452_v52 = vunpack.i.l.bf16 %v9007_v33  ;;  %v6724_v33 = vpack.i.bf16 %v9039_v58, %v9055_v54 }
 0x3f3   :  { %v6448_v37 = vunpack.i.h.bf16 %v6446_v50  ;;  %v6447_v47 = vunpack.i.l.bf16 %v6446_v50 }
 0x3f4   :  { %6690 = vrot.lane.b32.xlu0 %v6689_v31, %s6847_s28 }
 0x3f5   :  { %6660 = vrot.lane.b32.xlu1 %v6659_v38, %s6846_s27  ;;  %v9024_v36 = vpop.permute.xlu0 %6455 }
 0x3f8   :  { %6700 = vrot.lane.b32.xlu0 %v6699_v5, %s6845_s25  ;;  %v2409_v5 = vld [vmem:[#allocation4 + $0xb1] sm:$0xff] }
 0x3f9   :  { %6675 = vrot.lane.b32.xlu1 %v6674_v14, %s6847_s28  ;;  %v9041_v20 = vpop.permute.xlu0 %6460  ;;  %v3528_v14 = vld [vmem:[#allocation5 + $0x21] sm:$0xff] }
 0x3fc   :  { %6710 = vrot.lane.b32.xlu0 %v6709_v32, %s6846_s27 }
 0x3fd   :  { %6685 = vrot.lane.b32.xlu1 %v6684_v44, %s6845_s25 }
 0x400   :  { %6720 = vrot.lane.b32.xlu0 %v6719_v39, %s6847_s28  ;;  %v2922_v39 = vsel %vm95_vm11, %v2409_v5, %v6447_v47 }
 0x401   :  { %6695 = vrot.lane.b32.xlu1 %v6694_v11, %s6846_s27  ;;  %v4041_v11 = vsel %vm95_vm11, %v3528_v14, %v6448_v37 }
 0x404   :  { %6730 = vrot.lane.b32.xlu0 %v6729_v2, %s6845_s25  ;;  %v2874_v2 = vsel %vm95_vm11, %v2345_v49, %v6272_v48 }
 0x405   :  { %6705 = vrot.lane.b32.xlu1 %v6704_v29, %s6847_s28  ;;  %v9049_v60 = vpop.permute.xlu0 %6480  ;;  %v6466_v45 = vpop.permute.xlu1 %6465  ;;  %v3464_v29 = vld [vmem:[#allocation5 + $0x10] sm:$0xff]  ;;  %v2890_v47 = vsel %vm1841_vm13, %v2874_v2, %v6277_v51  ;;  %v2410_v2 = vld [vmem:[#allocation4 + $0xc1] sm:$0xff] }
 0x406   :  { %v6468_v24 = vunpack.i.h.bf16 %v6466_v45  ;;  %v6467_v40 = vunpack.i.l.bf16 %v6466_v45  ;;  %v3993_v37 = vsel %vm95_vm11, %v3464_v29, %v6273_v30  ;;  %v3529_v29 = vld [vmem:[#allocation5 + $0x31] sm:$0xff] }
 0x408   :  { %v9063_v32 = vpop.f32.mrb[28].mxu1  ;;  %v2938_v42 = vsel %vm1841_vm13, %v2922_v39, %v6467_v40  ;;  %v4057_v50 = vsel %vm1841_vm13, %v4041_v11, %v6468_v24  ;;  %v2906_v40 = vsel %vm1858_vm14, %v2890_v47, %v6452_v52  ;;  %v4009_v24 = vsel %vm1841_vm13, %v3993_v37, %v6278_v41  ;;  %v2346_v37 = vld [vmem:[#allocation4 + $0xb0] sm:$0xff] }
 0x409   :  { %6715 = vrot.lane.b32.xlu1 %v6714_v10, %s6845_s25  ;;  %v9061_v31 = vpop.permute.xlu0 %6485  ;;  %v6471_v38 = vpop.permute.xlu1 %6470  ;;  %v4025_v48 = vsel %vm1858_vm14, %v4009_v24, %v6453_v59  ;;  %v6457_v39 = vunpack.i.l.bf16 %v9024_v36  ;;  %v6463_v41 = vunpack.i.h.bf16 %v9041_v20  ;;  %v6483_v59 = vunpack.i.h.bf16 %v9049_v60 }
 0x40a   :  { %v6473_v23 = vunpack.i.h.bf16 %v6471_v38  ;;  %v6472_v44 = vunpack.i.l.bf16 %v6471_v38  ;;  %v9067_v35 = vpop.f32.mrb[29].mxu1  ;;  %v3591_v38 = vld [vmem:[#allocation5 + $0x131] sm:$0xff] }
 0x40b   :  { %v6734_v14 = vpack.i.bf16 %v3574_v3, %v3591_v38  ;;  %v3465_v38 = vld [vmem:[#allocation5 + $0x20] sm:$0xff] }
 0x40c   :  { %v2954_v45 = vsel %vm1858_vm14, %v2938_v42, %v6472_v44  ;;  %v4073_v10 = vsel %vm1858_vm14, %v4057_v50, %v6473_v23  ;;  %v6458_v44 = vunpack.i.h.bf16 %v9024_v36  ;;  %v6482_v42 = vunpack.i.l.bf16 %v9049_v60 }
 0x40d   :  { %6725 = vrot.lane.b32.xlu1 %v6724_v33, %s6846_s27  ;;  %v6476_v5 = vpop.permute.xlu1 %6475  ;;  %3157 = vmatprep.mubr.f32.mxu0 %v2954_v45  ;;  %v9082_v49 = vpop.permute.xlu0 %6490  ;;  %v6462_v33 = vunpack.i.l.bf16 %v9041_v20 }
 0x40e   :  { %4248 = vmatprep.mubr.f32.mxu1 %v4073_v10  ;;  %3158 = vmatmul.mubr.f32.gmra.mrb[54].mxu0 %v2906_v40  ;;  %v6478_v51 = vunpack.i.h.bf16 %v6476_v5  ;;  %v6477_v23 = vunpack.i.l.bf16 %v6476_v5  ;;  %v2875_v40 = vsel %vm95_vm11, %v2346_v37, %v6457_v39  ;;  %v3994_v60 = vsel %vm95_vm11, %v3465_v38, %v6458_v44 }
 0x40f   :  { %4249 = vmatmul.mubr.f32.gmra.mrb[44].mxu1 %v4025_v48 }
 0x410   :  { %v2923_v47 = vsel %vm95_vm11, %v2410_v2, %v6477_v23  ;;  %v4042_v36 = vsel %vm95_vm11, %v3529_v29, %v6478_v51  ;;  %v6487_v29 = vunpack.i.l.bf16 %v9061_v31 }
 0x411   :  { %6735 = vrot.lane.b32.xlu1 %v6734_v14, %s6847_s28  ;;  %v6496_v30 = vpop.permute.xlu1 %6495  ;;  %v9091_v3 = vpop.permute.xlu0 %6510  ;;  %v2891_v14 = vsel %vm1841_vm13, %v2875_v40, %v6462_v33  ;;  %v3530_v40 = vld [vmem:[#allocation5 + $0x41] sm:$0xff] }
 0x412   :  { %v6498_v52 = vunpack.i.h.bf16 %v6496_v30  ;;  %v6497_v11 = vunpack.i.l.bf16 %v6496_v30  ;;  %v4010_v30 = vsel %vm1841_vm13, %v3994_v60, %v6463_v41  ;;  %v2907_v51 = vsel %vm1858_vm14, %v2891_v14, %v6482_v42 }
 0x413   :  { %v4026_v23 = vsel %vm1858_vm14, %v4010_v30, %v6483_v59  ;;  %v6488_v41 = vunpack.i.h.bf16 %v9061_v31  ;;  %v6493_v59 = vunpack.i.h.bf16 %v9082_v49  ;;  %v6512_v37 = vunpack.i.l.bf16 %v9091_v3  ;;  %v3466_v30 = vld [vmem:[#allocation5 + $0x30] sm:$0xff] }
 0x414   :  { %v2939_v5 = vsel %vm1841_vm13, %v2923_v47, %v6497_v11  ;;  %v4058_v20 = vsel %vm1841_vm13, %v4042_v36, %v6498_v52  ;;  %v6513_v36 = vunpack.i.h.bf16 %v9091_v3 }
 0x415   :  { %v6501_v50 = vpop.permute.xlu1 %6500  ;;  %v9105_v52 = vpop.permute.xlu0 %6515 }
 0x416   :  { %v6503_v45 = vunpack.i.h.bf16 %v6501_v50  ;;  %v6502_v10 = vunpack.i.l.bf16 %v6501_v50 }
 0x418   :  { %v2955_v24 = vsel %vm1858_vm14, %v2939_v5, %v6502_v10  ;;  %v4074_v48 = vsel %vm1858_vm14, %v4058_v20, %v6503_v45  ;;  %v6492_v10 = vunpack.i.l.bf16 %v9082_v49  ;;  %v2411_v20 = vld [vmem:[#allocation4 + $0xd1] sm:$0xff]  ;;  %v2347_v49 = vld [vmem:[#allocation4 + $0xc0] sm:$0xff] }
 0x419   :  { %3162 = vmatprep.mubr.f32.mxu0 %v2955_v24  ;;  %4253 = vmatprep.mubr.f32.mxu1 %v4074_v48  ;;  %v9107_v39 = vpop.permute.xlu0 %6520  ;;  %v6506_v44 = vpop.permute.xlu1 %6505  ;;  %v2876_v3 = vsel %vm95_vm11, %v2347_v49, %v6487_v29 }
 0x41a   :  { %3163 = vmatmul.mubr.f32.gmra.mrb[56].mxu0 %v2907_v51  ;;  %4254 = vmatmul.mubr.f32.gmra.mrb[46].mxu1 %v4026_v23  ;;  %v6508_v2 = vunpack.i.h.bf16 %v6506_v44  ;;  %v6507_v33 = vunpack.i.l.bf16 %v6506_v44  ;;  %v3995_v44 = vsel %vm95_vm11, %v3466_v30, %v6488_v41 }
 0x41c   :  { %v2924_v48 = vsel %vm95_vm11, %v2411_v20, %v6507_v33  ;;  %v4043_v14 = vsel %vm95_vm11, %v3530_v40, %v6508_v2  ;;  %v2892_v33 = vsel %vm1841_vm13, %v2876_v3, %v6492_v10  ;;  %v4011_v2 = vsel %vm1841_vm13, %v3995_v44, %v6493_v59  ;;  %v3531_v3 = vld [vmem:[#allocation5 + $0x51] sm:$0xff] }
 0x41d   :  { %v6518_v59 = vunpack.i.h.bf16 %v9105_v52 }
 0x425   :  { %v9109_v11 = vpop.permute.xlu0 %6540  ;;  %v6526_v50 = vpop.permute.xlu1 %6525 }
 0x426   :  { %v6528_v45 = vunpack.i.h.bf16 %v6526_v50  ;;  %v6527_v42 = vunpack.i.l.bf16 %v6526_v50  ;;  %v6543_v49 = vunpack.i.h.bf16 %v9109_v11  ;;  %v6542_v30 = vunpack.i.l.bf16 %v9109_v11 }
 0x428   :  { %v9119_v38 = vpop.f32.mrb[30].mxu1  ;;  %v2940_v51 = vsel %vm1841_vm13, %v2924_v48, %v6527_v42  ;;  %v4059_v23 = vsel %vm1841_vm13, %v4043_v14, %v6528_v45  ;;  %v2908_v42 = vsel %vm1858_vm14, %v2892_v33, %v6512_v37  ;;  %v4027_v45 = vsel %vm1858_vm14, %v4011_v2, %v6513_v36 }
 0x429   :  { %v9115_v47 = vpop.permute.xlu0 %6545  ;;  %9736 = vst [vmem:[#allocation9_spill] sm:$0xff] %v9119_v38  ;;  %v6531_v5 = vpop.permute.xlu1 %6530  ;;  %v6517_v48 = vunpack.i.l.bf16 %v9105_v52  ;;  %v6523_v37 = vunpack.i.h.bf16 %v9107_v39  ;;  %v6522_v36 = vunpack.i.l.bf16 %v9107_v39  ;;  %v2348_v52 = vld [vmem:[#allocation4 + $0xd0] sm:$0xff] }
 0x42a   :  { %v6533_v60 = vunpack.i.h.bf16 %v6531_v5  ;;  %v6532_v24 = vunpack.i.l.bf16 %v6531_v5  ;;  %v9121_v31 = vpop.f32.mrb[31].mxu1 }
 0x42b   :  { %9737 = vst [vmem:[#allocation10_spill] sm:$0xff] %v9121_v31 }
 0x42c   :  { %v2956_v5 = vsel %vm1858_vm14, %v2940_v51, %v6532_v24  ;;  %v4075_v38 = vsel %vm1858_vm14, %v4059_v23, %v6533_v60  ;;  %v2412_v23 = vld [vmem:[#allocation4 + $0xe1] sm:$0xff] }
 0x42d   :  { %v9129_v50 = vpop.permute.xlu0 %6550  ;;  %v6536_v20 = vpop.permute.xlu1 %6535  ;;  %3167 = vmatprep.mubr.f32.mxu0 %v2956_v5  ;;  %4258 = vmatprep.mubr.f32.mxu1 %v4075_v38 }
 0x42e   :  { %3168 = vmatmul.mubr.f32.gmra.mrb[58].mxu0 %v2908_v42  ;;  %4259 = vmatmul.mubr.f32.gmra.mrb[48].mxu1 %v4027_v45  ;;  %v9137_v41 = vpop.f32.mrb[32].mxu1  ;;  %v6538_v24 = vunpack.i.h.bf16 %v6536_v20  ;;  %v6537_v10 = vunpack.i.l.bf16 %v6536_v20  ;;  %v3467_v20 = vld [vmem:[#allocation5 + $0x40] sm:$0xff] }
 0x42f   :  { %9738 = vst [vmem:[#allocation11_spill] sm:$0xff] %v9137_v41  ;;  %v9139_v29 = vpop.f32.mrb[33].mxu1  ;;  %v3996_v11 = vsel %vm95_vm11, %v3467_v20, %v6518_v59 }
 0x430   :  { %9739 = vst [vmem:[#allocation12_spill] sm:$0xff] %v9139_v29  ;;  %v2925_v33 = vsel %vm95_vm11, %v2412_v23, %v6537_v10  ;;  %v4044_v2 = vsel %vm95_vm11, %v3531_v3, %v6538_v24  ;;  %v4012_v24 = vsel %vm1841_vm13, %v3996_v11, %v6523_v37  ;;  %v6547_v37 = vunpack.i.l.bf16 %v9115_v47 }
 0x431   :  { %v9141_v40 = vpop.permute.xlu0 %6570  ;;  %v6556_v60 = vpop.permute.xlu1 %6555 }
 0x432   :  { %v6558_v38 = vunpack.i.h.bf16 %v6556_v60  ;;  %v6557_v14 = vunpack.i.l.bf16 %v6556_v60  ;;  %v2877_v60 = vsel %vm95_vm11, %v2348_v52, %v6517_v48  ;;  %v6573_v52 = vunpack.i.h.bf16 %v9141_v40 }
 0x433   :  { %v2893_v10 = vsel %vm1841_vm13, %v2877_v60, %v6522_v36  ;;  %v6548_v36 = vunpack.i.h.bf16 %v9115_v47  ;;  %v6572_v20 = vunpack.i.l.bf16 %v9141_v40  ;;  %v3532_v60 = vld [vmem:[#allocation5 + $0x61] sm:$0xff] }
 0x434   :  { %v2941_v45 = vsel %vm1841_vm13, %v2925_v33, %v6557_v14  ;;  %v4060_v39 = vsel %vm1841_vm13, %v4044_v2, %v6558_v38  ;;  %v2909_v23 = vsel %vm1858_vm14, %v2893_v10, %v6542_v30  ;;  %v4028_v14 = vsel %vm1858_vm14, %v4012_v24, %v6543_v49  ;;  %v2349_v24 = vld [vmem:[#allocation4 + $0xe0] sm:$0xff] }
 0x435   :  { %v6561_v51 = vpop.permute.xlu1 %6560  ;;  %v9151_v42 = vpop.permute.xlu0 %6575  ;;  %v6553_v30 = vunpack.i.h.bf16 %v9129_v50  ;;  %v6552_v49 = vunpack.i.l.bf16 %v9129_v50 }
 0x436   :  { %v6563_v44 = vunpack.i.h.bf16 %v6561_v51  ;;  %v6562_v5 = vunpack.i.l.bf16 %v6561_v51 }
 0x438   :  { %v2957_v41 = vsel %vm1858_vm14, %v2941_v45, %v6562_v5  ;;  %v4076_v51 = vsel %vm1858_vm14, %v4060_v39, %v6563_v44  ;;  %v2413_v39 = vld [vmem:[#allocation4 + $0xf1] sm:$0xff] }
 0x439   :  { %3172 = vmatprep.mubr.f32.mxu0 %v2957_v41  ;;  %4263 = vmatprep.mubr.f32.mxu1 %v4076_v51  ;;  %v9163_v38 = vpop.permute.xlu0 %6580  ;;  %v6566_v48 = vpop.permute.xlu1 %6565 }
 0x43a   :  { %3173 = vmatmul.mubr.f32.gmra.mrb[60].mxu0 %v2909_v23  ;;  %4264 = vmatmul.mubr.f32.gmra.mrb[50].mxu1 %v4028_v14  ;;  %v6568_v5 = vunpack.i.h.bf16 %v6566_v48  ;;  %v6567_v44 = vunpack.i.l.bf16 %v6566_v48  ;;  %v3468_v23 = vld [vmem:[#allocation5 + $0x50] sm:$0xff]  ;;  %v2878_v48 = vsel %vm95_vm11, %v2349_v24, %v6547_v37 }
 0x43c   :  { %v2926_v10 = vsel %vm95_vm11, %v2413_v39, %v6567_v44  ;;  %v4045_v47 = vsel %vm95_vm11, %v3532_v60, %v6568_v5  ;;  %v2894_v44 = vsel %vm1841_vm13, %v2878_v48, %v6552_v49  ;;  %v6577_v49 = vunpack.i.l.bf16 %v9151_v42 }
 0x442   :  { %v9165_v59 = vpop.permute.xlu0 %6600  ;;  %v6586_v3 = vpop.permute.xlu1 %6585 }
 0x443   :  { %v6588_v41 = vunpack.i.h.bf16 %v6586_v3  ;;  %v6587_v33 = vunpack.i.l.bf16 %v6586_v3  ;;  %v3997_v3 = vsel %vm95_vm11, %v3468_v23, %v6548_v36  ;;  %v6602_v24 = vunpack.i.l.bf16 %v9165_v59 }
 0x444   :  { %v4013_v5 = vsel %vm1841_vm13, %v3997_v3, %v6553_v30  ;;  %v2350_v3 = vld [vmem:[#allocation4 + $0xf0] sm:$0xff] }
 0x445   :  { %v2942_v14 = vsel %vm1841_vm13, %v2926_v10, %v6587_v33  ;;  %v4061_v50 = vsel %vm1841_vm13, %v4045_v47, %v6588_v41  ;;  %v2910_v33 = vsel %vm1858_vm14, %v2894_v44, %v6572_v20  ;;  %v4029_v41 = vsel %vm1858_vm14, %v4013_v5, %v6573_v52 }
 0x446   :  { %v9171_v2 = vpop.permute.xlu0 %6605  ;;  %v6591_v45 = vpop.permute.xlu1 %6590  ;;  %v6582_v47 = vunpack.i.l.bf16 %v9163_v38  ;;  %v6603_v52 = vunpack.i.h.bf16 %v9165_v59  ;;  %v2879_v5 = vsel %vm95_vm11, %v2350_v3, %v6577_v49  ;;  %v6292_v49 = vunpack.i.l.bf16 %v8757_v18 }
 0x447   :  { %v6593_v11 = vunpack.i.h.bf16 %v6591_v45  ;;  %v6592_v51 = vunpack.i.l.bf16 %v6591_v45 }
 0x449   :  { %v2958_v29 = vsel %vm1858_vm14, %v2942_v14, %v6592_v51  ;;  %v4077_v45 = vsel %vm1858_vm14, %v4061_v50, %v6593_v11  ;;  %v6578_v11 = vunpack.i.h.bf16 %v9151_v42 }
 0x44a   :  { %v9181_v40 = vpop.permute.xlu0 %6610  ;;  %3177 = vmatprep.mubr.f32.mxu0 %v2958_v29  ;;  %4268 = vmatprep.mubr.f32.mxu1 %v4077_v45  ;;  %v6583_v29 = vunpack.i.h.bf16 %v9163_v38  ;;  %v3469_v45 = vld [vmem:[#allocation5 + $0x60] sm:$0xff] }
 0x44b   :  { %v6596_v39 = vpop.permute.xlu1 %6595  ;;  %3178 = vmatmul.mubr.f32.gmra.mrb[62].mxu0 %v2910_v33  ;;  %4269 = vmatmul.mubr.f32.gmra.mrb[52].mxu1 %v4029_v41  ;;  %v6612_v3 = vunpack.i.l.bf16 %v9181_v40 }
 0x44c   :  { %v6598_v60 = vunpack.i.h.bf16 %v6596_v39  ;;  %v6597_v51 = vunpack.i.l.bf16 %v6596_v39  ;;  %v3998_v39 = vsel %vm95_vm11, %v3469_v45, %v6578_v11 }
 0x44e   :  { %v9189_v36 = vpop.permute.xlu0 %6630  ;;  %v2927_v48 = vsel %vm95_vm11, %v8871_v21, %v6597_v51  ;;  %v4046_v42 = vsel %vm95_vm11, %v8886_v9, %v6598_v60  ;;  %v2895_v21 = vsel %vm1841_vm13, %v2879_v5, %v6582_v47  ;;  %v4014_v9 = vsel %vm1841_vm13, %v3998_v39, %v6583_v29 }
 0x44f   :  { %v6616_v37 = vpop.permute.xlu1 %6615  ;;  %v2911_v60 = vsel %vm1858_vm14, %v2895_v21, %v6602_v24  ;;  %v4030_v51 = vsel %vm1858_vm14, %v4014_v9, %v6603_v52  ;;  %v6608_v29 = vunpack.i.h.bf16 %v9171_v2  ;;  %v6282_v24 = vunpack.i.l.bf16 %v8742_v28  ;;  %v2351_v9 = vld [vmem:[#allocation4 + $0x100] sm:$0xff] }
 0x450   :  { %v6618_v10 = vunpack.i.h.bf16 %v6616_v37  ;;  %v6617_v30 = vunpack.i.l.bf16 %v6616_v37  ;;  %v6288_v52 = vunpack.i.h.bf16 %v8749_v56  ;;  %v6633_v5 = vunpack.i.h.bf16 %v9189_v36 }
 0x451   :  { %v6632_v39 = vunpack.i.l.bf16 %v9189_v36 }
 0x452   :  { %v9195_v20 = vpop.permute.xlu0 %6635  ;;  %v2943_v44 = vsel %vm1841_vm13, %v2927_v48, %v6617_v30  ;;  %v4062_v38 = vsel %vm1841_vm13, %v4046_v42, %v6618_v10  ;;  %v6283_v30 = vunpack.i.h.bf16 %v8742_v28  ;;  %v6613_v42 = vunpack.i.h.bf16 %v9181_v40 }
 0x453   :  { %v6621_v23 = vpop.permute.xlu1 %6620 }
 0x454   :  { %v6623_v14 = vunpack.i.h.bf16 %v6621_v23  ;;  %v6622_v50 = vunpack.i.l.bf16 %v6621_v23 }
 0x456   :  { %v9207_v59 = vpop.permute.xlu0 %6640  ;;  %v2959_v33 = vsel %vm1858_vm14, %v2943_v44, %v6622_v50  ;;  %v4078_v41 = vsel %vm1858_vm14, %v4062_v38, %v6623_v14  ;;  %v6607_v14 = vunpack.i.l.bf16 %v9171_v2  ;;  %v3536_v44 = vld [vmem:[#allocation5 + $0xc1] sm:$0xff]  ;;  %v6302_v38 = vunpack.i.l.bf16 %v8753_v63 }
 0x457   :  { %v6626_v37 = vpop.permute.xlu1 %6625  ;;  %3182 = vmatprep.mubr.f32.mxu0 %v2959_v33  ;;  %4273 = vmatprep.mubr.f32.mxu1 %v4078_v41  ;;  %v4049_v33 = vsel %vm95_vm11, %v3536_v44, %v6292_v49 }
 0x458   :  { %3183 = vmatmul.mubr.f32.gmra.mrb[64].mxu0 %v2911_v60  ;;  %4274 = vmatmul.mubr.f32.gmra.mrb[54].mxu1 %v4030_v51  ;;  %v6628_v23 = vunpack.i.h.bf16 %v6626_v37  ;;  %v6627_v47 = vunpack.i.l.bf16 %v6626_v37  ;;  %v3470_v37 = vld [vmem:[#allocation5 + $0x70] sm:$0xff] }
 0x459   :  { %v3999_v36 = vsel %vm95_vm11, %v3470_v37, %v6608_v29  ;;  %v4065_v37 = vsel %vm1841_vm13, %v4049_v33, %v6302_v38  ;;  %v6308_v33 = vunpack.i.h.bf16 %v8769_v57 }
 0x45a   :  { %v9215_v11 = vpop.permute.xlu0 %6665  ;;  %v2928_v21 = vsel %vm95_vm11, %v8921_v43, %v6627_v47  ;;  %v4047_v40 = vsel %vm95_vm11, %v8931_v15, %v6628_v23  ;;  %v4015_v15 = vsel %vm1841_vm13, %v3999_v36, %v6613_v42  ;;  %v6638_v23 = vunpack.i.h.bf16 %v9195_v20  ;;  %v3471_v42 = vld [vmem:[#allocation5 + $0xa0] sm:$0xff] }
 0x45b   :  { %v6646_v10 = vpop.permute.xlu1 %6645  ;;  %v6637_v47 = vunpack.i.l.bf16 %v9195_v20  ;;  %v4031_v29 = vsel %vm1858_vm14, %v4015_v15, %v6633_v5  ;;  %v6293_v20 = vunpack.i.h.bf16 %v8757_v18  ;;  %v6307_v5 = vunpack.i.l.bf16 %v8769_v57 }
 0x45c   :  { %v6648_v50 = vunpack.i.h.bf16 %v6646_v10  ;;  %v6647_v48 = vunpack.i.l.bf16 %v6646_v10  ;;  %v2880_v10 = vsel %vm95_vm11, %v2351_v9, %v6607_v14 }
 0x45d   :  { %v2896_v43 = vsel %vm1841_vm13, %v2880_v10, %v6612_v3  ;;  %v6287_v3 = vunpack.i.l.bf16 %v8749_v56  ;;  %v2881_v18 = vsel %vm95_vm11, %v8907_v62, %v6637_v47  ;;  %v4081_v57 = vsel %vm1858_vm14, %v4065_v37, %v6307_v5 }
 0x45e   :  { %v9225_v45 = vpop.permute.xlu0 %6670  ;;  %v2944_v60 = vsel %vm1841_vm13, %v2928_v21, %v6647_v48  ;;  %v4063_v51 = vsel %vm1841_vm13, %v4047_v40, %v6648_v50  ;;  %v2912_v14 = vsel %vm1858_vm14, %v2896_v43, %v6632_v39  ;;  %v6643_v50 = vunpack.i.h.bf16 %v9207_v59  ;;  %v3535_v39 = vld [vmem:[#allocation5 + $0xb1] sm:$0xff] }
 0x45f   :  { %v6651_v2 = vpop.permute.xlu1 %6650  ;;  %v6668_v21 = vunpack.i.h.bf16 %v9215_v11  ;;  %v6667_v40 = vunpack.i.l.bf16 %v9215_v11  ;;  %v4000_v11 = vsel %vm95_vm11, %v3471_v42, %v6638_v23  ;;  %v6303_v43 = vunpack.i.h.bf16 %v8753_v63  ;;  %v3592_v23 = vld [vmem:[#allocation5 + $0x22] sm:$0xff] }
 0x460   :  { %v6653_v41 = vunpack.i.h.bf16 %v6651_v2  ;;  %v6652_v28 = vunpack.i.l.bf16 %v6651_v2  ;;  %v6642_v2 = vunpack.i.l.bf16 %v9207_v59  ;;  %v4016_v38 = vsel %vm1841_vm13, %v4000_v11, %v6643_v50  ;;  %v3593_v50 = vld [vmem:[#allocation5 + $0x32] sm:$0xff] }
 0x461   :  { %v4032_v62 = vsel %vm1858_vm14, %v4016_v38, %v6668_v21  ;;  %v6672_v21 = vunpack.i.l.bf16 %v9225_v45 }
 0x462   :  { %v9239_v31 = vpop.permute.xlu0 %6680  ;;  %v2960_v49 = vsel %vm1858_vm14, %v2944_v60, %v6652_v28  ;;  %v4079_v44 = vsel %vm1858_vm14, %v4063_v51, %v6653_v41 }
 0x463   :  { %v6656_v48 = vpop.permute.xlu1 %6655  ;;  %3187 = vmatprep.mubr.f32.mxu0 %v2960_v49  ;;  %4278 = vmatprep.mubr.f32.mxu1 %v4079_v44  ;;  %v2897_v49 = vsel %vm1841_vm13, %v2881_v18, %v6642_v2  ;;  %v4001_v44 = vsel %vm95_vm11, %v8960_v19, %v6293_v20  ;;  %v6682_v63 = vunpack.i.l.bf16 %v9239_v31  ;;  %v6683_v5 = vunpack.i.h.bf16 %v9239_v31  ;;  %v3596_v31 = vld [vmem:[#allocation5 + $0x62] sm:$0xff] }
 0x464   :  { %v6658_v41 = vunpack.i.h.bf16 %v6656_v48  ;;  %v6657_v28 = vunpack.i.l.bf16 %v6656_v48  ;;  %3188 = vmatmul.mubr.f32.gmra.mrb[66].mxu0 %v2912_v14  ;;  %4279 = vmatmul.mubr.f32.gmra.mrb[56].mxu1 %v4031_v29  ;;  %v4017_v48 = vsel %vm1841_vm13, %v4001_v44, %v6303_v43  ;;  %v6673_v18 = vunpack.i.h.bf16 %v9225_v45  ;;  %v3597_v43 = vld [vmem:[#allocation5 + $0x72] sm:$0xff] }
 0x465   :  { %v4033_v19 = vsel %vm1858_vm14, %v4017_v48, %v6308_v33 }
 0x466   :  { %v2929_v9 = vsel %vm95_vm11, %v8968_v16, %v6657_v28  ;;  %v4048_v59 = vsel %vm95_vm11, %v3535_v39, %v6658_v41  ;;  %v9265_v10 = vpop.permute.xlu0 %6690  ;;  %v9289_v28 = vld [vmem:[#allocation7] ss:$0 sm:$0xff] }
 0x467   :  { %v6661_v60 = vpop.permute.xlu1 %6660  ;;  %v2945_v51 = vsel %vm1841_vm13, %v2929_v9, %v6282_v24  ;;  %v4064_v56 = vsel %vm1841_vm13, %v4048_v59, %v6283_v30  ;;  %v2913_v30 = vsel %vm1858_vm14, %v2897_v49, %v6667_v40  ;;  %v3474_v59 = vld [vmem:[#allocation5 + $0xd0] sm:$0xff]  ;;  %v6692_v38 = vunpack.i.l.bf16 %v9265_v10 }
 0x468   :  { %v2961_v36 = vsel %vm1858_vm14, %v2945_v51, %v6287_v3  ;;  %v4080_v16 = vsel %vm1858_vm14, %v4064_v56, %v6288_v52  ;;  %v9273_v24 = vpop.f32.mrb[34].mxu1  ;;  %v6662_v52 = vunpack.i.l.bf16 %v6661_v60  ;;  %v6663_v14 = vunpack.i.h.bf16 %v6661_v60  ;;  %v3594_v3 = vld [vmem:[#allocation5 + $0x42] sm:$0xff]  ;;  %v3595_v51 = vld [vmem:[#allocation5 + $0x52] sm:$0xff] }
 0x469   :  { %3192 = vmatprep.mubr.f32.mxu0 %v2961_v36  ;;  %4283 = vmatprep.mubr.f32.mxu1 %v4080_v16  ;;  %v9279_v15 = vpop.f32.mrb[35].mxu1  ;;  %v4052_v36 = vsel %vm95_vm11, %v9005_v6, %v6682_v63  ;;  %v4004_v6 = vsel %vm95_vm11, %v9012_v1, %v6683_v5  ;;  %v3599_v1 = vld [vmem:[#allocation5 + $0x92] sm:$0xff] }
 0x46a   :  { %3193 = vmatmul.mubr.f32.gmra.mrb[68].mxu0 %v2913_v30  ;;  %4284 = vmatmul.mubr.f32.gmra.mrb[58].mxu1 %v4032_v62  ;;  %v9286_v2 = vpop.permute.xlu0 %6700  ;;  %v4051_v20 = vsel %vm95_vm11, %v8984_v0, %v6662_v52  ;;  %v4003_v0 = vsel %vm95_vm11, %v3474_v59, %v6663_v14 }
 0x46b   :  { %v6676_v47 = vpop.permute.xlu1 %6675  ;;  %4288 = vmatprep.mubr.f32.mxu1 %v4081_v57  ;;  %5719 = vmatprep.mubr.msk.f32.mxu0 %vm95_vm11, %v3592_v23  ;;  %v4067_v56 = vsel %vm1841_vm13, %v4051_v20, %v6672_v21 }
 0x46c   :  { %v5377_v29 = vpop.f32.mrb[38].mxu0  ;;  %v6677_v41 = vunpack.i.l.bf16 %v6676_v47  ;;  %v6678_v37 = vunpack.i.h.bf16 %v6676_v47  ;;  %v6702_v47 = vunpack.i.l.bf16 %v9286_v2 }
 0x46d   :  { %v5378_v42 = vpop.f32.mrb[39].mxu0 }
 0x46e   :  { %4289 = vmatmul.mubr.f32.gmra.mrb[60].mxu1 %v4033_v19  ;;  %5720 = vmatmul.mubr.msk.f32.vlgmr.msra.gmra.mrb[70].mxu0 %vm95_vm11, %v3593_v50  ;;  %v5379_v40 = vadd.f32 %v5378_v42, %v5377_v29  ;;  %v6711_v45 = vpop.permute.xlu0 %6710 }
 0x46f   :  { %v6686_v39 = vpop.permute.xlu1 %6685  ;;  %4293 = vmatprep.mubr.f32.mxu1 %v8774_v34  ;;  %5722 = vmatprep.mubr.msk.f32.mxu0 %vm95_vm11, %v3594_v3  ;;  %v4083_v34 = vsel %vm1858_vm14, %v4067_v56, %v6677_v41  ;;  %v6713_v14 = vunpack.i.h.bf16 %v6711_v45  ;;  %v6712_v29 = vunpack.i.l.bf16 %v6711_v45  ;;  %v3600_v3 = vld [vmem:[#allocation5 + $0xc2] sm:$0xff] }
 0x470   :  { %v6687_v9 = vunpack.i.l.bf16 %v6686_v39  ;;  %v3120_v60 = vadd.f32 %v5379_v40, %v9289_v28  ;;  %v6688_v11 = vunpack.i.h.bf16 %v6686_v39 }
 0x472   :  { %4294 = vmatmul.mubr.f32.gmra.mrb[62].mxu1 %v8777_v12  ;;  %5723 = vmatmul.mubr.msk.f32.gmra.mrb[72].mxu0 %vm95_vm11, %v3595_v51  ;;  %v4068_v49 = vsel %vm1841_vm13, %v4052_v36, %v6687_v9  ;;  %v4019_v12 = vsel %vm1841_vm13, %v4003_v0, %v6673_v18  ;;  %v9311_v30 = vadd.f32 %v8980_v46, %v3120_v60  ;;  %v6693_v46 = vunpack.i.h.bf16 %v9265_v10  ;;  %v6721_v42 = vpop.permute.xlu0 %6720 }
 0x473   :  { %v6696_v16 = vpop.permute.xlu1 %6695  ;;  %4298 = vmatprep.mubr.f32.mxu1 %v4083_v34  ;;  %5725 = vmatprep.mubr.msk.f32.mxu0 %vm95_vm11, %v3596_v31  ;;  %v4035_v44 = vsel %vm1858_vm14, %v4019_v12, %v6678_v37  ;;  %v4084_v52 = vsel %vm1858_vm14, %v4068_v49, %v6692_v38  ;;  %v4020_v57 = vsel %vm1841_vm13, %v4004_v6, %v6688_v11  ;;  %v6703_v10 = vunpack.i.h.bf16 %v9286_v2 }
 0x474   :  { %v6697_v33 = vunpack.i.l.bf16 %v6696_v16  ;;  %v6698_v62 = vunpack.i.h.bf16 %v6696_v16  ;;  %v4036_v63 = vsel %vm1858_vm14, %v4020_v57, %v6693_v46  ;;  %v6722_v5 = vunpack.i.l.bf16 %v6721_v42 }
 0x475   :  { %v4054_v2 = vsel %vm95_vm11, %v9039_v58, %v6712_v29  ;;  %v4006_v9 = vsel %vm95_vm11, %v9019_v25, %v6713_v14  ;;  %v6723_v60 = vunpack.i.h.bf16 %v6721_v42  ;;  %v9740_v42 = vld [vmem:[#allocation10_spill] sm:$0xff] }
 0x476   :  { %4299 = vmatmul.mubr.f32.gmra.mrb[64].mxu1 %v4035_v44  ;;  %5726 = vmatmul.mubr.msk.f32.gmra.mrb[74].mxu0 %vm95_vm11, %v3597_v43  ;;  %v4053_v23 = vsel %vm95_vm11, %v8989_v7, %v6697_v33  ;;  %v4005_v7 = vsel %vm95_vm11, %v8965_v26, %v6698_v62  ;;  %v6731_v0 = vpop.permute.xlu0 %6730 }
 0x477   :  { %v6706_v48 = vpop.permute.xlu1 %6705  ;;  %4303 = vmatprep.mubr.f32.mxu1 %v4084_v52  ;;  %5728 = vmatprep.mubr.msk.f32.mxu0 %vm95_vm11, %v8949_v27  ;;  %v4069_v41 = vsel %vm1841_vm13, %v4053_v23, %v6702_v47  ;;  %v4021_v39 = vsel %vm1841_vm13, %v4005_v7, %v6703_v10  ;;  %v6733_v34 = vunpack.i.h.bf16 %v6731_v0 }
 0x478   :  { %v6707_v19 = vunpack.i.l.bf16 %v6706_v48  ;;  %v6708_v50 = vunpack.i.h.bf16 %v6706_v48 }
 0x47a   :  { %4304 = vmatmul.mubr.f32.gmra.mrb[66].mxu1 %v4036_v63  ;;  %5729 = vmatmul.mubr.msk.f32.gmra.mrb[76].mxu0 %vm95_vm11, %v3599_v1  ;;  %v4085_v27 = vsel %vm1858_vm14, %v4069_v41, %v6707_v19  ;;  %v4037_v26 = vsel %vm1858_vm14, %v4021_v39, %v6708_v50 }
 0x47b   :  { %v6716_v20 = vpop.permute.xlu1 %6715  ;;  %4308 = vmatprep.mubr.f32.mxu1 %v4085_v27  ;;  %5731 = vmatprep.mubr.msk.f32.mxu0 %vm95_vm11, %v3600_v3 }
 0x47c   :  { %v6718_v21 = vunpack.i.h.bf16 %v6716_v20  ;;  %v6717_v40 = vunpack.i.l.bf16 %v6716_v20 }
 0x47e   :  { %4309 = vmatmul.mubr.f32.gmra.mrb[68].mxu1 %v4037_v26  ;;  %5732 = vmatmul.mubr.msk.f32.gmra.mrb[78].mxu0 %vm95_vm11, %v8971_v4  ;;  %v4070_v59 = vsel %vm1841_vm13, %v4054_v2, %v6717_v40  ;;  %v4022_v37 = vsel %vm1841_vm13, %v4006_v9, %v6718_v21  ;;  %v9741_v21 = vld [vmem:[#allocation9_spill] sm:$0xff] }
 0x47f   :  { %v6726_v51 = vpop.permute.xlu1 %6725  ;;  %5734 = vmatprep.mubr.msk.f32.mxu0 %vm95_vm11, %v8995_v61  ;;  %v4086_v56 = vsel %vm1858_vm14, %v4070_v59, %v6722_v5  ;;  %v4038_v25 = vsel %vm1858_vm14, %v4022_v37, %v6723_v60  ;;  %v6732_v61 = vunpack.i.l.bf16 %v6731_v0 }
 0x480   :  { %v6728_v58 = vunpack.i.h.bf16 %v6726_v51  ;;  %v6727_v18 = vunpack.i.l.bf16 %v6726_v51  ;;  %4313 = vmatprep.mubr.f32.mxu1 %v4086_v56  ;;  %v9742_v56 = vld [vmem:[#allocation12_spill] sm:$0xff] }
 0x482   :  { %4314 = vmatmul.mubr.f32.gmra.mrb[70].mxu1 %v4038_v25  ;;  %5735 = vmatmul.mubr.msk.f32.gmra.mrb[80].mxu0 %vm95_vm11, %v8978_v22  ;;  %v4055_v4 = vsel %vm95_vm11, %v9028_v8, %v6727_v18  ;;  %v4007_v11 = vsel %vm95_vm11, %v9002_v53, %v6728_v58  ;;  %v5380_v31 = vpop.f32.mrb[40].mxu0  ;;  %v9743_v18 = vld [vmem:[#allocation11_spill] sm:$0xff] }
 0x483   :  { %v6736_v36 = vpop.permute.xlu1 %6735  ;;  %5737 = vmatprep.mubr.msk.f32.mxu0 %vm95_vm11, %v9031_v55  ;;  %v5381_v38 = vpop.f32.mrb[41].mxu0  ;;  %v4071_v33 = vsel %vm1841_vm13, %v4055_v4, %v6732_v61  ;;  %v4023_v22 = vsel %vm1841_vm13, %v4007_v11, %v6733_v34  ;;  %v3607_v55 = vld [vmem:[#allocation5 + $0x132] sm:$0xff] }
 0x484   :  { %v6738_v16 = vunpack.i.h.bf16 %v6736_v36  ;;  %v6737_v49 = vunpack.i.l.bf16 %v6736_v36  ;;  %v5382_v45 = vadd.f32 %v5381_v38, %v5380_v31  ;;  %v4485_v38 = vld [vmem:[%s9704_s1] sm:$0xff] }
 0x486   :  { %5738 = vmatmul.mubr.msk.f32.gmra.mrb[82].mxu0 %vm95_vm11, %v9016_v13  ;;  %v4087_v53 = vsel %vm1858_vm14, %v4071_v33, %v6737_v49  ;;  %v4039_v8 = vsel %vm1858_vm14, %v4023_v22, %v6738_v16  ;;  %v3125_v12 = vadd.f32 %v5382_v45, %v9289_v28 }
 0x487   :  { %v5383_v62 = vpop.f32.mrb[42].mxu0  ;;  %4318 = vmatprep.mubr.f32.mxu1 %v4087_v53  ;;  %5740 = vmatprep.mubr.msk.f32.mxu0 %vm95_vm11, %v9055_v54 }
 0x488   :  { %v5384_v44 = vpop.f32.mrb[43].mxu0  ;;  %4319 = vmatmul.mubr.f32.gmra.mrb[72].mxu1 %v4039_v8  ;;  %v9365_v6 = vadd.f32 %v8975_v17, %v3125_v12 }
 0x489   :  { %v5385_v43 = vadd.f32 %v5384_v44, %v5383_v62  ;;  %v9367_v52 = vpop.f32.mrb[36].mxu1  ;;  %v9744_v62 = vmov 0.0  }
 0x48a   :  { %5741 = vmatmul.mubr.msk.f32.gmra.mrb[84].mxu0 %vm95_vm11, %v3607_v55  ;;  %v9371_v57 = vpop.f32.mrb[37].mxu1  ;;  %221 = vst.msk [vmem:[#allocation6 + $0x18] sm:$0x3f] %vm217_vm15, %v9744_v62  ;;  %222 = vst.msk [vmem:[#allocation6 + $0x20] sm:$0x3f] %vm217_vm15, %v9744_v62 }
 0x48b   :  { %v3130_v13 = vadd.f32 %v5385_v43, %v9289_v28  ;;  %5775 = vmatprep.mubr.f32.mxu0 %v4485_v38  ;;  %218 = vst.msk [vmem:[#allocation6] sm:$0x3f] %vm217_vm15, %v9744_v62  ;;  %219 = vst.msk [vmem:[#allocation6 + $0x8] sm:$0x3f] %vm217_vm15, %v9744_v62 }
 0x48c   :  { %220 = vst.msk [vmem:[#allocation6 + $0x10] sm:$0x3f] %vm217_vm15, %v9744_v62  ;;  %223 = vst.msk [vmem:[#allocation6 + $0x28] sm:$0x3f] %vm217_vm15, %v9744_v62 }
 0x48d   :  { %v9374_v23 = vadd.f32 %v9067_v35, %v3130_v13  ;;  %224 = vst.msk [vmem:[#allocation6 + $0x30] sm:$0x3f] %vm217_vm15, %v9744_v62  ;;  %225 = vst.msk [vmem:[#allocation6 + $0x38] sm:$0x3f] %vm217_vm15, %v9744_v62 }
 0x48e   :  { %226 = vst.msk [vmem:[#allocation6 + $0x40] sm:$0x3f] %vm217_vm15, %v9744_v62  ;;  %227 = vst.msk [vmem:[#allocation6 + $0x48] sm:$0x3f] %vm217_vm15, %v9744_v62 }
 0x48f   :  { %228 = vst.msk [vmem:[#allocation6 + $0x50] sm:$0x3f] %vm217_vm15, %v9744_v62  ;;  %229 = vst.msk [vmem:[#allocation6 + $0x58] sm:$0x3f] %vm217_vm15, %v9744_v62 }
 0x4a4   :  { %v5386_v46 = vpop.f32.mrb[44].mxu0 }
 0x4a5   :  { %v5387_v54 = vpop.f32.mrb[45].mxu0 }
 0x4a6   :  { %v5388_v47 = vadd.f32 %v5387_v54, %v5386_v46  ;;  %v9376_v48 = vpop.f32.mrb[38].mxu1 }
 0x4a7   :  { %v9379_v14 = vpop.f32.mrb[39].mxu1 }
 0x4a8   :  { %v3135_v1 = vadd.f32 %v5388_v47, %v9289_v28  ;;  %v5389_v17 = vpop.f32.mrb[46].mxu0 }
 0x4a9   :  { %v5390_v29 = vpop.f32.mrb[47].mxu0 }
 0x4aa   :  { %v5391_v19 = vadd.f32 %v5390_v29, %v5389_v17  ;;  %v9382_v50 = vadd.f32 %v9063_v32, %v3135_v1 }
 0x4ac   :  { %v3140_v63 = vadd.f32 %v5391_v19, %v9289_v28  ;;  %v5392_v41 = vpop.f32.mrb[48].mxu0 }
 0x4ad   :  { %v9385_v35 = vpop.f32.mrb[40].mxu1  ;;  %v5393_v7 = vpop.f32.mrb[49].mxu0 }
 0x4ae   :  { %v9387_v10 = vpop.f32.mrb[41].mxu1  ;;  %v9390_v27 = vadd.f32 %v9740_v42, %v3140_v63  ;;  %v5394_v3 = vadd.f32 %v5393_v7, %v5392_v41 }
 0x4b0   :  { %v3145_v20 = vadd.f32 %v5394_v3, %v9289_v28 }
 0x4b2   :  { %v9394_v40 = vadd.f32 %v9741_v21, %v3145_v20 }
 0x4b6   :  { %v5395_v39 = vpop.f32.mrb[50].mxu0 }
 0x4b7   :  { %v5396_v32 = vpop.f32.mrb[51].mxu0 }
 0x4b8   :  { %v5397_v5 = vadd.f32 %v5396_v32, %v5395_v39 }
 0x4b9   :  { %v5477_v26 = vpop.f32.mrb[42].mxu1 }
 0x4ba   :  { %v3150_v2 = vadd.f32 %v5397_v5, %v9289_v28  ;;  %v5398_v9 = vpop.f32.mrb[52].mxu0  ;;  %v5478_v59 = vpop.f32.mrb[43].mxu1 }
 0x4bb   :  { %v9397_v37 = vadd.f32 %v5478_v59, %v5477_v26  ;;  %v5399_v60 = vpop.f32.mrb[53].mxu0 }
 0x4bc   :  { %v5400_v51 = vadd.f32 %v5399_v60, %v5398_v9  ;;  %v9400_v0 = vadd.f32 %v9742_v56, %v3150_v2 }
 0x4be   :  { %v3155_v58 = vadd.f32 %v5400_v51, %v9289_v28 }
 0x4c0   :  { %v9404_v25 = vadd.f32 %v9743_v18, %v3155_v58 }
 0x4e1   :  { %v5401_v4 = vpop.f32.mrb[54].mxu0 }
 0x4e2   :  { %v5480_v11 = vpop.f32.mrb[44].mxu1  ;;  %v5402_v34 = vpop.f32.mrb[55].mxu0 }
 0x4e3   :  { %v5403_v61 = vadd.f32 %v5402_v34, %v5401_v4  ;;  %v5481_v31 = vpop.f32.mrb[45].mxu1 }
 0x4e4   :  { %v9406_v36 = vadd.f32 %v5481_v31, %v5480_v11 }
 0x4e5   :  { %v3160_v16 = vadd.f32 %v5403_v61, %v9289_v28 }
 0x4e7   :  { %v9410_v49 = vadd.f32 %v9279_v15, %v3160_v16 }
 0x4ed   :  { %v5404_v45 = vpop.f32.mrb[56].mxu0  ;;  %v5483_v33 = vpop.f32.mrb[46].mxu1 }
 0x4ee   :  { %v5405_v22 = vpop.f32.mrb[57].mxu0  ;;  %v5484_v53 = vpop.f32.mrb[47].mxu1 }
 0x4ef   :  { %v5406_v8 = vadd.f32 %v5405_v22, %v5404_v45  ;;  %v9415_v12 = vadd.f32 %v5484_v53, %v5483_v33 }
 0x4f1   :  { %v3165_v15 = vadd.f32 %v5406_v8, %v9289_v28 }
 0x4f3   :  { %v9431_v55 = vadd.f32 %v9273_v24, %v3165_v15 }
 0x501   :  { %v5407_v44 = vpop.f32.mrb[58].mxu0  ;;  %v5486_v43 = vpop.f32.mrb[48].mxu1 }
 0x502   :  { %v5408_v13 = vpop.f32.mrb[59].mxu0  ;;  %v5487_v46 = vpop.f32.mrb[49].mxu1 }
 0x503   :  { %v5409_v54 = vadd.f32 %v5408_v13, %v5407_v44  ;;  %v5488_v47 = vadd.f32 %v5487_v46, %v5486_v43 }
 0x505   :  { %v3170_v1 = vadd.f32 %v5409_v54, %v9289_v28 }
 0x507   :  { %v9435_v17 = vadd.f32 %v9371_v57, %v3170_v1 }
 0x50d   :  { %v5410_v29 = vpop.f32.mrb[60].mxu0  ;;  %v5489_v19 = vpop.f32.mrb[50].mxu1 }
 0x50e   :  { %v5411_v63 = vpop.f32.mrb[61].mxu0  ;;  %v5490_v41 = vpop.f32.mrb[51].mxu1 }
 0x50f   :  { %v5412_v7 = vadd.f32 %v5411_v63, %v5410_v29  ;;  %v9437_v42 = vadd.f32 %v5490_v41, %v5489_v19 }
 0x511   :  { %v3175_v24 = vadd.f32 %v5412_v7, %v9289_v28 }
 0x513   :  { %v9441_v3 = vadd.f32 %v9367_v52, %v3175_v24 }
 0x51e   :  { %v5413_v20 = vpop.f32.mrb[62].mxu0  ;;  %v5492_v21 = vpop.f32.mrb[52].mxu1 }
 0x51f   :  { %v5414_v39 = vpop.f32.mrb[63].mxu0  ;;  %v5493_v32 = vpop.f32.mrb[53].mxu1 }
 0x520   :  { %v5415_v5 = vadd.f32 %v5414_v39, %v5413_v20  ;;  %v5494_v26 = vadd.f32 %v5493_v32, %v5492_v21 }
 0x522   :  { %v3180_v57 = vadd.f32 %v5415_v5, %v9289_v28 }
 0x524   :  { %v9445_v2 = vadd.f32 %v9379_v14, %v3180_v57 }
 0x52b   :  { %v5416_v9 = vpop.f32.mrb[64].mxu0  ;;  %v5495_v59 = vpop.f32.mrb[54].mxu1 }
 0x52c   :  { %v5417_v60 = vpop.f32.mrb[65].mxu0  ;;  %v5496_v51 = vpop.f32.mrb[55].mxu1 }
 0x52d   :  { %v5418_v56 = vadd.f32 %v5417_v60, %v5416_v9  ;;  %v5497_v58 = vadd.f32 %v5496_v51, %v5495_v59 }
 0x52f   :  { %v3185_v52 = vadd.f32 %v5418_v56, %v9289_v28 }
 0x531   :  { %v9449_v18 = vadd.f32 %v9376_v48, %v3185_v52  ;;  %v9458_v48 = vld [vmem:[%s9705_s9] ss:$0 sm:$0xff] }
 0x532   :  { %v4251_v15 = vadd.f32 %v9406_v36, %v9458_v48  ;;  %v4261_v7 = vadd.f32 %v5488_v47, %v9458_v48  ;;  %v4271_v59 = vadd.f32 %v5494_v26, %v9458_v48  ;;  %v4266_v47 = vadd.f32 %v9437_v42, %v9458_v48 }
 0x537   :  { %v5419_v4 = vpop.f32.mrb[66].mxu0  ;;  %v5498_v11 = vpop.f32.mrb[56].mxu1 }
 0x538   :  { %v5420_v34 = vpop.f32.mrb[67].mxu0  ;;  %v5499_v61 = vpop.f32.mrb[57].mxu1 }
 0x539   :  { %v5421_v31 = vadd.f32 %v5420_v34, %v5419_v4  ;;  %v5500_v16 = vadd.f32 %v5499_v61, %v5498_v11 }
 0x53b   :  { %v3190_v14 = vadd.f32 %v5421_v31, %v9289_v28  ;;  %v4281_v31 = vadd.f32 %v5500_v16, %v9458_v48 }
 0x53d   :  { %v5422_v38 = vpop.f32.mrb[68].mxu0  ;;  %v5501_v45 = vpop.f32.mrb[58].mxu1  ;;  %v9453_v33 = vadd.f32 %v9387_v10, %v3190_v14  ;;  %v4246_v10 = vadd.f32 %v9397_v37, %v9458_v48 }
 0x53e   :  { %v5423_v22 = vpop.f32.mrb[69].mxu0  ;;  %v5502_v53 = vpop.f32.mrb[59].mxu1 }
 0x53f   :  { %v5424_v8 = vadd.f32 %v5423_v22, %v5422_v38  ;;  %v5503_v62 = vadd.f32 %v5502_v53, %v5501_v45  ;;  %v4276_v45 = vadd.f32 %v5497_v58, %v9458_v48 }
 0x541   :  { %v3195_v44 = vadd.f32 %v5424_v8, %v9289_v28  ;;  %v5504_v43 = vpop.f32.mrb[60].mxu1  ;;  %v5721_v13 = vpop.f32.mrb[70].mxu0  ;;  %v4256_v28 = vadd.f32 %v9415_v12, %v9458_v48  ;;  %v4286_v16 = vadd.f32 %v5503_v62, %v9458_v48 }
 0x542   :  { %v4396_v46 = vadd.f32 %v5721_v13, %v4251_v15  ;;  %v5505_v54 = vpop.f32.mrb[61].mxu1  ;;  %v4390_v1 = vpop.f32.mrb[71].mxu0 }
 0x543   :  { %v5506_v29 = vadd.f32 %v5505_v54, %v5504_v43  ;;  %v4391_v19 = vadd.f32 %v4390_v1, %v4246_v10  ;;  %v9466_v63 = vadd.f32 %v9385_v35, %v3195_v44 }
 0x544   :  { %v4470_v41 = vmax.f32 %v4396_v46, 0.0 }
 0x545   :  { %v4469_v24 = vmax.f32 %v4391_v19, 0.0  ;;  %v5507_v36 = vpop.f32.mrb[62].mxu1  ;;  %v5724_v20 = vpop.f32.mrb[72].mxu0  ;;  %v4291_v13 = vadd.f32 %v5506_v29, %v9458_v48 }
 0x546   :  { %v4406_v21 = vadd.f32 %v5724_v20, %v4261_v7  ;;  %v5508_v39 = vpop.f32.mrb[63].mxu1  ;;  %v4400_v37 = vpop.f32.mrb[73].mxu0 }
 0x547   :  { %v5919_v32 = vpack.c.bf16 %v4470_v41, %v4469_v24  ;;  %v5509_v5 = vadd.f32 %v5508_v39, %v5507_v36  ;;  %v4401_v57 = vadd.f32 %v4400_v37, %v4256_v28 }
 0x548   :  { %v4472_v9 = vmax.f32 %v4406_v21, 0.0 }
 0x549   :  { %v4471_v35 = vmax.f32 %v4401_v57, 0.0  ;;  %v5510_v60 = vpop.f32.mrb[64].mxu1  ;;  %v5727_v51 = vpop.f32.mrb[74].mxu0  ;;  %5920 = vmatprep.subr.bf16.mxu0 %v5919_v32  ;;  %v4296_v29 = vadd.f32 %v5509_v5, %v9458_v48 }
 0x54a   :  { %v4416_v56 = vadd.f32 %v5727_v51, %v4271_v59  ;;  %v5511_v52 = vpop.f32.mrb[65].mxu1  ;;  %v4410_v4 = vpop.f32.mrb[75].mxu0  ;;  %5922 = vmatpush3.bf16.msra.mxu0 %v5919_v32 }
 0x54b   :  { %v5923_v12 = vpack.c.bf16 %v4472_v9, %v4471_v35  ;;  %v5512_v11 = vadd.f32 %v5511_v52, %v5510_v60  ;;  %v4411_v34 = vadd.f32 %v4410_v4, %v4266_v47 }
 0x54c   :  { %v4474_v61 = vmax.f32 %v4416_v56, 0.0 }
 0x54d   :  { %v4473_v14 = vmax.f32 %v4411_v34, 0.0  ;;  %v5513_v38 = vpop.f32.mrb[66].mxu1  ;;  %v5730_v26 = vpop.f32.mrb[76].mxu0  ;;  %5924 = vmatprep.subr.bf16.mxu0 %v5923_v12  ;;  %v4301_v20 = vadd.f32 %v5512_v11, %v9458_v48 }
 0x54e   :  { %v4426_v22 = vadd.f32 %v5730_v26, %v4281_v31  ;;  %v5514_v53 = vpop.f32.mrb[67].mxu1  ;;  %v4420_v8 = vpop.f32.mrb[77].mxu0  ;;  %5926 = vmatpush3.bf16.msra.mxu0 %v5923_v12 }
 0x54f   :  { %v5927_v42 = vpack.c.bf16 %v4474_v61, %v4473_v14  ;;  %v5515_v15 = vadd.f32 %v5514_v53, %v5513_v38  ;;  %v4421_v44 = vadd.f32 %v4420_v8, %v4276_v45 }
 0x550   :  { %v4476_v43 = vmax.f32 %v4426_v22, 0.0 }
 0x551   :  { %v4475_v10 = vmax.f32 %v4421_v44, 0.0  ;;  %v5516_v46 = vpop.f32.mrb[68].mxu1  ;;  %v5733_v54 = vpop.f32.mrb[78].mxu0  ;;  %5928 = vmatprep.subr.bf16.mxu0 %v5927_v42  ;;  %v4306_v56 = vadd.f32 %v5515_v15, %v9458_v48 }
 0x552   :  { %v4436_v1 = vadd.f32 %v5733_v54, %v4291_v13  ;;  %v5517_v19 = vpop.f32.mrb[69].mxu1  ;;  %v4430_v41 = vpop.f32.mrb[79].mxu0  ;;  %5930 = vmatpush3.bf16.msra.mxu0 %v5927_v42  ;;  %v4486_v13 = vld [vmem:[%s9704_s1 + $0x8] sm:$0xff] }
 0x553   :  { %v5931_v58 = vpack.c.bf16 %v4476_v43, %v4475_v10  ;;  %v5518_v7 = vadd.f32 %v5517_v19, %v5516_v46  ;;  %v4431_v24 = vadd.f32 %v4430_v41, %v4286_v16  ;;  %v4487_v10 = vld [vmem:[%s9704_s1 + $0x10] sm:$0xff]  ;;  %v4913_v46 = vld [vmem:[%s9706_s10 + $0x100] sm:$0xff]  ;;  %v4914_v54 = vld [vmem:[%s9706_s10 + $0x108] sm:$0xff] }
 0x554   :  { %v4478_v36 = vmax.f32 %v4436_v1, 0.0  ;;  %v5983_v16 = vpack.c.bf16 %v4914_v54, %v4913_v46  ;;  %v4915_v1 = vld [vmem:[%s9706_s10 + $0x110] sm:$0xff]  ;;  %v4916_v19 = vld [vmem:[%s9706_s10 + $0x118] sm:$0xff] }
 0x555   :  { %v4477_v28 = vmax.f32 %v4431_v24, 0.0  ;;  %v5519_v21 = vpop.f32.mrb[70].mxu1  ;;  %v5736_v39 = vpop.f32.mrb[80].mxu0  ;;  %5932 = vmatprep.subr.bf16.mxu0 %v5931_v58  ;;  %v4311_v60 = vadd.f32 %v5518_v7, %v9458_v48  ;;  %v5987_v41 = vpack.c.bf16 %v4916_v19, %v4915_v1  ;;  %v4898_v7 = vld [vmem:[%s9706_s10 + $0x88] sm:$0xff]  ;;  %v4881_v24 = vld [vmem:[%s9706_s10] sm:$0xff] }
 0x556   :  { %v4446_v37 = vadd.f32 %v5736_v39, %v4301_v20  ;;  %v5520_v32 = vpop.f32.mrb[71].mxu1  ;;  %v4440_v57 = vpop.f32.mrb[81].mxu0  ;;  %5934 = vmatpush3.bf16.msra.mxu0 %v5931_v58  ;;  %v4897_v58 = vld [vmem:[%s9706_s10 + $0x80] sm:$0xff]  ;;  %v4882_v20 = vld [vmem:[%s9706_s10 + $0x8] sm:$0xff]  ;;  %v4900_v39 = vld [vmem:[%s9706_s10 + $0x98] sm:$0xff] }
 0x557   :  { %v5935_v62 = vpack.c.bf16 %v4478_v36, %v4477_v28  ;;  %v5521_v9 = vadd.f32 %v5520_v32, %v5519_v21  ;;  %v4441_v59 = vadd.f32 %v4440_v57, %v4296_v29  ;;  %v5951_v36 = vpack.c.bf16 %v4898_v7, %v4897_v58  ;;  %v4899_v21 = vld [vmem:[%s9706_s10 + $0x90] sm:$0xff]  ;;  %v4884_v32 = vld [vmem:[%s9706_s10 + $0x18] sm:$0xff] }
 0x558   :  { %v4480_v35 = vmax.f32 %v4446_v37, 0.0  ;;  %v5953_v28 = vpack.c.bf16 %v4882_v20, %v4881_v24  ;;  %v4883_v29 = vld [vmem:[%s9706_s10 + $0x10] sm:$0xff]  ;;  %v5955_v37 = vpack.c.bf16 %v4900_v39, %v4899_v21 }
 0x559   :  { %v4479_v51 = vmax.f32 %v4441_v59, 0.0  ;;  %v5739_v47 = vpop.f32.mrb[82].mxu0  ;;  %5936 = vmatprep.subr.bf16.mxu0 %v5935_v62  ;;  %v4316_v26 = vadd.f32 %v5521_v9, %v9458_v48  ;;  %5952 = vmatprep.subr.bf16.mxu1 %v5951_v36  ;;  %v5957_v57 = vpack.c.bf16 %v4884_v32, %v4883_v29  ;;  %v4902_v9 = vld [vmem:[%s9706_s10 + $0xa8] sm:$0xff]  ;;  %v4885_v59 = vld [vmem:[%s9706_s10 + $0x20] sm:$0xff] }
 0x55a   :  { %v4456_v52 = vadd.f32 %v5739_v47, %v4311_v60  ;;  %v4450_v4 = vpop.f32.mrb[83].mxu0  ;;  %5938 = vmatpush3.bf16.msra.mxu0 %v5935_v62  ;;  %5954 = vmatpush3.bf16.msra.mxu1 %v5953_v28  ;;  %v4901_v62 = vld [vmem:[%s9706_s10 + $0xa0] sm:$0xff]  ;;  %v4886_v60 = vld [vmem:[%s9706_s10 + $0x28] sm:$0xff]  ;;  %v4903_v47 = vld [vmem:[%s9706_s10 + $0xb0] sm:$0xff] }
 0x55b   :  { %v5939_v12 = vpack.c.bf16 %v4480_v35, %v4479_v51  ;;  %v4451_v5 = vadd.f32 %v4450_v4, %v4306_v56  ;;  %v5522_v11 = vpop.f32.mrb[72].mxu1  ;;  %5956 = vmatprep.subr.bf16.mxu1 %v5955_v37  ;;  %v5959_v35 = vpack.c.bf16 %v4902_v9, %v4901_v62  ;;  %v5961_v51 = vpack.c.bf16 %v4886_v60, %v4885_v59  ;;  %v4904_v56 = vld [vmem:[%s9706_s10 + $0xb8] sm:$0xff] }
 0x55c   :  { %v4482_v34 = vmax.f32 %v4456_v52, 0.0  ;;  %v5523_v61 = vpop.f32.mrb[73].mxu1  ;;  %v4887_v52 = vld [vmem:[%s9706_s10 + $0x30] sm:$0xff]  ;;  %v5963_v4 = vpack.c.bf16 %v4904_v56, %v4903_v47 }
 0x55d   :  { %v4481_v31 = vmax.f32 %v4451_v5, 0.0  ;;  %v5524_v14 = vadd.f32 %v5523_v61, %v5522_v11  ;;  %v5742_v38 = vpop.f32.mrb[84].mxu0  ;;  %5940 = vmatprep.subr.bf16.mxu0 %v5939_v12  ;;  %v4905_v11 = vld [vmem:[%s9706_s10 + $0xc0] sm:$0xff] }
 0x55e   :  { %v4460_v45 = vpop.f32.mrb[85].mxu0  ;;  %5942 = vmatpush3.bf16.msra.mxu0 %v5939_v12  ;;  %5958 = vmatpush3.bf16.msra.mxu1 %v5957_v57  ;;  %v4888_v12 = vld [vmem:[%s9706_s10 + $0x38] sm:$0xff]  ;;  %v4889_v61 = vld [vmem:[%s9706_s10 + $0x40] sm:$0xff] }
 0x55f   :  { %v5943_v22 = vpack.c.bf16 %v4482_v34, %v4481_v31  ;;  %v4321_v53 = vadd.f32 %v5524_v14, %v9458_v48  ;;  %v4461_v8 = vadd.f32 %v4460_v45, %v4316_v26  ;;  %v4488_v48 = vld [vmem:[%s9704_s1 + $0x18] sm:$0xff]  ;;  %5960 = vmatprep.subr.bf16.mxu1 %v5959_v35  ;;  %v5965_v5 = vpack.c.bf16 %v4888_v12, %v4887_v52  ;;  %v4906_v34 = vld [vmem:[%s9706_s10 + $0xc8] sm:$0xff]  ;;  %v4907_v26 = vld [vmem:[%s9706_s10 + $0xd0] sm:$0xff] }
 0x560   :  { %v5967_v31 = vpack.c.bf16 %v4906_v34, %v4905_v11  ;;  %v4890_v14 = vld [vmem:[%s9706_s10 + $0x48] sm:$0xff]  ;;  %v4908_v45 = vld [vmem:[%s9706_s10 + $0xd8] sm:$0xff] }
 0x561   :  { %v4466_v42 = vadd.f32 %v5742_v38, %v4321_v53  ;;  %5944 = vmatprep.subr.bf16.mxu0 %v5943_v22  ;;  %v4483_v44 = vmax.f32 %v4461_v8, 0.0  ;;  %v5969_v38 = vpack.c.bf16 %v4890_v14, %v4889_v61  ;;  %v5971_v53 = vpack.c.bf16 %v4908_v45, %v4907_v26  ;;  %v4892_v8 = vld [vmem:[%s9706_s10 + $0x58] sm:$0xff] }
 0x562   :  { %5946 = vmatpush3.bf16.msra.mxu0 %v5943_v22  ;;  %5962 = vmatpush3.bf16.msra.mxu1 %v5961_v51  ;;  %v4891_v22 = vld [vmem:[%s9706_s10 + $0x50] sm:$0xff] }
 0x563   :  { %v4484_v15 = vmax.f32 %v4466_v42, 0.0  ;;  %5964 = vmatprep.subr.bf16.mxu1 %v5963_v4  ;;  %v5973_v42 = vpack.c.bf16 %v4892_v8, %v4891_v22 }
 0x565   :  { %v5947_v43 = vpack.c.bf16 %v4484_v15, %v4483_v44  ;;  %v4909_v15 = vld [vmem:[%s9706_s10 + $0xe0] sm:$0xff]  ;;  %v4910_v44 = vld [vmem:[%s9706_s10 + $0xe8] sm:$0xff] }
 0x566   :  { %5966 = vmatpush3.bf16.msra.mxu1 %v5965_v5 }
 0x567   :  { %5948 = vmatprep.subr.bf16.mxu0 %v5947_v43  ;;  %5968 = vmatprep.subr.bf16.mxu1 %v5967_v31 }
 0x568   :  { %5950 = vmatpush3.bf16.msra.mxu0 %v5947_v43  ;;  %v4893_v43 = vld [vmem:[%s9706_s10 + $0x60] sm:$0xff] }
 0x569   :  { %5984 = vmatprep.subr.bf16.mxu0 %v5983_v16 }
 0x56a   :  { %5970 = vmatpush3.bf16.msra.mxu1 %v5969_v38 }
 0x56b   :  { %5776 = vmatmul.mubr.f32.vlgmr.msra.gmra.mrb[86].mxu0 %v4486_v13  ;;  %5972 = vmatprep.subr.bf16.mxu1 %v5971_v53 }
 0x56c   :  { %5778 = vmatprep.mubr.f32.mxu0 %v4487_v10  ;;  %5986 = vmatpush3.bf16.msra.mxu0 %v5983_v16  ;;  %v5975_v10 = vpack.c.bf16 %v4910_v44, %v4909_v15 }
 0x56d   :  { %5988 = vmatprep.subr.bf16.mxu0 %v5987_v41 }
 0x56e   :  { %5974 = vmatpush3.bf16.msra.mxu1 %v5973_v42 }
 0x56f   :  { %5779 = vmatmul.mubr.f32.gmra.mrb[88].mxu0 %v4488_v48  ;;  %v4894_v48 = vld [vmem:[%s9706_s10 + $0x68] sm:$0xff]  ;;  %5976 = vmatprep.subr.bf16.mxu1 %v5975_v10 }
 0x570   :  { %5990 = vmatpush3.bf16.msra.mxu0 %v5987_v41  ;;  %v5977_v16 = vpack.c.bf16 %v4894_v48, %v4893_v43  ;;  %v4911_v48 = vld [vmem:[%s9706_s10 + $0xf0] sm:$0xff] }
 0x572   :  { %5978 = vmatpush3.bf16.msra.mxu1 %v5977_v16  ;;  %v4895_v16 = vld [vmem:[%s9706_s10 + $0x70] sm:$0xff] }
 0x63e   :  { %v5777_v13 = vpop.f32.mrb[86].mxu0 }
 0x63f   :  { %v4579_v46 = vcombine.high %v5777_v13, %v5777_v13  ;;  %4590 = vst.msk [vmem:[#allocation6 + $0x19] sm:$0xf] %vm4587_vm0, %v5777_v13  ;;  %v4555_v54 = vpop.f32.mrb[87].mxu0 }
 0x640   :  { %v4578_v1 = vcombine.high %v4555_v54, %v4555_v54  ;;  %4588 = vst.msk [vmem:[#allocation6 + $0x9] sm:$0xf] %vm4587_vm0, %v4555_v54 }
 0x641   :  { %4591 = vst.msk [vmem:[#allocation6 + $0x21] sm:$0xf] %vm4587_vm0, %v4579_v46  ;;  %v4912_v46 = vld [vmem:[%s9706_s10 + $0xf8] sm:$0xff] }
 0x642   :  { %4589 = vst.msk [vmem:[#allocation6 + $0x11] sm:$0xf] %vm4587_vm0, %v4578_v1  ;;  %v5780_v19 = vpop.f32.mrb[88].mxu0  ;;  %v5979_v54 = vpack.c.bf16 %v4912_v46, %v4911_v48  ;;  %v4896_v1 = vld [vmem:[%s9706_s10 + $0x78] sm:$0xff] }
 0x643   :  { %v4581_v41 = vcombine.high %v5780_v19, %v5780_v19  ;;  %4594 = vst.msk [vmem:[#allocation6 + $0x49] sm:$0xf] %vm4587_vm0, %v5780_v19  ;;  %v4565_v58 = vpop.f32.mrb[89].mxu0 }
 0x644   :  { %v4580_v7 = vcombine.high %v4565_v58, %v4565_v58  ;;  %4592 = vst.msk [vmem:[#allocation6 + $0x39] sm:$0xf] %vm4587_vm0, %v4565_v58  ;;  %5980 = vmatprep.subr.bf16.mxu1 %v5979_v54 }
 0x645   :  { %4595 = vst.msk [vmem:[#allocation6 + $0x51] sm:$0xf] %vm4587_vm0, %v4581_v41  ;;  %v5981_v41 = vpack.c.bf16 %v4896_v1, %v4895_v16 }
 0x646   :  { %4593 = vst.msk [vmem:[#allocation6 + $0x41] sm:$0xf] %vm4587_vm0, %v4580_v7 }
 0x647   :  { %v6803_v28 = vld [vmem:[#allocation6 + $0x1] ss:$8 sps:$4 sm:$0xff]   ;;  %5982 = vmatpush3.bf16.msra.mxu1 %v5981_v41 }
 0x648   :  { %v6800_v24 = vld [vmem:[#allocation6 + $0x18] ss:$8 sps:$4 sm:$0xff]  }
 0x649   :  { %v6799_v36 = vld [vmem:[#allocation6 + $0x12] ss:$8 sps:$4 sm:$0xff]   ;;  %v6801_v20 = vld [vmem:[#allocation6 + $0x21] ss:$8 sps:$4 sm:$0xff]  }
 0x64a   :  { %v6802_v21 = vld [vmem:[#allocation6 + $0x22] ss:$8 sps:$4 sm:$0xff]   ;;  %5789 = vmatprep.mubr.msk.f32.mxu0 %vm95_vm11, %v6799_v36  ;;  %v6739_v39 = vpack.i.bf16 %v6800_v24, %v6801_v20  ;;  %v6806_v32 = vld [vmem:[#allocation6 + $0x10] ss:$8 sps:$4 sm:$0xff]  }
 0x64b   :  { %v6804_v29 = vld [vmem:[#allocation6 + $0xa] ss:$8 sps:$4 sm:$0xff]   ;;  %5790 = vmatmul.mubr.msk.f32.vlgmr.msra.gmra.mrb[90].mxu0 %vm95_vm11, %v6802_v21  ;;  %v6810_v60 = vld [vmem:[#allocation6 + $0x1a] ss:$8 sps:$4 sm:$0xff]  }
 0x64c   :  { %v6805_v37 = vld [vmem:[#allocation6 + $0x2] ss:$8 sps:$4 sm:$0xff]   ;;  %6740 = vrot.lane.b32.xlu1 %v6739_v39, %s6847_s28  ;;  %v6744_v57 = vpack.i.bf16 %v6803_v28, %v6804_v29  ;;  %v6808_v9 = vld [vmem:[#allocation6 + $0x11] ss:$8 sps:$4 sm:$0xff]  }
 0x64d   :  { %v6807_v62 = vld [vmem:[#allocation6 + $0x8] ss:$8 sps:$4 sm:$0xff]   ;;  %v6749_v59 = vpack.i.bf16 %v6805_v37, %v6806_v32  ;;  %v6818_v14 = vld [vmem:[#allocation6 + $0x3a] ss:$8 sps:$4 sm:$0xff]  }
 0x64e   :  { %6745 = vrot.lane.b32.xlu0 %v6744_v57, %s6846_s27  ;;  %v6809_v35 = vld [vmem:[#allocation6 + $0x11] ss:$8 sps:$4 sm:$0xff]   ;;  %v6754_v51 = vpack.i.bf16 %v6807_v62, %v6808_v9  ;;  %v6812_v56 = vld [vmem:[#allocation6 + $0x20] ss:$8 sps:$4 sm:$0xff]  }
 0x64f   :  { %v6811_v47 = vld [vmem:[#allocation6 + $0x12] ss:$8 sps:$4 sm:$0xff]   ;;  %v6759_v52 = vpack.i.bf16 %v6809_v35, %v6810_v60  ;;  %v6813_v4 = vld [vmem:[#allocation6 + $0x42] ss:$8 sps:$4 sm:$0xff]  }
 0x650   :  { %6750 = vrot.lane.b32.xlu1 %v6749_v59, %s6845_s25  ;;  %v6814_v12 = vld [vmem:[#allocation6 + $0x52] ss:$8 sps:$4 sm:$0xff]   ;;  %v6764_v5 = vpack.i.bf16 %v6811_v47, %v6812_v56  ;;  %5792 = vmatprep.mubr.msk.f32.mxu0 %vm95_vm11, %v6813_v4  ;;  %v6816_v34 = vld [vmem:[#allocation6 + $0x40] ss:$8 sps:$4 sm:$0xff]  }
 0x651   :  { %v6815_v11 = vld [vmem:[#allocation6 + $0x32] ss:$8 sps:$4 sm:$0xff]   ;;  %5793 = vmatmul.mubr.msk.f32.gmra.mrb[92].mxu0 %vm95_vm11, %v6814_v12  ;;  %v6819_v38 = vld [vmem:[#allocation6 + $0x41] ss:$8 sps:$4 sm:$0xff]  }
 0x652   :  { %6755 = vrot.lane.b32.xlu0 %v6754_v51, %s6847_s28  ;;  %v6817_v61 = vld [vmem:[#allocation6 + $0x31] ss:$8 sps:$4 sm:$0xff]   ;;  %v6774_v31 = vpack.i.bf16 %v6815_v11, %v6816_v34  ;;  %v6822_v8 = vld [vmem:[#allocation6 + $0x41] ss:$8 sps:$4 sm:$0xff]  }
 0x653   :  { %v6769_v26 = vpack.i.bf16 %v6817_v61, %v6818_v14  ;;  %v6820_v45 = vld [vmem:[#allocation6 + $0x4a] ss:$8 sps:$4 sm:$0xff]   ;;  %v6821_v22 = vld [vmem:[#allocation6 + $0x38] ss:$8 sps:$4 sm:$0xff]  }
 0x654   :  { %6760 = vrot.lane.b32.xlu1 %v6759_v52, %s6846_s27  ;;  %v6784_v53 = vpack.i.bf16 %v6819_v38, %v6820_v45  ;;  %v6823_v42 = vld [vmem:[#allocation6 + $0x48] ss:$8 sps:$4 sm:$0xff]   ;;  %v6779_v44 = vpack.i.bf16 %v6821_v22, %v6822_v8  ;;  %v6829_v28 = vld [vmem:[#allocation6 + $0x19] ss:$8 sps:$4 sm:$0xff]  }
 0x655   :  { %v6824_v15 = vld [vmem:[#allocation6 + $0x51] ss:$8 sps:$4 sm:$0xff]   ;;  %v6825_v43 = vld [vmem:[#allocation6 + $0x42] ss:$8 sps:$4 sm:$0xff]  }
 0x656   :  { %6765 = vrot.lane.b32.xlu0 %v6764_v5, %s6845_s25  ;;  %v6826_v13 = vld [vmem:[#allocation6 + $0x50] ss:$8 sps:$4 sm:$0xff]   ;;  %v6794_v10 = vpack.i.bf16 %v6823_v42, %v6824_v15  ;;  %v6834_v48 = vld [vmem:[#allocation6 + $0x40] ss:$8 sps:$4 sm:$0xff]  }
 0x657   :  { %v6789_v19 = vpack.i.bf16 %v6825_v43, %v6826_v13  ;;  %v6830_v21 = vld [vmem:[#allocation6 + $0x10] ss:$8 sps:$4 sm:$0xff]  }
 0x658   :  { %6775 = vrot.lane.b32.xlu1 %v6774_v31, %s6845_s25  ;;  %v6831_v12 = vld [vmem:[#allocation6 + $0x39] ss:$8 sps:$4 sm:$0xff]  }
 0x659   :  { %v6832_v5 = vld [vmem:[#allocation6 + $0x30] ss:$8 sps:$4 sm:$0xff]  }
 0x65a   :  { %6770 = vrot.lane.b32.xlu0 %v6769_v26, %s6846_s27 }
 0x65c   :  { %6785 = vrot.lane.b32.xlu1 %v6784_v53, %s6846_s27 }
 0x65e   :  { %6780 = vrot.lane.b32.xlu0 %v6779_v44, %s6847_s28 }
 0x660   :  { %6795 = vrot.lane.b32.xlu1 %v6794_v10, %s6847_s28  ;;  %v6833_v10 = vld [vmem:[#allocation6 + $0x49] ss:$8 sps:$4 sm:$0xff]  }
 0x662   :  { %6790 = vrot.lane.b32.xlu0 %v6789_v19, %s6845_s25 }
 0x680   :  { %3343 = vxpose.xlu0.b32.start [1/16] (narrow) %v9311_v30, 8 }
 0x684   :  { %3344 = vxpose.xlu0.b32.cont [2/16] (narrow) %v9365_v6, 8 }
 0x688   :  { %3345 = vxpose.xlu0.b32.cont [3/16] (narrow) %v9374_v23, 8 }
 0x68c   :  { %3346 = vxpose.xlu0.b32.cont [4/16] (narrow) %v9382_v50, 8 }
 0x690   :  { %3347 = vxpose.xlu0.b32.cont [5/16] (narrow) %v9390_v27, 8  ;;  %v6827_v27 = vld [vmem:[#allocation6] ss:$8 sps:$4 sm:$0xff]  }
 0x694   :  { %3348 = vxpose.xlu0.b32.cont [6/16] (narrow) %v9394_v40, 8 }
 0x698   :  { %3349 = vxpose.xlu0.b32.cont [7/16] (narrow) %v9400_v0, 8  ;;  %v6828_v0 = vld [vmem:[#allocation6 + $0x9] ss:$8 sps:$4 sm:$0xff]  }
 0x69c   :  { %3350 = vxpose.xlu0.b32.cont [8/16] (narrow) %v9404_v25, 8 }
 0x6a0   :  { %3351 = vxpose.xlu0.b32.cont [9/16] (narrow) %v9410_v49, 8 }
 0x6a4   :  { %3352 = vxpose.xlu0.b32.cont [10/16] (narrow) %v9431_v55, 8 }
 0x6a8   :  { %3353 = vxpose.xlu0.b32.cont [11/16] (narrow) %v9435_v17, 8 }
 0x6ac   :  { %3354 = vxpose.xlu0.b32.cont [12/16] (narrow) %v9441_v3, 8 }
 0x6b0   :  { %3355 = vxpose.xlu0.b32.cont [13/16] (narrow) %v9445_v2, 8 }
 0x6b4   :  { %3356 = vxpose.xlu0.b32.cont [14/16] (narrow) %v9449_v18, 8 }
 0x6b8   :  { %3357 = vxpose.xlu0.b32.cont [15/16] (narrow) %v9453_v33, 8 }
 0x6bc   :  { %3358 = vxpose.xlu0.b32.end [16/16] (narrow) %v9466_v63, 8 }
 0x6be   :  { %v6741_v30 = vpop.permute.xlu1 %6740 }
 0x6bf   :  { %v6743_v62 = vunpack.i.h.bf16 %v6741_v30  ;;  %v6742_v9 = vunpack.i.l.bf16 %v6741_v30 }
 0x6c0   :  { %v6746_v6 = vpop.permute.xlu0 %6745 }
 0x6c1   :  { %v6748_v23 = vunpack.i.h.bf16 %v6746_v6  ;;  %v6747_v50 = vunpack.i.l.bf16 %v6746_v6 }
 0x6c2   :  { %v6751_v40 = vpop.permute.xlu1 %6750 }
 0x6c3   :  { %v6753_v25 = vunpack.i.h.bf16 %v6751_v40  ;;  %v6752_v49 = vunpack.i.l.bf16 %v6751_v40  ;;  %v4857_v55 = vsel %vm95_vm11, %v6827_v27, %v6748_v23  ;;  %v4869_v3 = vsel %vm95_vm11, %v6828_v0, %v6747_v50 }
 0x6c4   :  { %v6756_v17 = vpop.permute.xlu0 %6755 }
 0x6c5   :  { %v4861_v2 = vsel %vm1841_vm13, %v4857_v55, %v6753_v25  ;;  %v6758_v18 = vunpack.i.h.bf16 %v6756_v17  ;;  %v6757_v33 = vunpack.i.l.bf16 %v6756_v17  ;;  %v4873_v63 = vsel %vm1841_vm13, %v4869_v3, %v6752_v49  ;;  %v5221_v17 = vld [vmem:[%s9708_s11] ss:$0 sm:$0xff] }
 0x6c6   :  { %v6761_v58 = vpop.permute.xlu1 %6760 }
 0x6c7   :  { %v6763_v7 = vunpack.i.h.bf16 %v6761_v58  ;;  %v6762_v24 = vunpack.i.l.bf16 %v6761_v58  ;;  %v4877_v36 = vsel %vm1858_vm14, %v4873_v63, %v6757_v33  ;;  %v4865_v20 = vsel %vm1858_vm14, %v4861_v2, %v6758_v18 }
 0x6c8   :  { %4996 = vmatprep.mubr.f32.mxu1 %v4877_v36  ;;  %v6766_v39 = vpop.permute.xlu0 %6765 }
 0x6c9   :  { %v6768_v29 = vunpack.i.h.bf16 %v6766_v39  ;;  %v6767_v37 = vunpack.i.l.bf16 %v6766_v39  ;;  %4997 = vmatmul.mubr.f32.vlgmr.msra.gmra.mrb[74].mxu1 %v4865_v20  ;;  %v4870_v32 = vsel %vm95_vm11, %v6829_v28, %v6762_v24  ;;  %v4858_v57 = vsel %vm95_vm11, %v6830_v21, %v6763_v7  ;;  %v5106_v24 = vld [vmem:[%s9709_s12] sm:$0xff] }
 0x6ca   :  { %v6776_v59 = vpop.permute.xlu1 %6775 }
 0x6cb   :  { %v4874_v35 = vsel %vm1841_vm13, %v4870_v32, %v6767_v37  ;;  %v4862_v60 = vsel %vm1841_vm13, %v4858_v57, %v6768_v29  ;;  %v6778_v31 = vunpack.i.h.bf16 %v6776_v59  ;;  %v6777_v14 = vunpack.i.l.bf16 %v6776_v59  ;;  %v5107_v37 = vld [vmem:[%s9709_s12 + $0x8] sm:$0xff] }
 0x6cc   :  { %v6771_v51 = vpop.permute.xlu0 %6770  ;;  %v4878_v47 = vsel %vm1858_vm14, %v4874_v35, %v6742_v9  ;;  %v4866_v56 = vsel %vm1858_vm14, %v4862_v60, %v6743_v62 }
 0x6cd   :  { %v6773_v52 = vunpack.i.h.bf16 %v6771_v51  ;;  %v6772_v4 = vunpack.i.l.bf16 %v6771_v51  ;;  %5001 = vmatprep.mubr.f32.mxu1 %v4878_v47 }
 0x6ce   :  { %5002 = vmatmul.mubr.f32.gmra.mrb[76].mxu1 %v4866_v56  ;;  %v6786_v11 = vpop.permute.xlu1 %6785 }
 0x6cf   :  { %v4871_v34 = vsel %vm95_vm11, %v6831_v12, %v6772_v4  ;;  %v4859_v61 = vsel %vm95_vm11, %v6832_v5, %v6773_v52  ;;  %v6788_v22 = vunpack.i.h.bf16 %v6786_v11  ;;  %v6787_v53 = vunpack.i.l.bf16 %v6786_v11 }
 0x6d0   :  { %v6781_v38 = vpop.permute.xlu0 %6780  ;;  %v4875_v8 = vsel %vm1841_vm13, %v4871_v34, %v6777_v14  ;;  %v4863_v42 = vsel %vm1841_vm13, %v4859_v61, %v6778_v31  ;;  %v23_v31 = vstv %s9710_s13 }
 0x6d1   :  { %v6783_v26 = vunpack.i.h.bf16 %v6781_v38  ;;  %v6782_v45 = vunpack.i.l.bf16 %v6781_v38  ;;  %v4872_v19 = vsel %vm95_vm11, %v6833_v10, %v6787_v53  ;;  %v4860_v41 = vsel %vm95_vm11, %v6834_v48, %v6788_v22  ;;  %24 = vst [vmem:[#allocation8] sm:$0x1] %v23_v31 }
 0x6d2   :  { %v6796_v15 = vpop.permute.xlu1 %6795 }
 0x6d3   :  { %v4879_v44 = vsel %vm1858_vm14, %v4875_v8, %v6782_v45  ;;  %v4867_v43 = vsel %vm1858_vm14, %v4863_v42, %v6783_v26  ;;  %v6798_v16 = vunpack.i.h.bf16 %v6796_v15  ;;  %v6797_v1 = vunpack.i.l.bf16 %v6796_v15 }
 0x6d4   :  { %5006 = vmatprep.mubr.f32.mxu1 %v4879_v44  ;;  %v6791_v13 = vpop.permute.xlu0 %6790 }
 0x6d5   :  { %v6793_v46 = vunpack.i.h.bf16 %v6791_v13  ;;  %v6792_v54 = vunpack.i.l.bf16 %v6791_v13  ;;  %5007 = vmatmul.mubr.f32.gmra.mrb[78].mxu1 %v4867_v43 }
 0x6d7   :  { %v4876_v30 = vsel %vm1841_vm13, %v4872_v19, %v6792_v54  ;;  %v4864_v6 = vsel %vm1841_vm13, %v4860_v41, %v6793_v46 }
 0x6d8   :  { %v4880_v23 = vsel %vm1858_vm14, %v4876_v30, %v6797_v1  ;;  %v4868_v50 = vsel %vm1858_vm14, %v4864_v6, %v6798_v16  ;;  %v5108_v43 = vld [vmem:[#allocation8] sm:$0x1] }
 0x6d9   :  { %5011 = vmatprep.mubr.f32.mxu1 %v4880_v23 }
 0x6da   :  { %5012 = vmatmul.mubr.f32.gmra.mrb[80].mxu1 %v4868_v50 }
 0x700   :  { %v3359_v49 = vpop.trf.xlu0 }
 0x701   :  { %3376 = vst.msk [vmem:[%s9707_s14] sm:$0x1] %vm3375_vm1, %v3359_v49 }
 0x71e   :  { %v5791_v27 = vpop.f32.mrb[90].mxu0 }
 0x71f   :  { %v5083_v40 = vpop.f32.mrb[91].mxu0 }
 0x724   :  { %v5794_v0 = vpop.f32.mrb[92].mxu0 }
 0x725   :  { %v5093_v25 = vpop.f32.mrb[93].mxu0 }
 0x79c   :  { %v5597_v55 = vpop.f32.mrb[74].mxu1 }
 0x79d   :  { %v5598_v3 = vpop.f32.mrb[75].mxu1 }
 0x79e   :  { %v5599_v2 = vadd.f32 %v5598_v3, %v5597_v55 }
 0x7a0   :  { %v4999_v18 = vadd.f32 %v5599_v2, %v5221_v17 }
 0x7a1   :  { %v5600_v33 = vpop.f32.mrb[76].mxu1 }
 0x7a2   :  { %v5084_v63 = vadd.f32 %v5083_v40, %v4999_v18  ;;  %v5601_v58 = vpop.f32.mrb[77].mxu1 }
 0x7a3   :  { %v5602_v7 = vadd.f32 %v5601_v58, %v5600_v33 }
 0x7a4   :  { %v5102_v36 = vmax.f32 %v5084_v63, 0.0 }
 0x7a5   :  { %v5004_v20 = vadd.f32 %v5602_v7, %v5221_v17 }
 0x7a6   :  { %v5109_v28 = vmul.f32 %v5106_v24, %v5102_v36 }
 0x7a7   :  { %v5089_v21 = vadd.f32 %v5791_v27, %v5004_v20 }
 0x7a8   :  { %v5603_v39 = vpop.f32.mrb[78].mxu1  ;;  %v5111_v29 = vsel %vm95_vm11, %v5109_v28, 0.0 }
 0x7a9   :  { %v5103_v32 = vmax.f32 %v5089_v21, 0.0  ;;  %v5604_v57 = vpop.f32.mrb[79].mxu1  ;;  %5112 = vadd.xlane.f32.xlu1 %v5111_v29 }
 0x7aa   :  { %v5605_v62 = vadd.f32 %v5604_v57, %v5603_v39 }
 0x7ab   :  { %v5110_v9 = vmul.f32 %v5107_v37, %v5103_v32 }
 0x7ac   :  { %v5009_v59 = vadd.f32 %v5605_v62, %v5221_v17 }
 0x7ad   :  { %v5606_v35 = vpop.f32.mrb[80].mxu1  ;;  %v5114_v60 = vsel %vm95_vm11, %v5110_v9, 0.0 }
 0x7ae   :  { %v5094_v51 = vadd.f32 %v5093_v25, %v5009_v59  ;;  %5115 = vadd.xlane.f32.xlu1 %v5114_v60  ;;  %v5607_v47 = vpop.f32.mrb[81].mxu1 }
 0x7af   :  { %v5608_v56 = vadd.f32 %v5607_v47, %v5606_v35 }
 0x7b0   :  { %v5104_v52 = vmax.f32 %v5094_v51, 0.0 }
 0x7b1   :  { %v5014_v4 = vadd.f32 %v5608_v56, %v5221_v17 }
 0x7b2   :  { %v5127_v12 = vmul.f32 %v5106_v24, %v5104_v52 }
 0x7b3   :  { %v5099_v5 = vadd.f32 %v5794_v0, %v5014_v4 }
 0x7b4   :  { %v5129_v11 = vsel %vm95_vm11, %v5127_v12, 0.0 }
 0x7b5   :  { %v5105_v34 = vmax.f32 %v5099_v5, 0.0  ;;  %5130 = vadd.xlane.f32.xlu1 %v5129_v11 }
 0x7b7   :  { %v5128_v61 = vmul.f32 %v5107_v37, %v5105_v34 }
 0x7b9   :  { %v5132_v14 = vsel %vm95_vm11, %v5128_v61, 0.0 }
 0x7ba   :  { %5133 = vadd.xlane.f32.xlu1 %v5132_v14 }
 0x7cb   :  { %3378 = vrot.lane.b32.xlu1 %v3359_v49, %s6845_s25 }
 0x836   :  { %v5113_v38 = vpop.xlane.xlu1 %5112 }
 0x83b   :  { %v5116_v26 = vpop.xlane.xlu1 %5115 }
 0x83c   :  { %v5117_v45 = vadd.f32 %v5116_v26, %v5113_v38 }
 0x83e   :  { %v5118_v22 = vrot.slane %v5117_v45, 4 }
 0x840   :  { %v5119_v53 = vadd.f32 %v5118_v22, %v5117_v45 }
 0x842   :  { %v5120_v8 = vrot.slane %v5119_v53, 2  ;;  %v5131_v42 = vpop.xlane.xlu1 %5130 }
 0x844   :  { %v5121_v15 = vadd.f32 %v5120_v8, %v5119_v53 }
 0x846   :  { %v5122_v44 = vrot.slane %v5121_v15, 1 }
 0x847   :  { %v5134_v13 = vpop.xlane.xlu1 %5133 }
 0x848   :  { %v5123_v10 = vadd.f32 %v5122_v44, %v5121_v15  ;;  %v5135_v48 = vadd.f32 %v5134_v13, %v5131_v42 }
 0x84a   :  { %v5124_v46 = vadd.f32 %v5123_v10, %v5108_v43  ;;  %v5136_v54 = vrot.slane %v5135_v48, 4 }
 0x84b   :  { %v3379_v16 = vpop.permute.xlu1 %3378 }
 0x84c   :  { %5126 = vst.msk [vmem:[%s9711_s15] sm:$0x1] %vm5125_vm2, %v5124_v46  ;;  %v5137_v1 = vadd.f32 %v5136_v54, %v5135_v48 }
 0x84d   :  { %3381 = vst.msk [vmem:[%s9707_s14 + $0x1] sm:$0x1] %vm3375_vm1, %v3379_v16 }
 0x84e   :  { %v5138_v19 = vrot.slane %v5137_v1, 2 }
 0x850   :  { %v5139_v41 = vadd.f32 %v5138_v19, %v5137_v1 }
 0x852   :  { %v5140_v30 = vrot.slane %v5139_v41, 1 }
 0x854   :  { %v5141_v6 = vadd.f32 %v5140_v30, %v5139_v41 }
 0x856   :  { %v5142_v23 = vadd.f32 %v5141_v6, %v5108_v43 }
 0x858   :  { %5143 = vst.msk [vmem:[%s9711_s15 + $0x1] sm:$0x1] %vm5125_vm2, %v5142_v23 }

</bundles_post_ra>
